<compile_context>
chip_gen: v6e
topology: v6e:2x2x1
jax: 0.10.0
libtpu: 0.0.40
codegen_flags: <defaults>
</compile_context>

<pallas_src>
import functools

import jax
import jax.numpy as jnp
import numpy as np
from jax import lax
from jax.experimental import pallas as pl
from jax.experimental.pallas import tpu as pltpu

K = 10    # kernel_size
DIL = 2   # dilation
PAD = 9   # padding  -> output spatial size == input spatial size
EPS = 1e-5


def _conv_stats_kernel(x_ref, w_ref, o_ref, s_ref, ss_ref, xflat_ref, slab_ref,
                       *, H, W, Cin):
    """Dilated conv (one sample) + fused BN partial statistics.

    x_ref:  (1, Cin, H*W)        input sample, NCHW with flattened spatial (compute dtype)
    w_ref:  (Cout, K*K*Cin)      tap-major weight matrix (compute dtype)
    o_ref:  (1, Cout, H*W)       conv output (f32, bias-free, flat NCHW)
    s_ref:  (1, Cout, 1)         per-sample per-channel sum of the conv output
    ss_ref: (1, Cout, 1)         per-sample per-channel sum of squares
    xflat_ref: (Cin, LF)         zero-padded input, spatially flattened at stride Wp
    slab_ref:  (K*K*Cin, F)      im2col slab, F = H*Wp
    """
    Wp = W + 2 * PAD
    F = H * Wp  # matmul free (lane) axis: output pixels enumerated at the padded row stride

    # 1) zero-filled flat padded input (VMEM only; no HBM padding round trip)
    xflat_ref[...] = jnp.zeros(xflat_ref.shape, xflat_ref.dtype)
    for h in range(H):
        dst = (PAD + h) * Wp + PAD
        xflat_ref[:, dst:dst + W] = x_ref[0, :, h * W:(h + 1) * W]

    # 2) im2col with static contiguous slices only (no dynamic slice, no reshape)
    for kh in range(K):
        for kw in range(K):
            t = kh * K + kw
            off = DIL * kh * Wp + DIL * kw
            slab_ref[t * Cin:(t + 1) * Cin, :] = xflat_ref[:, off:off + F]

    # 3) single deep-contraction MXU matmul (contraction depth K*K*Cin), f32 accumulation
    acc = jnp.dot(w_ref[...], slab_ref[...],
                  preferred_element_type=jnp.float32)          # (Cout, F) f32

    # 4) compact (drop the Wp-W garbage columns of each row) -> lane-dense flat-NCHW output
    for h in range(H):
        o_ref[0, :, h * W:(h + 1) * W] = acc[:, h * Wp:h * Wp + W]

    # 5) fused BatchNorm batch statistics for this sample (lane reductions over H*W)
    y = o_ref[0]                                               # (Cout, H*W) f32
    s_ref[0] = jnp.sum(y, axis=1, keepdims=True)
    ss_ref[0] = jnp.sum(y * y, axis=1, keepdims=True)


def _bn_relu_kernel(y_ref, scale_ref, shift_ref, o_ref):
    """Streaming affine-normalize + ReLU on one (Cout, hw_blk) tile."""
    y = y_ref[0]                                               # (Cout, hw_blk) f32
    out = y * scale_ref[...] + shift_ref[...]                  # (Cout,1) broadcast over lanes
    o_ref[0] = jnp.maximum(out, 0.0).astype(o_ref.dtype)


def singleconv_forward(x_nchw, w_oihw, bias, gamma, beta, eps=EPS,
                       compute_dtype=jnp.bfloat16):
    N, Cin, H, W = x_nchw.shape
    Cout = w_oihw.shape[0]
    HW = H * W
    Wp = W + 2 * PAD
    F = H * Wp
    max_off = DIL * (K - 1) * Wp + DIL * (K - 1)
    LF = ((max_off + F + 127) // 128) * 128     # flat padded-input scratch length

    # conv bias is intentionally unused: training-mode BN subtracts the batch mean,
    # which cancels the per-channel bias exactly (identical forward output).
    del bias

    # free row-major views / one-time tiny casts (no NCHW<->NHWC transposes anywhere)
    x_flat = x_nchw.astype(compute_dtype).reshape(N, Cin, HW)
    w_mat = jnp.transpose(w_oihw, (0, 2, 3, 1)).reshape(Cout, K * K * Cin)
    w_mat = w_mat.astype(compute_dtype)

    # --- kernel 1: dilated conv + fused BN statistics, grid over batch -------------------
    conv_flat, ssum, ssq = pl.pallas_call(
        functools.partial(_conv_stats_kernel, H=H, W=W, Cin=Cin),
        out_shape=(
            jax.ShapeDtypeStruct((N, Cout, HW), jnp.float32),
            jax.ShapeDtypeStruct((N, Cout, 1), jnp.float32),
            jax.ShapeDtypeStruct((N, Cout, 1), jnp.float32),
        ),
        grid=(N,),
        in_specs=[
            pl.BlockSpec((1, Cin, HW), lambda n: (n, 0, 0)),
            pl.BlockSpec((Cout, K * K * Cin), lambda n: (0, 0)),
        ],
        out_specs=(
            pl.BlockSpec((1, Cout, HW), lambda n: (n, 0, 0)),
            pl.BlockSpec((1, Cout, 1), lambda n: (n, 0, 0)),
            pl.BlockSpec((1, Cout, 1), lambda n: (n, 0, 0)),
        ),
        scratch_shapes=[
            pltpu.VMEM((Cin, LF), compute_dtype),
            pltpu.VMEM((K * K * Cin, F), compute_dtype),
        ],
        compiler_params=pltpu.CompilerParams(dimension_semantics=("parallel",)),
    )(x_flat, w_mat)

    # --- tiny cross-sample stat combine + scale/shift folding (plain JAX) ----------------
    cnt = jnp.float32(N * HW)
    mean = jnp.sum(ssum[:, :, 0], axis=0) / cnt                      # (Cout,)
    ex2 = jnp.sum(ssq[:, :, 0], axis=0) / cnt
    var = jnp.maximum(ex2 - mean * mean, 0.0)                        # biased batch variance
    scale = gamma.astype(jnp.float32) * lax.rsqrt(var + eps)
    shift = beta.astype(jnp.float32) - mean * scale

    # --- kernel 2: tiled, streaming normalize + ReLU --------------------------------------
    hw_blk = min(HW, 8 * 1024)
    out_flat = pl.pallas_call(
        _bn_relu_kernel,
        out_shape=jax.ShapeDtypeStruct((N, Cout, HW), jnp.float32),
        grid=(N, pl.cdiv(HW, hw_blk)),
        in_specs=[
            pl.BlockSpec((1, Cout, hw_blk), lambda n, j: (n, 0, j)),
            pl.BlockSpec((Cout, 1), lambda n, j: (0, 0)),
            pl.BlockSpec((Cout, 1), lambda n, j: (0, 0)),
        ],
        out_specs=pl.BlockSpec((1, Cout, hw_blk), lambda n, j: (n, 0, j)),
        compiler_params=pltpu.CompilerParams(
            dimension_semantics=("parallel", "parallel")),
    )(conv_flat, scale.reshape(Cout, 1), shift.reshape(Cout, 1))

    return out_flat.reshape(N, Cout, H, W)                           # free view: already NCHW


def _reference(x_nchw, w_oihw, bias, gamma, beta, eps=EPS, conv_dtype=jnp.float32):
    conv = lax.conv_general_dilated(
        x_nchw.astype(conv_dtype), w_oihw.astype(conv_dtype), window_strides=(1, 1),
        padding=((PAD, PAD), (PAD, PAD)), rhs_dilation=(DIL, DIL),
        dimension_numbers=("NCHW", "OIHW", "NCHW"),
        preferred_element_type=jnp.float32,
    ) + bias[None, :, None, None]
    mean = conv.mean(axis=(0, 2, 3), keepdims=True)
    var = ((conv - mean) ** 2).mean(axis=(0, 2, 3), keepdims=True)
    xhat = (conv - mean) * lax.rsqrt(var + eps)
    return jnp.maximum(xhat * gamma[None, :, None, None] + beta[None, :, None, None], 0.0)


if __name__ == "__main__":
    key = jax.random.PRNGKey(0)
    k_x, k_w, k_b, k_g, k_bt = jax.random.split(key, 5)

    N, Cin, Cout, H, W = 2, 4, 8, 16, 16
    x = jax.random.normal(k_x, (N, Cin, H, W), dtype=jnp.float32)
    w = jax.random.normal(k_w, (Cout, Cin, K, K), dtype=jnp.float32) * 0.05
    b = jax.random.normal(k_b, (Cout,), dtype=jnp.float32) * 0.1
    gamma = 1.0 + 0.1 * jax.random.normal(k_g, (Cout,), dtype=jnp.float32)
    beta = 0.1 * jax.random.normal(k_bt, (Cout,), dtype=jnp.float32)

    y = jax.block_until_ready(singleconv_forward(x, w, b, gamma, beta))
    assert y.shape == (N, Cout, H, W)

    # Tight check vs a reference whose conv uses the same bf16 operands / f32 accumulation.
    y_ref_bf16 = jax.block_until_ready(
        _reference(x, w, b, gamma, beta, conv_dtype=jnp.bfloat16))
    np.testing.assert_allclose(np.asarray(y), np.asarray(y_ref_bf16), rtol=2e-3, atol=2e-3)

    # Loose check vs the pure-f32 module semantics (only bf16 MXU input rounding differs).
    y_ref_f32 = jax.block_until_ready(
        _reference(x, w, b, gamma, beta, conv_dtype=jnp.float32))
    np.testing.assert_allclose(np.asarray(y), np.asarray(y_ref_f32), rtol=5e-2, atol=5e-2)

    print("KERNEL_OK")
</pallas_src>

<mosaic_0001>
module attributes {stable_mosaic.version = 11 : i64} {
  func.func @_conv_stats_kernel(%arg0: i32, %arg1: memref<1x4x256xbf16, #tpu.memory_space<vmem>>, %arg2: memref<8x400xbf16, #tpu.memory_space<vmem>>, %arg3: memref<1x8x256xf32, #tpu.memory_space<vmem>>, %arg4: memref<1x8x1xf32, #tpu.memory_space<vmem>>, %arg5: memref<1x8x1xf32, #tpu.memory_space<vmem>>, %arg6: memref<4x1280xbf16, #tpu.memory_space<vmem>>, %arg7: memref<400x544xbf16, #tpu.memory_space<vmem>>) attributes {dimension_semantics = [#tpu.dimension_semantics<parallel>], iteration_bounds = array<i64: 2>, scalar_prefetch = 0 : i64, scratch_operands = 2 : i64, tpu.core_type = #tpu.core_type<tc>, window_params = [{transform_indices = @transform_0, window_bounds = array<i64: 1, 4, 256>}, {pipeline_mode = #tpu.pipeline_mode<synchronous>, transform_indices = @transform_1, window_bounds = array<i64: 8, 400>}, {transform_indices = @transform_2, window_bounds = array<i64: 1, 8, 256>}, {transform_indices = @transform_3, window_bounds = array<i64: 1, 8, 1>}, {transform_indices = @transform_4, window_bounds = array<i64: 1, 8, 1>}]} {
    %cst = arith.constant 0.000000e+00 : bf16
    %0 = vector.broadcast %cst : bf16 to vector<4x1280xbf16>
    %c0 = arith.constant 0 : index
    %c0_0 = arith.constant 0 : index
    %1 = vector.load %arg6[%c0, %c0_0] : memref<4x1280xbf16, #tpu.memory_space<vmem>>, vector<4x1280xbf16>
    tpu.vector_store %arg6[%c0, %c0_0], %0 {strides = array<i32>} : memref<4x1280xbf16, #tpu.memory_space<vmem>>, vector<4x1280xbf16>,
    %c0_1 = arith.constant 0 : index
    %c0_2 = arith.constant 0 : index
    %c0_3 = arith.constant 0 : index
    %2 = vector.load %arg1[%c0_1, %c0_2, %c0_3] : memref<1x4x256xbf16, #tpu.memory_space<vmem>>, vector<1x4x16xbf16>
    %3 = vector.shape_cast %2 : vector<1x4x16xbf16> to vector<4x16xbf16>
    %c0_4 = arith.constant 0 : index
    %c315 = arith.constant 315 : index
    %4 = vector.load %arg6[%c0_4, %c315] : memref<4x1280xbf16, #tpu.memory_space<vmem>>, vector<4x16xbf16>
    tpu.vector_store %arg6[%c0_4, %c315], %3 {strides = array<i32>} : memref<4x1280xbf16, #tpu.memory_space<vmem>>, vector<4x16xbf16>,
    %c0_5 = arith.constant 0 : index
    %c0_6 = arith.constant 0 : index
    %c16 = arith.constant 16 : index
    %5 = vector.load %arg1[%c0_5, %c0_6, %c16] : memref<1x4x256xbf16, #tpu.memory_space<vmem>>, vector<1x4x16xbf16>
    %6 = vector.shape_cast %5 : vector<1x4x16xbf16> to vector<4x16xbf16>
    %c0_7 = arith.constant 0 : index
    %c349 = arith.constant 349 : index
    %7 = vector.load %arg6[%c0_7, %c349] : memref<4x1280xbf16, #tpu.memory_space<vmem>>, vector<4x16xbf16>
    tpu.vector_store %arg6[%c0_7, %c349], %6 {strides = array<i32>} : memref<4x1280xbf16, #tpu.memory_space<vmem>>, vector<4x16xbf16>,
    %c0_8 = arith.constant 0 : index
    %c0_9 = arith.constant 0 : index
    %c32 = arith.constant 32 : index
    %8 = vector.load %arg1[%c0_8, %c0_9, %c32] : memref<1x4x256xbf16, #tpu.memory_space<vmem>>, vector<1x4x16xbf16>
    %9 = vector.shape_cast %8 : vector<1x4x16xbf16> to vector<4x16xbf16>
    %c0_10 = arith.constant 0 : index
    %c383 = arith.constant 383 : index
    %10 = vector.load %arg6[%c0_10, %c383] : memref<4x1280xbf16, #tpu.memory_space<vmem>>, vector<4x16xbf16>
    tpu.vector_store %arg6[%c0_10, %c383], %9 {strides = array<i32>} : memref<4x1280xbf16, #tpu.memory_space<vmem>>, vector<4x16xbf16>,
    %c0_11 = arith.constant 0 : index
    %c0_12 = arith.constant 0 : index
    %c48 = arith.constant 48 : index
    %11 = vector.load %arg1[%c0_11, %c0_12, %c48] : memref<1x4x256xbf16, #tpu.memory_space<vmem>>, vector<1x4x16xbf16>
    %12 = vector.shape_cast %11 : vector<1x4x16xbf16> to vector<4x16xbf16>
    %c0_13 = arith.constant 0 : index
    %c417 = arith.constant 417 : index
    %13 = vector.load %arg6[%c0_13, %c417] : memref<4x1280xbf16, #tpu.memory_space<vmem>>, vector<4x16xbf16>
    tpu.vector_store %arg6[%c0_13, %c417], %12 {strides = array<i32>} : memref<4x1280xbf16, #tpu.memory_space<vmem>>, vector<4x16xbf16>,
    %c0_14 = arith.constant 0 : index
    %c0_15 = arith.constant 0 : index
    %c64 = arith.constant 64 : index
    %14 = vector.load %arg1[%c0_14, %c0_15, %c64] : memref<1x4x256xbf16, #tpu.memory_space<vmem>>, vector<1x4x16xbf16>
    %15 = vector.shape_cast %14 : vector<1x4x16xbf16> to vector<4x16xbf16>
    %c0_16 = arith.constant 0 : index
    %c451 = arith.constant 451 : index
    %16 = vector.load %arg6[%c0_16, %c451] : memref<4x1280xbf16, #tpu.memory_space<vmem>>, vector<4x16xbf16>
    tpu.vector_store %arg6[%c0_16, %c451], %15 {strides = array<i32>} : memref<4x1280xbf16, #tpu.memory_space<vmem>>, vector<4x16xbf16>,
    %c0_17 = arith.constant 0 : index
    %c0_18 = arith.constant 0 : index
    %c80 = arith.constant 80 : index
    %17 = vector.load %arg1[%c0_17, %c0_18, %c80] : memref<1x4x256xbf16, #tpu.memory_space<vmem>>, vector<1x4x16xbf16>
    %18 = vector.shape_cast %17 : vector<1x4x16xbf16> to vector<4x16xbf16>
    %c0_19 = arith.constant 0 : index
    %c485 = arith.constant 485 : index
    %19 = vector.load %arg6[%c0_19, %c485] : memref<4x1280xbf16, #tpu.memory_space<vmem>>, vector<4x16xbf16>
    tpu.vector_store %arg6[%c0_19, %c485], %18 {strides = array<i32>} : memref<4x1280xbf16, #tpu.memory_space<vmem>>, vector<4x16xbf16>,
    %c0_20 = arith.constant 0 : index
    %c0_21 = arith.constant 0 : index
    %c96 = arith.constant 96 : index
    %20 = vector.load %arg1[%c0_20, %c0_21, %c96] : memref<1x4x256xbf16, #tpu.memory_space<vmem>>, vector<1x4x16xbf16>
    %21 = vector.shape_cast %20 : vector<1x4x16xbf16> to vector<4x16xbf16>
    %c0_22 = arith.constant 0 : index
    %c519 = arith.constant 519 : index
    %22 = vector.load %arg6[%c0_22, %c519] : memref<4x1280xbf16, #tpu.memory_space<vmem>>, vector<4x16xbf16>
    tpu.vector_store %arg6[%c0_22, %c519], %21 {strides = array<i32>} : memref<4x1280xbf16, #tpu.memory_space<vmem>>, vector<4x16xbf16>,
    %c0_23 = arith.constant 0 : index
    %c0_24 = arith.constant 0 : index
    %c112 = arith.constant 112 : index
    %23 = vector.load %arg1[%c0_23, %c0_24, %c112] : memref<1x4x256xbf16, #tpu.memory_space<vmem>>, vector<1x4x16xbf16>
    %24 = vector.shape_cast %23 : vector<1x4x16xbf16> to vector<4x16xbf16>
    %c0_25 = arith.constant 0 : index
    %c553 = arith.constant 553 : index
    %25 = vector.load %arg6[%c0_25, %c553] : memref<4x1280xbf16, #tpu.memory_space<vmem>>, vector<4x16xbf16>
    tpu.vector_store %arg6[%c0_25, %c553], %24 {strides = array<i32>} : memref<4x1280xbf16, #tpu.memory_space<vmem>>, vector<4x16xbf16>,
    %c0_26 = arith.constant 0 : index
    %c0_27 = arith.constant 0 : index
    %c128 = arith.constant 128 : index
    %26 = vector.load %arg1[%c0_26, %c0_27, %c128] : memref<1x4x256xbf16, #tpu.memory_space<vmem>>, vector<1x4x16xbf16>
    %27 = vector.shape_cast %26 : vector<1x4x16xbf16> to vector<4x16xbf16>
    %c0_28 = arith.constant 0 : index
    %c587 = arith.constant 587 : index
    %28 = vector.load %arg6[%c0_28, %c587] : memref<4x1280xbf16, #tpu.memory_space<vmem>>, vector<4x16xbf16>
    tpu.vector_store %arg6[%c0_28, %c587], %27 {strides = array<i32>} : memref<4x1280xbf16, #tpu.memory_space<vmem>>, vector<4x16xbf16>,
    %c0_29 = arith.constant 0 : index
    %c0_30 = arith.constant 0 : index
    %c144 = arith.constant 144 : index
    %29 = vector.load %arg1[%c0_29, %c0_30, %c144] : memref<1x4x256xbf16, #tpu.memory_space<vmem>>, vector<1x4x16xbf16>
    %30 = vector.shape_cast %29 : vector<1x4x16xbf16> to vector<4x16xbf16>
    %c0_31 = arith.constant 0 : index
    %c621 = arith.constant 621 : index
    %31 = vector.load %arg6[%c0_31, %c621] : memref<4x1280xbf16, #tpu.memory_space<vmem>>, vector<4x16xbf16>
    tpu.vector_store %arg6[%c0_31, %c621], %30 {strides = array<i32>} : memref<4x1280xbf16, #tpu.memory_space<vmem>>, vector<4x16xbf16>,
    %c0_32 = arith.constant 0 : index
    %c0_33 = arith.constant 0 : index
    %c160 = arith.constant 160 : index
    %32 = vector.load %arg1[%c0_32, %c0_33, %c160] : memref<1x4x256xbf16, #tpu.memory_space<vmem>>, vector<1x4x16xbf16>
    %33 = vector.shape_cast %32 : vector<1x4x16xbf16> to vector<4x16xbf16>
    %c0_34 = arith.constant 0 : index
    %c655 = arith.constant 655 : index
    %34 = vector.load %arg6[%c0_34, %c655] : memref<4x1280xbf16, #tpu.memory_space<vmem>>, vector<4x16xbf16>
    tpu.vector_store %arg6[%c0_34, %c655], %33 {strides = array<i32>} : memref<4x1280xbf16, #tpu.memory_space<vmem>>, vector<4x16xbf16>,
    %c0_35 = arith.constant 0 : index
    %c0_36 = arith.constant 0 : index
    %c176 = arith.constant 176 : index
    %35 = vector.load %arg1[%c0_35, %c0_36, %c176] : memref<1x4x256xbf16, #tpu.memory_space<vmem>>, vector<1x4x16xbf16>
    %36 = vector.shape_cast %35 : vector<1x4x16xbf16> to vector<4x16xbf16>
    %c0_37 = arith.constant 0 : index
    %c689 = arith.constant 689 : index
    %37 = vector.load %arg6[%c0_37, %c689] : memref<4x1280xbf16, #tpu.memory_space<vmem>>, vector<4x16xbf16>
    tpu.vector_store %arg6[%c0_37, %c689], %36 {strides = array<i32>} : memref<4x1280xbf16, #tpu.memory_space<vmem>>, vector<4x16xbf16>,
    %c0_38 = arith.constant 0 : index
    %c0_39 = arith.constant 0 : index
    %c192 = arith.constant 192 : index
    %38 = vector.load %arg1[%c0_38, %c0_39, %c192] : memref<1x4x256xbf16, #tpu.memory_space<vmem>>, vector<1x4x16xbf16>
    %39 = vector.shape_cast %38 : vector<1x4x16xbf16> to vector<4x16xbf16>
    %c0_40 = arith.constant 0 : index
    %c723 = arith.constant 723 : index
    %40 = vector.load %arg6[%c0_40, %c723] : memref<4x1280xbf16, #tpu.memory_space<vmem>>, vector<4x16xbf16>
    tpu.vector_store %arg6[%c0_40, %c723], %39 {strides = array<i32>} : memref<4x1280xbf16, #tpu.memory_space<vmem>>, vector<4x16xbf16>,
    %c0_41 = arith.constant 0 : index
    %c0_42 = arith.constant 0 : index
    %c208 = arith.constant 208 : index
    %41 = vector.load %arg1[%c0_41, %c0_42, %c208] : memref<1x4x256xbf16, #tpu.memory_space<vmem>>, vector<1x4x16xbf16>
    %42 = vector.shape_cast %41 : vector<1x4x16xbf16> to vector<4x16xbf16>
    %c0_43 = arith.constant 0 : index
    %c757 = arith.constant 757 : index
    %43 = vector.load %arg6[%c0_43, %c757] : memref<4x1280xbf16, #tpu.memory_space<vmem>>, vector<4x16xbf16>
    tpu.vector_store %arg6[%c0_43, %c757], %42 {strides = array<i32>} : memref<4x1280xbf16, #tpu.memory_space<vmem>>, vector<4x16xbf16>,
    %c0_44 = arith.constant 0 : index
    %c0_45 = arith.constant 0 : index
    %c224 = arith.constant 224 : index
    %44 = vector.load %arg1[%c0_44, %c0_45, %c224] : memref<1x4x256xbf16, #tpu.memory_space<vmem>>, vector<1x4x16xbf16>
    %45 = vector.shape_cast %44 : vector<1x4x16xbf16> to vector<4x16xbf16>
    %c0_46 = arith.constant 0 : index
    %c791 = arith.constant 791 : index
    %46 = vector.load %arg6[%c0_46, %c791] : memref<4x1280xbf16, #tpu.memory_space<vmem>>, vector<4x16xbf16>
    tpu.vector_store %arg6[%c0_46, %c791], %45 {strides = array<i32>} : memref<4x1280xbf16, #tpu.memory_space<vmem>>, vector<4x16xbf16>,
    %c0_47 = arith.constant 0 : index
    %c0_48 = arith.constant 0 : index
    %c240 = arith.constant 240 : index
    %47 = vector.load %arg1[%c0_47, %c0_48, %c240] : memref<1x4x256xbf16, #tpu.memory_space<vmem>>, vector<1x4x16xbf16>
    %48 = vector.shape_cast %47 : vector<1x4x16xbf16> to vector<4x16xbf16>
    %c0_49 = arith.constant 0 : index
    %c825 = arith.constant 825 : index
    %49 = vector.load %arg6[%c0_49, %c825] : memref<4x1280xbf16, #tpu.memory_space<vmem>>, vector<4x16xbf16>
    tpu.vector_store %arg6[%c0_49, %c825], %48 {strides = array<i32>} : memref<4x1280xbf16, #tpu.memory_space<vmem>>, vector<4x16xbf16>,
    %c0_50 = arith.constant 0 : index
    %c0_51 = arith.constant 0 : index
    %50 = vector.load %arg6[%c0_50, %c0_51] : memref<4x1280xbf16, #tpu.memory_space<vmem>>, vector<4x544xbf16>
    %c0_52 = arith.constant 0 : index
    %c0_53 = arith.constant 0 : index
    %51 = vector.load %arg7[%c0_52, %c0_53] : memref<400x544xbf16, #tpu.memory_space<vmem>>, vector<4x544xbf16>
    tpu.vector_store %arg7[%c0_52, %c0_53], %50 {strides = array<i32>} : memref<400x544xbf16, #tpu.memory_space<vmem>>, vector<4x544xbf16>,
    %c0_54 = arith.constant 0 : index
    %c2 = arith.constant 2 : index
    %52 = vector.load %arg6[%c0_54, %c2] : memref<4x1280xbf16, #tpu.memory_space<vmem>>, vector<4x544xbf16>
    %c4 = arith.constant 4 : index
    %c0_55 = arith.constant 0 : index
    %53 = vector.load %arg7[%c4, %c0_55] : memref<400x544xbf16, #tpu.memory_space<vmem>>, vector<4x544xbf16>
    tpu.vector_store %arg7[%c4, %c0_55], %52 {strides = array<i32>} : memref<400x544xbf16, #tpu.memory_space<vmem>>, vector<4x544xbf16>,
    %c0_56 = arith.constant 0 : index
    %c4_57 = arith.constant 4 : index
    %54 = vector.load %arg6[%c0_56, %c4_57] : memref<4x1280xbf16, #tpu.memory_space<vmem>>, vector<4x544xbf16>
    %c8 = arith.constant 8 : index
    %c0_58 = arith.constant 0 : index
    %55 = vector.load %arg7[%c8, %c0_58] : memref<400x544xbf16, #tpu.memory_space<vmem>>, vector<4x544xbf16>
    tpu.vector_store %arg7[%c8, %c0_58], %54 {strides = array<i32>} : memref<400x544xbf16, #tpu.memory_space<vmem>>, vector<4x544xbf16>,
    %c0_59 = arith.constant 0 : index
    %c6 = arith.constant 6 : index
    %56 = vector.load %arg6[%c0_59, %c6] : memref<4x1280xbf16, #tpu.memory_space<vmem>>, vector<4x544xbf16>
    %c12 = arith.constant 12 : index
    %c0_60 = arith.constant 0 : index
    %57 = vector.load %arg7[%c12, %c0_60] : memref<400x544xbf16, #tpu.memory_space<vmem>>, vector<4x544xbf16>
    tpu.vector_store %arg7[%c12, %c0_60], %56 {strides = array<i32>} : memref<400x544xbf16, #tpu.memory_space<vmem>>, vector<4x544xbf16>,
    %c0_61 = arith.constant 0 : index
    %c8_62 = arith.constant 8 : index
    %58 = vector.load %arg6[%c0_61, %c8_62] : memref<4x1280xbf16, #tpu.memory_space<vmem>>, vector<4x544xbf16>
    %c16_63 = arith.constant 16 : index
    %c0_64 = arith.constant 0 : index
    %59 = vector.load %arg7[%c16_63, %c0_64] : memref<400x544xbf16, #tpu.memory_space<vmem>>, vector<4x544xbf16>
    tpu.vector_store %arg7[%c16_63, %c0_64], %58 {strides = array<i32>} : memref<400x544xbf16, #tpu.memory_space<vmem>>, vector<4x544xbf16>,
    %c0_65 = arith.constant 0 : index
    %c10 = arith.constant 10 : index
    %60 = vector.load %arg6[%c0_65, %c10] : memref<4x1280xbf16, #tpu.memory_space<vmem>>, vector<4x544xbf16>
    %c20 = arith.constant 20 : index
    %c0_66 = arith.constant 0 : index
    %61 = vector.load %arg7[%c20, %c0_66] : memref<400x544xbf16, #tpu.memory_space<vmem>>, vector<4x544xbf16>
    tpu.vector_store %arg7[%c20, %c0_66], %60 {strides = array<i32>} : memref<400x544xbf16, #tpu.memory_space<vmem>>, vector<4x544xbf16>,
    %c0_67 = arith.constant 0 : index
    %c12_68 = arith.constant 12 : index
    %62 = vector.load %arg6[%c0_67, %c12_68] : memref<4x1280xbf16, #tpu.memory_space<vmem>>, vector<4x544xbf16>
    %c24 = arith.constant 24 : index
    %c0_69 = arith.constant 0 : index
    %63 = vector.load %arg7[%c24, %c0_69] : memref<400x544xbf16, #tpu.memory_space<vmem>>, vector<4x544xbf16>
    tpu.vector_store %arg7[%c24, %c0_69], %62 {strides = array<i32>} : memref<400x544xbf16, #tpu.memory_space<vmem>>, vector<4x544xbf16>,
    %c0_70 = arith.constant 0 : index
    %c14 = arith.constant 14 : index
    %64 = vector.load %arg6[%c0_70, %c14] : memref<4x1280xbf16, #tpu.memory_space<vmem>>, vector<4x544xbf16>
    %c28 = arith.constant 28 : index
    %c0_71 = arith.constant 0 : index
    %65 = vector.load %arg7[%c28, %c0_71] : memref<400x544xbf16, #tpu.memory_space<vmem>>, vector<4x544xbf16>
    tpu.vector_store %arg7[%c28, %c0_71], %64 {strides = array<i32>} : memref<400x544xbf16, #tpu.memory_space<vmem>>, vector<4x544xbf16>,
    %c0_72 = arith.constant 0 : index
    %c16_73 = arith.constant 16 : index
    %66 = vector.load %arg6[%c0_72, %c16_73] : memref<4x1280xbf16, #tpu.memory_space<vmem>>, vector<4x544xbf16>
    %c32_74 = arith.constant 32 : index
    %c0_75 = arith.constant 0 : index
    %67 = vector.load %arg7[%c32_74, %c0_75] : memref<400x544xbf16, #tpu.memory_space<vmem>>, vector<4x544xbf16>
    tpu.vector_store %arg7[%c32_74, %c0_75], %66 {strides = array<i32>} : memref<400x544xbf16, #tpu.memory_space<vmem>>, vector<4x544xbf16>,
    %c0_76 = arith.constant 0 : index
    %c18 = arith.constant 18 : index
    %68 = vector.load %arg6[%c0_76, %c18] : memref<4x1280xbf16, #tpu.memory_space<vmem>>, vector<4x544xbf16>
    %c36 = arith.constant 36 : index
    %c0_77 = arith.constant 0 : index
    %69 = vector.load %arg7[%c36, %c0_77] : memref<400x544xbf16, #tpu.memory_space<vmem>>, vector<4x544xbf16>
    tpu.vector_store %arg7[%c36, %c0_77], %68 {strides = array<i32>} : memref<400x544xbf16, #tpu.memory_space<vmem>>, vector<4x544xbf16>,
    %c0_78 = arith.constant 0 : index
    %c68 = arith.constant 68 : index
    %70 = vector.load %arg6[%c0_78, %c68] : memref<4x1280xbf16, #tpu.memory_space<vmem>>, vector<4x544xbf16>
    %c40 = arith.constant 40 : index
    %c0_79 = arith.constant 0 : index
    %71 = vector.load %arg7[%c40, %c0_79] : memref<400x544xbf16, #tpu.memory_space<vmem>>, vector<4x544xbf16>
    tpu.vector_store %arg7[%c40, %c0_79], %70 {strides = array<i32>} : memref<400x544xbf16, #tpu.memory_space<vmem>>, vector<4x544xbf16>,
    %c0_80 = arith.constant 0 : index
    %c70 = arith.constant 70 : index
    %72 = vector.load %arg6[%c0_80, %c70] : memref<4x1280xbf16, #tpu.memory_space<vmem>>, vector<4x544xbf16>
    %c44 = arith.constant 44 : index
    %c0_81 = arith.constant 0 : index
    %73 = vector.load %arg7[%c44, %c0_81] : memref<400x544xbf16, #tpu.memory_space<vmem>>, vector<4x544xbf16>
    tpu.vector_store %arg7[%c44, %c0_81], %72 {strides = array<i32>} : memref<400x544xbf16, #tpu.memory_space<vmem>>, vector<4x544xbf16>,
    %c0_82 = arith.constant 0 : index
    %c72 = arith.constant 72 : index
    %74 = vector.load %arg6[%c0_82, %c72] : memref<4x1280xbf16, #tpu.memory_space<vmem>>, vector<4x544xbf16>
    %c48_83 = arith.constant 48 : index
    %c0_84 = arith.constant 0 : index
    %75 = vector.load %arg7[%c48_83, %c0_84] : memref<400x544xbf16, #tpu.memory_space<vmem>>, vector<4x544xbf16>
    tpu.vector_store %arg7[%c48_83, %c0_84], %74 {strides = array<i32>} : memref<400x544xbf16, #tpu.memory_space<vmem>>, vector<4x544xbf16>,
    %c0_85 = arith.constant 0 : index
    %c74 = arith.constant 74 : index
    %76 = vector.load %arg6[%c0_85, %c74] : memref<4x1280xbf16, #tpu.memory_space<vmem>>, vector<4x544xbf16>
    %c52 = arith.constant 52 : index
    %c0_86 = arith.constant 0 : index
    %77 = vector.load %arg7[%c52, %c0_86] : memref<400x544xbf16, #tpu.memory_space<vmem>>, vector<4x544xbf16>
    tpu.vector_store %arg7[%c52, %c0_86], %76 {strides = array<i32>} : memref<400x544xbf16, #tpu.memory_space<vmem>>, vector<4x544xbf16>,
    %c0_87 = arith.constant 0 : index
    %c76 = arith.constant 76 : index
    %78 = vector.load %arg6[%c0_87, %c76] : memref<4x1280xbf16, #tpu.memory_space<vmem>>, vector<4x544xbf16>
    %c56 = arith.constant 56 : index
    %c0_88 = arith.constant 0 : index
    %79 = vector.load %arg7[%c56, %c0_88] : memref<400x544xbf16, #tpu.memory_space<vmem>>, vector<4x544xbf16>
    tpu.vector_store %arg7[%c56, %c0_88], %78 {strides = array<i32>} : memref<400x544xbf16, #tpu.memory_space<vmem>>, vector<4x544xbf16>,
    %c0_89 = arith.constant 0 : index
    %c78 = arith.constant 78 : index
    %80 = vector.load %arg6[%c0_89, %c78] : memref<4x1280xbf16, #tpu.memory_space<vmem>>, vector<4x544xbf16>
    %c60 = arith.constant 60 : index
    %c0_90 = arith.constant 0 : index
    %81 = vector.load %arg7[%c60, %c0_90] : memref<400x544xbf16, #tpu.memory_space<vmem>>, vector<4x544xbf16>
    tpu.vector_store %arg7[%c60, %c0_90], %80 {strides = array<i32>} : memref<400x544xbf16, #tpu.memory_space<vmem>>, vector<4x544xbf16>,
    %c0_91 = arith.constant 0 : index
    %c80_92 = arith.constant 80 : index
    %82 = vector.load %arg6[%c0_91, %c80_92] : memref<4x1280xbf16, #tpu.memory_space<vmem>>, vector<4x544xbf16>
    %c64_93 = arith.constant 64 : index
    %c0_94 = arith.constant 0 : index
    %83 = vector.load %arg7[%c64_93, %c0_94] : memref<400x544xbf16, #tpu.memory_space<vmem>>, vector<4x544xbf16>
    tpu.vector_store %arg7[%c64_93, %c0_94], %82 {strides = array<i32>} : memref<400x544xbf16, #tpu.memory_space<vmem>>, vector<4x544xbf16>,
    %c0_95 = arith.constant 0 : index
    %c82 = arith.constant 82 : index
    %84 = vector.load %arg6[%c0_95, %c82] : memref<4x1280xbf16, #tpu.memory_space<vmem>>, vector<4x544xbf16>
    %c68_96 = arith.constant 68 : index
    %c0_97 = arith.constant 0 : index
    %85 = vector.load %arg7[%c68_96, %c0_97] : memref<400x544xbf16, #tpu.memory_space<vmem>>, vector<4x544xbf16>
    tpu.vector_store %arg7[%c68_96, %c0_97], %84 {strides = array<i32>} : memref<400x544xbf16, #tpu.memory_space<vmem>>, vector<4x544xbf16>,
    %c0_98 = arith.constant 0 : index
    %c84 = arith.constant 84 : index
    %86 = vector.load %arg6[%c0_98, %c84] : memref<4x1280xbf16, #tpu.memory_space<vmem>>, vector<4x544xbf16>
    %c72_99 = arith.constant 72 : index
    %c0_100 = arith.constant 0 : index
    %87 = vector.load %arg7[%c72_99, %c0_100] : memref<400x544xbf16, #tpu.memory_space<vmem>>, vector<4x544xbf16>
    tpu.vector_store %arg7[%c72_99, %c0_100], %86 {strides = array<i32>} : memref<400x544xbf16, #tpu.memory_space<vmem>>, vector<4x544xbf16>,
    %c0_101 = arith.constant 0 : index
    %c86 = arith.constant 86 : index
    %88 = vector.load %arg6[%c0_101, %c86] : memref<4x1280xbf16, #tpu.memory_space<vmem>>, vector<4x544xbf16>
    %c76_102 = arith.constant 76 : index
    %c0_103 = arith.constant 0 : index
    %89 = vector.load %arg7[%c76_102, %c0_103] : memref<400x544xbf16, #tpu.memory_space<vmem>>, vector<4x544xbf16>
    tpu.vector_store %arg7[%c76_102, %c0_103], %88 {strides = array<i32>} : memref<400x544xbf16, #tpu.memory_space<vmem>>, vector<4x544xbf16>,
    %c0_104 = arith.constant 0 : index
    %c136 = arith.constant 136 : index
    %90 = vector.load %arg6[%c0_104, %c136] : memref<4x1280xbf16, #tpu.memory_space<vmem>>, vector<4x544xbf16>
    %c80_105 = arith.constant 80 : index
    %c0_106 = arith.constant 0 : index
    %91 = vector.load %arg7[%c80_105, %c0_106] : memref<400x544xbf16, #tpu.memory_space<vmem>>, vector<4x544xbf16>
    tpu.vector_store %arg7[%c80_105, %c0_106], %90 {strides = array<i32>} : memref<400x544xbf16, #tpu.memory_space<vmem>>, vector<4x544xbf16>,
    %c0_107 = arith.constant 0 : index
    %c138 = arith.constant 138 : index
    %92 = vector.load %arg6[%c0_107, %c138] : memref<4x1280xbf16, #tpu.memory_space<vmem>>, vector<4x544xbf16>
    %c84_108 = arith.constant 84 : index
    %c0_109 = arith.constant 0 : index
    %93 = vector.load %arg7[%c84_108, %c0_109] : memref<400x544xbf16, #tpu.memory_space<vmem>>, vector<4x544xbf16>
    tpu.vector_store %arg7[%c84_108, %c0_109], %92 {strides = array<i32>} : memref<400x544xbf16, #tpu.memory_space<vmem>>, vector<4x544xbf16>,
    %c0_110 = arith.constant 0 : index
    %c140 = arith.constant 140 : index
    %94 = vector.load %arg6[%c0_110, %c140] : memref<4x1280xbf16, #tpu.memory_space<vmem>>, vector<4x544xbf16>
    %c88 = arith.constant 88 : index
    %c0_111 = arith.constant 0 : index
    %95 = vector.load %arg7[%c88, %c0_111] : memref<400x544xbf16, #tpu.memory_space<vmem>>, vector<4x544xbf16>
    tpu.vector_store %arg7[%c88, %c0_111], %94 {strides = array<i32>} : memref<400x544xbf16, #tpu.memory_space<vmem>>, vector<4x544xbf16>,
    %c0_112 = arith.constant 0 : index
    %c142 = arith.constant 142 : index
    %96 = vector.load %arg6[%c0_112, %c142] : memref<4x1280xbf16, #tpu.memory_space<vmem>>, vector<4x544xbf16>
    %c92 = arith.constant 92 : index
    %c0_113 = arith.constant 0 : index
    %97 = vector.load %arg7[%c92, %c0_113] : memref<400x544xbf16, #tpu.memory_space<vmem>>, vector<4x544xbf16>
    tpu.vector_store %arg7[%c92, %c0_113], %96 {strides = array<i32>} : memref<400x544xbf16, #tpu.memory_space<vmem>>, vector<4x544xbf16>,
    %c0_114 = arith.constant 0 : index
    %c144_115 = arith.constant 144 : index
    %98 = vector.load %arg6[%c0_114, %c144_115] : memref<4x1280xbf16, #tpu.memory_space<vmem>>, vector<4x544xbf16>
    %c96_116 = arith.constant 96 : index
    %c0_117 = arith.constant 0 : index
    %99 = vector.load %arg7[%c96_116, %c0_117] : memref<400x544xbf16, #tpu.memory_space<vmem>>, vector<4x544xbf16>
    tpu.vector_store %arg7[%c96_116, %c0_117], %98 {strides = array<i32>} : memref<400x544xbf16, #tpu.memory_space<vmem>>, vector<4x544xbf16>,
    %c0_118 = arith.constant 0 : index
    %c146 = arith.constant 146 : index
    %100 = vector.load %arg6[%c0_118, %c146] : memref<4x1280xbf16, #tpu.memory_space<vmem>>, vector<4x544xbf16>
    %c100 = arith.constant 100 : index
    %c0_119 = arith.constant 0 : index
    %101 = vector.load %arg7[%c100, %c0_119] : memref<400x544xbf16, #tpu.memory_space<vmem>>, vector<4x544xbf16>
    tpu.vector_store %arg7[%c100, %c0_119], %100 {strides = array<i32>} : memref<400x544xbf16, #tpu.memory_space<vmem>>, vector<4x544xbf16>,
    %c0_120 = arith.constant 0 : index
    %c148 = arith.constant 148 : index
    %102 = vector.load %arg6[%c0_120, %c148] : memref<4x1280xbf16, #tpu.memory_space<vmem>>, vector<4x544xbf16>
    %c104 = arith.constant 104 : index
    %c0_121 = arith.constant 0 : index
    %103 = vector.load %arg7[%c104, %c0_121] : memref<400x544xbf16, #tpu.memory_space<vmem>>, vector<4x544xbf16>
    tpu.vector_store %arg7[%c104, %c0_121], %102 {strides = array<i32>} : memref<400x544xbf16, #tpu.memory_space<vmem>>, vector<4x544xbf16>,
    %c0_122 = arith.constant 0 : index
    %c150 = arith.constant 150 : index
    %104 = vector.load %arg6[%c0_122, %c150] : memref<4x1280xbf16, #tpu.memory_space<vmem>>, vector<4x544xbf16>
    %c108 = arith.constant 108 : index
    %c0_123 = arith.constant 0 : index
    %105 = vector.load %arg7[%c108, %c0_123] : memref<400x544xbf16, #tpu.memory_space<vmem>>, vector<4x544xbf16>
    tpu.vector_store %arg7[%c108, %c0_123], %104 {strides = array<i32>} : memref<400x544xbf16, #tpu.memory_space<vmem>>, vector<4x544xbf16>,
    %c0_124 = arith.constant 0 : index
    %c152 = arith.constant 152 : index
    %106 = vector.load %arg6[%c0_124, %c152] : memref<4x1280xbf16, #tpu.memory_space<vmem>>, vector<4x544xbf16>
    %c112_125 = arith.constant 112 : index
    %c0_126 = arith.constant 0 : index
    %107 = vector.load %arg7[%c112_125, %c0_126] : memref<400x544xbf16, #tpu.memory_space<vmem>>, vector<4x544xbf16>
    tpu.vector_store %arg7[%c112_125, %c0_126], %106 {strides = array<i32>} : memref<400x544xbf16, #tpu.memory_space<vmem>>, vector<4x544xbf16>,
    %c0_127 = arith.constant 0 : index
    %c154 = arith.constant 154 : index
    %108 = vector.load %arg6[%c0_127, %c154] : memref<4x1280xbf16, #tpu.memory_space<vmem>>, vector<4x544xbf16>
    %c116 = arith.constant 116 : index
    %c0_128 = arith.constant 0 : index
    %109 = vector.load %arg7[%c116, %c0_128] : memref<400x544xbf16, #tpu.memory_space<vmem>>, vector<4x544xbf16>
    tpu.vector_store %arg7[%c116, %c0_128], %108 {strides = array<i32>} : memref<400x544xbf16, #tpu.memory_space<vmem>>, vector<4x544xbf16>,
    %c0_129 = arith.constant 0 : index
    %c204 = arith.constant 204 : index
    %110 = vector.load %arg6[%c0_129, %c204] : memref<4x1280xbf16, #tpu.memory_space<vmem>>, vector<4x544xbf16>
    %c120 = arith.constant 120 : index
    %c0_130 = arith.constant 0 : index
    %111 = vector.load %arg7[%c120, %c0_130] : memref<400x544xbf16, #tpu.memory_space<vmem>>, vector<4x544xbf16>
    tpu.vector_store %arg7[%c120, %c0_130], %110 {strides = array<i32>} : memref<400x544xbf16, #tpu.memory_space<vmem>>, vector<4x544xbf16>,
    %c0_131 = arith.constant 0 : index
    %c206 = arith.constant 206 : index
    %112 = vector.load %arg6[%c0_131, %c206] : memref<4x1280xbf16, #tpu.memory_space<vmem>>, vector<4x544xbf16>
    %c124 = arith.constant 124 : index
    %c0_132 = arith.constant 0 : index
    %113 = vector.load %arg7[%c124, %c0_132] : memref<400x544xbf16, #tpu.memory_space<vmem>>, vector<4x544xbf16>
    tpu.vector_store %arg7[%c124, %c0_132], %112 {strides = array<i32>} : memref<400x544xbf16, #tpu.memory_space<vmem>>, vector<4x544xbf16>,
    %c0_133 = arith.constant 0 : index
    %c208_134 = arith.constant 208 : index
    %114 = vector.load %arg6[%c0_133, %c208_134] : memref<4x1280xbf16, #tpu.memory_space<vmem>>, vector<4x544xbf16>
    %c128_135 = arith.constant 128 : index
    %c0_136 = arith.constant 0 : index
    %115 = vector.load %arg7[%c128_135, %c0_136] : memref<400x544xbf16, #tpu.memory_space<vmem>>, vector<4x544xbf16>
    tpu.vector_store %arg7[%c128_135, %c0_136], %114 {strides = array<i32>} : memref<400x544xbf16, #tpu.memory_space<vmem>>, vector<4x544xbf16>,
    %c0_137 = arith.constant 0 : index
    %c210 = arith.constant 210 : index
    %116 = vector.load %arg6[%c0_137, %c210] : memref<4x1280xbf16, #tpu.memory_space<vmem>>, vector<4x544xbf16>
    %c132 = arith.constant 132 : index
    %c0_138 = arith.constant 0 : index
    %117 = vector.load %arg7[%c132, %c0_138] : memref<400x544xbf16, #tpu.memory_space<vmem>>, vector<4x544xbf16>
    tpu.vector_store %arg7[%c132, %c0_138], %116 {strides = array<i32>} : memref<400x544xbf16, #tpu.memory_space<vmem>>, vector<4x544xbf16>,
    %c0_139 = arith.constant 0 : index
    %c212 = arith.constant 212 : index
    %118 = vector.load %arg6[%c0_139, %c212] : memref<4x1280xbf16, #tpu.memory_space<vmem>>, vector<4x544xbf16>
    %c136_140 = arith.constant 136 : index
    %c0_141 = arith.constant 0 : index
    %119 = vector.load %arg7[%c136_140, %c0_141] : memref<400x544xbf16, #tpu.memory_space<vmem>>, vector<4x544xbf16>
    tpu.vector_store %arg7[%c136_140, %c0_141], %118 {strides = array<i32>} : memref<400x544xbf16, #tpu.memory_space<vmem>>, vector<4x544xbf16>,
    %c0_142 = arith.constant 0 : index
    %c214 = arith.constant 214 : index
    %120 = vector.load %arg6[%c0_142, %c214] : memref<4x1280xbf16, #tpu.memory_space<vmem>>, vector<4x544xbf16>
    %c140_143 = arith.constant 140 : index
    %c0_144 = arith.constant 0 : index
    %121 = vector.load %arg7[%c140_143, %c0_144] : memref<400x544xbf16, #tpu.memory_space<vmem>>, vector<4x544xbf16>
    tpu.vector_store %arg7[%c140_143, %c0_144], %120 {strides = array<i32>} : memref<400x544xbf16, #tpu.memory_space<vmem>>, vector<4x544xbf16>,
    %c0_145 = arith.constant 0 : index
    %c216 = arith.constant 216 : index
    %122 = vector.load %arg6[%c0_145, %c216] : memref<4x1280xbf16, #tpu.memory_space<vmem>>, vector<4x544xbf16>
    %c144_146 = arith.constant 144 : index
    %c0_147 = arith.constant 0 : index
    %123 = vector.load %arg7[%c144_146, %c0_147] : memref<400x544xbf16, #tpu.memory_space<vmem>>, vector<4x544xbf16>
    tpu.vector_store %arg7[%c144_146, %c0_147], %122 {strides = array<i32>} : memref<400x544xbf16, #tpu.memory_space<vmem>>, vector<4x544xbf16>,
    %c0_148 = arith.constant 0 : index
    %c218 = arith.constant 218 : index
    %124 = vector.load %arg6[%c0_148, %c218] : memref<4x1280xbf16, #tpu.memory_space<vmem>>, vector<4x544xbf16>
    %c148_149 = arith.constant 148 : index
    %c0_150 = arith.constant 0 : index
    %125 = vector.load %arg7[%c148_149, %c0_150] : memref<400x544xbf16, #tpu.memory_space<vmem>>, vector<4x544xbf16>
    tpu.vector_store %arg7[%c148_149, %c0_150], %124 {strides = array<i32>} : memref<400x544xbf16, #tpu.memory_space<vmem>>, vector<4x544xbf16>,
    %c0_151 = arith.constant 0 : index
    %c220 = arith.constant 220 : index
    %126 = vector.load %arg6[%c0_151, %c220] : memref<4x1280xbf16, #tpu.memory_space<vmem>>, vector<4x544xbf16>
    %c152_152 = arith.constant 152 : index
    %c0_153 = arith.constant 0 : index
    %127 = vector.load %arg7[%c152_152, %c0_153] : memref<400x544xbf16, #tpu.memory_space<vmem>>, vector<4x544xbf16>
    tpu.vector_store %arg7[%c152_152, %c0_153], %126 {strides = array<i32>} : memref<400x544xbf16, #tpu.memory_space<vmem>>, vector<4x544xbf16>,
    %c0_154 = arith.constant 0 : index
    %c222 = arith.constant 222 : index
    %128 = vector.load %arg6[%c0_154, %c222] : memref<4x1280xbf16, #tpu.memory_space<vmem>>, vector<4x544xbf16>
    %c156 = arith.constant 156 : index
    %c0_155 = arith.constant 0 : index
    %129 = vector.load %arg7[%c156, %c0_155] : memref<400x544xbf16, #tpu.memory_space<vmem>>, vector<4x544xbf16>
    tpu.vector_store %arg7[%c156, %c0_155], %128 {strides = array<i32>} : memref<400x544xbf16, #tpu.memory_space<vmem>>, vector<4x544xbf16>,
    %c0_156 = arith.constant 0 : index
    %c272 = arith.constant 272 : index
    %130 = vector.load %arg6[%c0_156, %c272] : memref<4x1280xbf16, #tpu.memory_space<vmem>>, vector<4x544xbf16>
    %c160_157 = arith.constant 160 : index
    %c0_158 = arith.constant 0 : index
    %131 = vector.load %arg7[%c160_157, %c0_158] : memref<400x544xbf16, #tpu.memory_space<vmem>>, vector<4x544xbf16>
    tpu.vector_store %arg7[%c160_157, %c0_158], %130 {strides = array<i32>} : memref<400x544xbf16, #tpu.memory_space<vmem>>, vector<4x544xbf16>,
    %c0_159 = arith.constant 0 : index
    %c274 = arith.constant 274 : index
    %132 = vector.load %arg6[%c0_159, %c274] : memref<4x1280xbf16, #tpu.memory_space<vmem>>, vector<4x544xbf16>
    %c164 = arith.constant 164 : index
    %c0_160 = arith.constant 0 : index
    %133 = vector.load %arg7[%c164, %c0_160] : memref<400x544xbf16, #tpu.memory_space<vmem>>, vector<4x544xbf16>
    tpu.vector_store %arg7[%c164, %c0_160], %132 {strides = array<i32>} : memref<400x544xbf16, #tpu.memory_space<vmem>>, vector<4x544xbf16>,
    %c0_161 = arith.constant 0 : index
    %c276 = arith.constant 276 : index
    %134 = vector.load %arg6[%c0_161, %c276] : memref<4x1280xbf16, #tpu.memory_space<vmem>>, vector<4x544xbf16>
    %c168 = arith.constant 168 : index
    %c0_162 = arith.constant 0 : index
    %135 = vector.load %arg7[%c168, %c0_162] : memref<400x544xbf16, #tpu.memory_space<vmem>>, vector<4x544xbf16>
    tpu.vector_store %arg7[%c168, %c0_162], %134 {strides = array<i32>} : memref<400x544xbf16, #tpu.memory_space<vmem>>, vector<4x544xbf16>,
    %c0_163 = arith.constant 0 : index
    %c278 = arith.constant 278 : index
    %136 = vector.load %arg6[%c0_163, %c278] : memref<4x1280xbf16, #tpu.memory_space<vmem>>, vector<4x544xbf16>
    %c172 = arith.constant 172 : index
    %c0_164 = arith.constant 0 : index
    %137 = vector.load %arg7[%c172, %c0_164] : memref<400x544xbf16, #tpu.memory_space<vmem>>, vector<4x544xbf16>
    tpu.vector_store %arg7[%c172, %c0_164], %136 {strides = array<i32>} : memref<400x544xbf16, #tpu.memory_space<vmem>>, vector<4x544xbf16>,
    %c0_165 = arith.constant 0 : index
    %c280 = arith.constant 280 : index
    %138 = vector.load %arg6[%c0_165, %c280] : memref<4x1280xbf16, #tpu.memory_space<vmem>>, vector<4x544xbf16>
    %c176_166 = arith.constant 176 : index
    %c0_167 = arith.constant 0 : index
    %139 = vector.load %arg7[%c176_166, %c0_167] : memref<400x544xbf16, #tpu.memory_space<vmem>>, vector<4x544xbf16>
    tpu.vector_store %arg7[%c176_166, %c0_167], %138 {strides = array<i32>} : memref<400x544xbf16, #tpu.memory_space<vmem>>, vector<4x544xbf16>,
    %c0_168 = arith.constant 0 : index
    %c282 = arith.constant 282 : index
    %140 = vector.load %arg6[%c0_168, %c282] : memref<4x1280xbf16, #tpu.memory_space<vmem>>, vector<4x544xbf16>
    %c180 = arith.constant 180 : index
    %c0_169 = arith.constant 0 : index
    %141 = vector.load %arg7[%c180, %c0_169] : memref<400x544xbf16, #tpu.memory_space<vmem>>, vector<4x544xbf16>
    tpu.vector_store %arg7[%c180, %c0_169], %140 {strides = array<i32>} : memref<400x544xbf16, #tpu.memory_space<vmem>>, vector<4x544xbf16>,
    %c0_170 = arith.constant 0 : index
    %c284 = arith.constant 284 : index
    %142 = vector.load %arg6[%c0_170, %c284] : memref<4x1280xbf16, #tpu.memory_space<vmem>>, vector<4x544xbf16>
    %c184 = arith.constant 184 : index
    %c0_171 = arith.constant 0 : index
    %143 = vector.load %arg7[%c184, %c0_171] : memref<400x544xbf16, #tpu.memory_space<vmem>>, vector<4x544xbf16>
    tpu.vector_store %arg7[%c184, %c0_171], %142 {strides = array<i32>} : memref<400x544xbf16, #tpu.memory_space<vmem>>, vector<4x544xbf16>,
    %c0_172 = arith.constant 0 : index
    %c286 = arith.constant 286 : index
    %144 = vector.load %arg6[%c0_172, %c286] : memref<4x1280xbf16, #tpu.memory_space<vmem>>, vector<4x544xbf16>
    %c188 = arith.constant 188 : index
    %c0_173 = arith.constant 0 : index
    %145 = vector.load %arg7[%c188, %c0_173] : memref<400x544xbf16, #tpu.memory_space<vmem>>, vector<4x544xbf16>
    tpu.vector_store %arg7[%c188, %c0_173], %144 {strides = array<i32>} : memref<400x544xbf16, #tpu.memory_space<vmem>>, vector<4x544xbf16>,
    %c0_174 = arith.constant 0 : index
    %c288 = arith.constant 288 : index
    %146 = vector.load %arg6[%c0_174, %c288] : memref<4x1280xbf16, #tpu.memory_space<vmem>>, vector<4x544xbf16>
    %c192_175 = arith.constant 192 : index
    %c0_176 = arith.constant 0 : index
    %147 = vector.load %arg7[%c192_175, %c0_176] : memref<400x544xbf16, #tpu.memory_space<vmem>>, vector<4x544xbf16>
    tpu.vector_store %arg7[%c192_175, %c0_176], %146 {strides = array<i32>} : memref<400x544xbf16, #tpu.memory_space<vmem>>, vector<4x544xbf16>,
    %c0_177 = arith.constant 0 : index
    %c290 = arith.constant 290 : index
    %148 = vector.load %arg6[%c0_177, %c290] : memref<4x1280xbf16, #tpu.memory_space<vmem>>, vector<4x544xbf16>
    %c196 = arith.constant 196 : index
    %c0_178 = arith.constant 0 : index
    %149 = vector.load %arg7[%c196, %c0_178] : memref<400x544xbf16, #tpu.memory_space<vmem>>, vector<4x544xbf16>
    tpu.vector_store %arg7[%c196, %c0_178], %148 {strides = array<i32>} : memref<400x544xbf16, #tpu.memory_space<vmem>>, vector<4x544xbf16>,
    %c0_179 = arith.constant 0 : index
    %c340 = arith.constant 340 : index
    %150 = vector.load %arg6[%c0_179, %c340] : memref<4x1280xbf16, #tpu.memory_space<vmem>>, vector<4x544xbf16>
    %c200 = arith.constant 200 : index
    %c0_180 = arith.constant 0 : index
    %151 = vector.load %arg7[%c200, %c0_180] : memref<400x544xbf16, #tpu.memory_space<vmem>>, vector<4x544xbf16>
    tpu.vector_store %arg7[%c200, %c0_180], %150 {strides = array<i32>} : memref<400x544xbf16, #tpu.memory_space<vmem>>, vector<4x544xbf16>,
    %c0_181 = arith.constant 0 : index
    %c342 = arith.constant 342 : index
    %152 = vector.load %arg6[%c0_181, %c342] : memref<4x1280xbf16, #tpu.memory_space<vmem>>, vector<4x544xbf16>
    %c204_182 = arith.constant 204 : index
    %c0_183 = arith.constant 0 : index
    %153 = vector.load %arg7[%c204_182, %c0_183] : memref<400x544xbf16, #tpu.memory_space<vmem>>, vector<4x544xbf16>
    tpu.vector_store %arg7[%c204_182, %c0_183], %152 {strides = array<i32>} : memref<400x544xbf16, #tpu.memory_space<vmem>>, vector<4x544xbf16>,
    %c0_184 = arith.constant 0 : index
    %c344 = arith.constant 344 : index
    %154 = vector.load %arg6[%c0_184, %c344] : memref<4x1280xbf16, #tpu.memory_space<vmem>>, vector<4x544xbf16>
    %c208_185 = arith.constant 208 : index
    %c0_186 = arith.constant 0 : index
    %155 = vector.load %arg7[%c208_185, %c0_186] : memref<400x544xbf16, #tpu.memory_space<vmem>>, vector<4x544xbf16>
    tpu.vector_store %arg7[%c208_185, %c0_186], %154 {strides = array<i32>} : memref<400x544xbf16, #tpu.memory_space<vmem>>, vector<4x544xbf16>,
    %c0_187 = arith.constant 0 : index
    %c346 = arith.constant 346 : index
    %156 = vector.load %arg6[%c0_187, %c346] : memref<4x1280xbf16, #tpu.memory_space<vmem>>, vector<4x544xbf16>
    %c212_188 = arith.constant 212 : index
    %c0_189 = arith.constant 0 : index
    %157 = vector.load %arg7[%c212_188, %c0_189] : memref<400x544xbf16, #tpu.memory_space<vmem>>, vector<4x544xbf16>
    tpu.vector_store %arg7[%c212_188, %c0_189], %156 {strides = array<i32>} : memref<400x544xbf16, #tpu.memory_space<vmem>>, vector<4x544xbf16>,
    %c0_190 = arith.constant 0 : index
    %c348 = arith.constant 348 : index
    %158 = vector.load %arg6[%c0_190, %c348] : memref<4x1280xbf16, #tpu.memory_space<vmem>>, vector<4x544xbf16>
    %c216_191 = arith.constant 216 : index
    %c0_192 = arith.constant 0 : index
    %159 = vector.load %arg7[%c216_191, %c0_192] : memref<400x544xbf16, #tpu.memory_space<vmem>>, vector<4x544xbf16>
    tpu.vector_store %arg7[%c216_191, %c0_192], %158 {strides = array<i32>} : memref<400x544xbf16, #tpu.memory_space<vmem>>, vector<4x544xbf16>,
    %c0_193 = arith.constant 0 : index
    %c350 = arith.constant 350 : index
    %160 = vector.load %arg6[%c0_193, %c350] : memref<4x1280xbf16, #tpu.memory_space<vmem>>, vector<4x544xbf16>
    %c220_194 = arith.constant 220 : index
    %c0_195 = arith.constant 0 : index
    %161 = vector.load %arg7[%c220_194, %c0_195] : memref<400x544xbf16, #tpu.memory_space<vmem>>, vector<4x544xbf16>
    tpu.vector_store %arg7[%c220_194, %c0_195], %160 {strides = array<i32>} : memref<400x544xbf16, #tpu.memory_space<vmem>>, vector<4x544xbf16>,
    %c0_196 = arith.constant 0 : index
    %c352 = arith.constant 352 : index
    %162 = vector.load %arg6[%c0_196, %c352] : memref<4x1280xbf16, #tpu.memory_space<vmem>>, vector<4x544xbf16>
    %c224_197 = arith.constant 224 : index
    %c0_198 = arith.constant 0 : index
    %163 = vector.load %arg7[%c224_197, %c0_198] : memref<400x544xbf16, #tpu.memory_space<vmem>>, vector<4x544xbf16>
    tpu.vector_store %arg7[%c224_197, %c0_198], %162 {strides = array<i32>} : memref<400x544xbf16, #tpu.memory_space<vmem>>, vector<4x544xbf16>,
    %c0_199 = arith.constant 0 : index
    %c354 = arith.constant 354 : index
    %164 = vector.load %arg6[%c0_199, %c354] : memref<4x1280xbf16, #tpu.memory_space<vmem>>, vector<4x544xbf16>
    %c228 = arith.constant 228 : index
    %c0_200 = arith.constant 0 : index
    %165 = vector.load %arg7[%c228, %c0_200] : memref<400x544xbf16, #tpu.memory_space<vmem>>, vector<4x544xbf16>
    tpu.vector_store %arg7[%c228, %c0_200], %164 {strides = array<i32>} : memref<400x544xbf16, #tpu.memory_space<vmem>>, vector<4x544xbf16>,
    %c0_201 = arith.constant 0 : index
    %c356 = arith.constant 356 : index
    %166 = vector.load %arg6[%c0_201, %c356] : memref<4x1280xbf16, #tpu.memory_space<vmem>>, vector<4x544xbf16>
    %c232 = arith.constant 232 : index
    %c0_202 = arith.constant 0 : index
    %167 = vector.load %arg7[%c232, %c0_202] : memref<400x544xbf16, #tpu.memory_space<vmem>>, vector<4x544xbf16>
    tpu.vector_store %arg7[%c232, %c0_202], %166 {strides = array<i32>} : memref<400x544xbf16, #tpu.memory_space<vmem>>, vector<4x544xbf16>,
    %c0_203 = arith.constant 0 : index
    %c358 = arith.constant 358 : index
    %168 = vector.load %arg6[%c0_203, %c358] : memref<4x1280xbf16, #tpu.memory_space<vmem>>, vector<4x544xbf16>
    %c236 = arith.constant 236 : index
    %c0_204 = arith.constant 0 : index
    %169 = vector.load %arg7[%c236, %c0_204] : memref<400x544xbf16, #tpu.memory_space<vmem>>, vector<4x544xbf16>
    tpu.vector_store %arg7[%c236, %c0_204], %168 {strides = array<i32>} : memref<400x544xbf16, #tpu.memory_space<vmem>>, vector<4x544xbf16>,
    %c0_205 = arith.constant 0 : index
    %c408 = arith.constant 408 : index
    %170 = vector.load %arg6[%c0_205, %c408] : memref<4x1280xbf16, #tpu.memory_space<vmem>>, vector<4x544xbf16>
    %c240_206 = arith.constant 240 : index
    %c0_207 = arith.constant 0 : index
    %171 = vector.load %arg7[%c240_206, %c0_207] : memref<400x544xbf16, #tpu.memory_space<vmem>>, vector<4x544xbf16>
    tpu.vector_store %arg7[%c240_206, %c0_207], %170 {strides = array<i32>} : memref<400x544xbf16, #tpu.memory_space<vmem>>, vector<4x544xbf16>,
    %c0_208 = arith.constant 0 : index
    %c410 = arith.constant 410 : index
    %172 = vector.load %arg6[%c0_208, %c410] : memref<4x1280xbf16, #tpu.memory_space<vmem>>, vector<4x544xbf16>
    %c244 = arith.constant 244 : index
    %c0_209 = arith.constant 0 : index
    %173 = vector.load %arg7[%c244, %c0_209] : memref<400x544xbf16, #tpu.memory_space<vmem>>, vector<4x544xbf16>
    tpu.vector_store %arg7[%c244, %c0_209], %172 {strides = array<i32>} : memref<400x544xbf16, #tpu.memory_space<vmem>>, vector<4x544xbf16>,
    %c0_210 = arith.constant 0 : index
    %c412 = arith.constant 412 : index
    %174 = vector.load %arg6[%c0_210, %c412] : memref<4x1280xbf16, #tpu.memory_space<vmem>>, vector<4x544xbf16>
    %c248 = arith.constant 248 : index
    %c0_211 = arith.constant 0 : index
    %175 = vector.load %arg7[%c248, %c0_211] : memref<400x544xbf16, #tpu.memory_space<vmem>>, vector<4x544xbf16>
    tpu.vector_store %arg7[%c248, %c0_211], %174 {strides = array<i32>} : memref<400x544xbf16, #tpu.memory_space<vmem>>, vector<4x544xbf16>,
    %c0_212 = arith.constant 0 : index
    %c414 = arith.constant 414 : index
    %176 = vector.load %arg6[%c0_212, %c414] : memref<4x1280xbf16, #tpu.memory_space<vmem>>, vector<4x544xbf16>
    %c252 = arith.constant 252 : index
    %c0_213 = arith.constant 0 : index
    %177 = vector.load %arg7[%c252, %c0_213] : memref<400x544xbf16, #tpu.memory_space<vmem>>, vector<4x544xbf16>
    tpu.vector_store %arg7[%c252, %c0_213], %176 {strides = array<i32>} : memref<400x544xbf16, #tpu.memory_space<vmem>>, vector<4x544xbf16>,
    %c0_214 = arith.constant 0 : index
    %c416 = arith.constant 416 : index
    %178 = vector.load %arg6[%c0_214, %c416] : memref<4x1280xbf16, #tpu.memory_space<vmem>>, vector<4x544xbf16>
    %c256 = arith.constant 256 : index
    %c0_215 = arith.constant 0 : index
    %179 = vector.load %arg7[%c256, %c0_215] : memref<400x544xbf16, #tpu.memory_space<vmem>>, vector<4x544xbf16>
    tpu.vector_store %arg7[%c256, %c0_215], %178 {strides = array<i32>} : memref<400x544xbf16, #tpu.memory_space<vmem>>, vector<4x544xbf16>,
    %c0_216 = arith.constant 0 : index
    %c418 = arith.constant 418 : index
    %180 = vector.load %arg6[%c0_216, %c418] : memref<4x1280xbf16, #tpu.memory_space<vmem>>, vector<4x544xbf16>
    %c260 = arith.constant 260 : index
    %c0_217 = arith.constant 0 : index
    %181 = vector.load %arg7[%c260, %c0_217] : memref<400x544xbf16, #tpu.memory_space<vmem>>, vector<4x544xbf16>
    tpu.vector_store %arg7[%c260, %c0_217], %180 {strides = array<i32>} : memref<400x544xbf16, #tpu.memory_space<vmem>>, vector<4x544xbf16>,
    %c0_218 = arith.constant 0 : index
    %c420 = arith.constant 420 : index
    %182 = vector.load %arg6[%c0_218, %c420] : memref<4x1280xbf16, #tpu.memory_space<vmem>>, vector<4x544xbf16>
    %c264 = arith.constant 264 : index
    %c0_219 = arith.constant 0 : index
    %183 = vector.load %arg7[%c264, %c0_219] : memref<400x544xbf16, #tpu.memory_space<vmem>>, vector<4x544xbf16>
    tpu.vector_store %arg7[%c264, %c0_219], %182 {strides = array<i32>} : memref<400x544xbf16, #tpu.memory_space<vmem>>, vector<4x544xbf16>,
    %c0_220 = arith.constant 0 : index
    %c422 = arith.constant 422 : index
    %184 = vector.load %arg6[%c0_220, %c422] : memref<4x1280xbf16, #tpu.memory_space<vmem>>, vector<4x544xbf16>
    %c268 = arith.constant 268 : index
    %c0_221 = arith.constant 0 : index
    %185 = vector.load %arg7[%c268, %c0_221] : memref<400x544xbf16, #tpu.memory_space<vmem>>, vector<4x544xbf16>
    tpu.vector_store %arg7[%c268, %c0_221], %184 {strides = array<i32>} : memref<400x544xbf16, #tpu.memory_space<vmem>>, vector<4x544xbf16>,
    %c0_222 = arith.constant 0 : index
    %c424 = arith.constant 424 : index
    %186 = vector.load %arg6[%c0_222, %c424] : memref<4x1280xbf16, #tpu.memory_space<vmem>>, vector<4x544xbf16>
    %c272_223 = arith.constant 272 : index
    %c0_224 = arith.constant 0 : index
    %187 = vector.load %arg7[%c272_223, %c0_224] : memref<400x544xbf16, #tpu.memory_space<vmem>>, vector<4x544xbf16>
    tpu.vector_store %arg7[%c272_223, %c0_224], %186 {strides = array<i32>} : memref<400x544xbf16, #tpu.memory_space<vmem>>, vector<4x544xbf16>,
    %c0_225 = arith.constant 0 : index
    %c426 = arith.constant 426 : index
    %188 = vector.load %arg6[%c0_225, %c426] : memref<4x1280xbf16, #tpu.memory_space<vmem>>, vector<4x544xbf16>
    %c276_226 = arith.constant 276 : index
    %c0_227 = arith.constant 0 : index
    %189 = vector.load %arg7[%c276_226, %c0_227] : memref<400x544xbf16, #tpu.memory_space<vmem>>, vector<4x544xbf16>
    tpu.vector_store %arg7[%c276_226, %c0_227], %188 {strides = array<i32>} : memref<400x544xbf16, #tpu.memory_space<vmem>>, vector<4x544xbf16>,
    %c0_228 = arith.constant 0 : index
    %c476 = arith.constant 476 : index
    %190 = vector.load %arg6[%c0_228, %c476] : memref<4x1280xbf16, #tpu.memory_space<vmem>>, vector<4x544xbf16>
    %c280_229 = arith.constant 280 : index
    %c0_230 = arith.constant 0 : index
    %191 = vector.load %arg7[%c280_229, %c0_230] : memref<400x544xbf16, #tpu.memory_space<vmem>>, vector<4x544xbf16>
    tpu.vector_store %arg7[%c280_229, %c0_230], %190 {strides = array<i32>} : memref<400x544xbf16, #tpu.memory_space<vmem>>, vector<4x544xbf16>,
    %c0_231 = arith.constant 0 : index
    %c478 = arith.constant 478 : index
    %192 = vector.load %arg6[%c0_231, %c478] : memref<4x1280xbf16, #tpu.memory_space<vmem>>, vector<4x544xbf16>
    %c284_232 = arith.constant 284 : index
    %c0_233 = arith.constant 0 : index
    %193 = vector.load %arg7[%c284_232, %c0_233] : memref<400x544xbf16, #tpu.memory_space<vmem>>, vector<4x544xbf16>
    tpu.vector_store %arg7[%c284_232, %c0_233], %192 {strides = array<i32>} : memref<400x544xbf16, #tpu.memory_space<vmem>>, vector<4x544xbf16>,
    %c0_234 = arith.constant 0 : index
    %c480 = arith.constant 480 : index
    %194 = vector.load %arg6[%c0_234, %c480] : memref<4x1280xbf16, #tpu.memory_space<vmem>>, vector<4x544xbf16>
    %c288_235 = arith.constant 288 : index
    %c0_236 = arith.constant 0 : index
    %195 = vector.load %arg7[%c288_235, %c0_236] : memref<400x544xbf16, #tpu.memory_space<vmem>>, vector<4x544xbf16>
    tpu.vector_store %arg7[%c288_235, %c0_236], %194 {strides = array<i32>} : memref<400x544xbf16, #tpu.memory_space<vmem>>, vector<4x544xbf16>,
    %c0_237 = arith.constant 0 : index
    %c482 = arith.constant 482 : index
    %196 = vector.load %arg6[%c0_237, %c482] : memref<4x1280xbf16, #tpu.memory_space<vmem>>, vector<4x544xbf16>
    %c292 = arith.constant 292 : index
    %c0_238 = arith.constant 0 : index
    %197 = vector.load %arg7[%c292, %c0_238] : memref<400x544xbf16, #tpu.memory_space<vmem>>, vector<4x544xbf16>
    tpu.vector_store %arg7[%c292, %c0_238], %196 {strides = array<i32>} : memref<400x544xbf16, #tpu.memory_space<vmem>>, vector<4x544xbf16>,
    %c0_239 = arith.constant 0 : index
    %c484 = arith.constant 484 : index
    %198 = vector.load %arg6[%c0_239, %c484] : memref<4x1280xbf16, #tpu.memory_space<vmem>>, vector<4x544xbf16>
    %c296 = arith.constant 296 : index
    %c0_240 = arith.constant 0 : index
    %199 = vector.load %arg7[%c296, %c0_240] : memref<400x544xbf16, #tpu.memory_space<vmem>>, vector<4x544xbf16>
    tpu.vector_store %arg7[%c296, %c0_240], %198 {strides = array<i32>} : memref<400x544xbf16, #tpu.memory_space<vmem>>, vector<4x544xbf16>,
    %c0_241 = arith.constant 0 : index
    %c486 = arith.constant 486 : index
    %200 = vector.load %arg6[%c0_241, %c486] : memref<4x1280xbf16, #tpu.memory_space<vmem>>, vector<4x544xbf16>
    %c300 = arith.constant 300 : index
    %c0_242 = arith.constant 0 : index
    %201 = vector.load %arg7[%c300, %c0_242] : memref<400x544xbf16, #tpu.memory_space<vmem>>, vector<4x544xbf16>
    tpu.vector_store %arg7[%c300, %c0_242], %200 {strides = array<i32>} : memref<400x544xbf16, #tpu.memory_space<vmem>>, vector<4x544xbf16>,
    %c0_243 = arith.constant 0 : index
    %c488 = arith.constant 488 : index
    %202 = vector.load %arg6[%c0_243, %c488] : memref<4x1280xbf16, #tpu.memory_space<vmem>>, vector<4x544xbf16>
    %c304 = arith.constant 304 : index
    %c0_244 = arith.constant 0 : index
    %203 = vector.load %arg7[%c304, %c0_244] : memref<400x544xbf16, #tpu.memory_space<vmem>>, vector<4x544xbf16>
    tpu.vector_store %arg7[%c304, %c0_244], %202 {strides = array<i32>} : memref<400x544xbf16, #tpu.memory_space<vmem>>, vector<4x544xbf16>,
    %c0_245 = arith.constant 0 : index
    %c490 = arith.constant 490 : index
    %204 = vector.load %arg6[%c0_245, %c490] : memref<4x1280xbf16, #tpu.memory_space<vmem>>, vector<4x544xbf16>
    %c308 = arith.constant 308 : index
    %c0_246 = arith.constant 0 : index
    %205 = vector.load %arg7[%c308, %c0_246] : memref<400x544xbf16, #tpu.memory_space<vmem>>, vector<4x544xbf16>
    tpu.vector_store %arg7[%c308, %c0_246], %204 {strides = array<i32>} : memref<400x544xbf16, #tpu.memory_space<vmem>>, vector<4x544xbf16>,
    %c0_247 = arith.constant 0 : index
    %c492 = arith.constant 492 : index
    %206 = vector.load %arg6[%c0_247, %c492] : memref<4x1280xbf16, #tpu.memory_space<vmem>>, vector<4x544xbf16>
    %c312 = arith.constant 312 : index
    %c0_248 = arith.constant 0 : index
    %207 = vector.load %arg7[%c312, %c0_248] : memref<400x544xbf16, #tpu.memory_space<vmem>>, vector<4x544xbf16>
    tpu.vector_store %arg7[%c312, %c0_248], %206 {strides = array<i32>} : memref<400x544xbf16, #tpu.memory_space<vmem>>, vector<4x544xbf16>,
    %c0_249 = arith.constant 0 : index
    %c494 = arith.constant 494 : index
    %208 = vector.load %arg6[%c0_249, %c494] : memref<4x1280xbf16, #tpu.memory_space<vmem>>, vector<4x544xbf16>
    %c316 = arith.constant 316 : index
    %c0_250 = arith.constant 0 : index
    %209 = vector.load %arg7[%c316, %c0_250] : memref<400x544xbf16, #tpu.memory_space<vmem>>, vector<4x544xbf16>
    tpu.vector_store %arg7[%c316, %c0_250], %208 {strides = array<i32>} : memref<400x544xbf16, #tpu.memory_space<vmem>>, vector<4x544xbf16>,
    %c0_251 = arith.constant 0 : index
    %c544 = arith.constant 544 : index
    %210 = vector.load %arg6[%c0_251, %c544] : memref<4x1280xbf16, #tpu.memory_space<vmem>>, vector<4x544xbf16>
    %c320 = arith.constant 320 : index
    %c0_252 = arith.constant 0 : index
    %211 = vector.load %arg7[%c320, %c0_252] : memref<400x544xbf16, #tpu.memory_space<vmem>>, vector<4x544xbf16>
    tpu.vector_store %arg7[%c320, %c0_252], %210 {strides = array<i32>} : memref<400x544xbf16, #tpu.memory_space<vmem>>, vector<4x544xbf16>,
    %c0_253 = arith.constant 0 : index
    %c546 = arith.constant 546 : index
    %212 = vector.load %arg6[%c0_253, %c546] : memref<4x1280xbf16, #tpu.memory_space<vmem>>, vector<4x544xbf16>
    %c324 = arith.constant 324 : index
    %c0_254 = arith.constant 0 : index
    %213 = vector.load %arg7[%c324, %c0_254] : memref<400x544xbf16, #tpu.memory_space<vmem>>, vector<4x544xbf16>
    tpu.vector_store %arg7[%c324, %c0_254], %212 {strides = array<i32>} : memref<400x544xbf16, #tpu.memory_space<vmem>>, vector<4x544xbf16>,
    %c0_255 = arith.constant 0 : index
    %c548 = arith.constant 548 : index
    %214 = vector.load %arg6[%c0_255, %c548] : memref<4x1280xbf16, #tpu.memory_space<vmem>>, vector<4x544xbf16>
    %c328 = arith.constant 328 : index
    %c0_256 = arith.constant 0 : index
    %215 = vector.load %arg7[%c328, %c0_256] : memref<400x544xbf16, #tpu.memory_space<vmem>>, vector<4x544xbf16>
    tpu.vector_store %arg7[%c328, %c0_256], %214 {strides = array<i32>} : memref<400x544xbf16, #tpu.memory_space<vmem>>, vector<4x544xbf16>,
    %c0_257 = arith.constant 0 : index
    %c550 = arith.constant 550 : index
    %216 = vector.load %arg6[%c0_257, %c550] : memref<4x1280xbf16, #tpu.memory_space<vmem>>, vector<4x544xbf16>
    %c332 = arith.constant 332 : index
    %c0_258 = arith.constant 0 : index
    %217 = vector.load %arg7[%c332, %c0_258] : memref<400x544xbf16, #tpu.memory_space<vmem>>, vector<4x544xbf16>
    tpu.vector_store %arg7[%c332, %c0_258], %216 {strides = array<i32>} : memref<400x544xbf16, #tpu.memory_space<vmem>>, vector<4x544xbf16>,
    %c0_259 = arith.constant 0 : index
    %c552 = arith.constant 552 : index
    %218 = vector.load %arg6[%c0_259, %c552] : memref<4x1280xbf16, #tpu.memory_space<vmem>>, vector<4x544xbf16>
    %c336 = arith.constant 336 : index
    %c0_260 = arith.constant 0 : index
    %219 = vector.load %arg7[%c336, %c0_260] : memref<400x544xbf16, #tpu.memory_space<vmem>>, vector<4x544xbf16>
    tpu.vector_store %arg7[%c336, %c0_260], %218 {strides = array<i32>} : memref<400x544xbf16, #tpu.memory_space<vmem>>, vector<4x544xbf16>,
    %c0_261 = arith.constant 0 : index
    %c554 = arith.constant 554 : index
    %220 = vector.load %arg6[%c0_261, %c554] : memref<4x1280xbf16, #tpu.memory_space<vmem>>, vector<4x544xbf16>
    %c340_262 = arith.constant 340 : index
    %c0_263 = arith.constant 0 : index
    %221 = vector.load %arg7[%c340_262, %c0_263] : memref<400x544xbf16, #tpu.memory_space<vmem>>, vector<4x544xbf16>
    tpu.vector_store %arg7[%c340_262, %c0_263], %220 {strides = array<i32>} : memref<400x544xbf16, #tpu.memory_space<vmem>>, vector<4x544xbf16>,
    %c0_264 = arith.constant 0 : index
    %c556 = arith.constant 556 : index
    %222 = vector.load %arg6[%c0_264, %c556] : memref<4x1280xbf16, #tpu.memory_space<vmem>>, vector<4x544xbf16>
    %c344_265 = arith.constant 344 : index
    %c0_266 = arith.constant 0 : index
    %223 = vector.load %arg7[%c344_265, %c0_266] : memref<400x544xbf16, #tpu.memory_space<vmem>>, vector<4x544xbf16>
    tpu.vector_store %arg7[%c344_265, %c0_266], %222 {strides = array<i32>} : memref<400x544xbf16, #tpu.memory_space<vmem>>, vector<4x544xbf16>,
    %c0_267 = arith.constant 0 : index
    %c558 = arith.constant 558 : index
    %224 = vector.load %arg6[%c0_267, %c558] : memref<4x1280xbf16, #tpu.memory_space<vmem>>, vector<4x544xbf16>
    %c348_268 = arith.constant 348 : index
    %c0_269 = arith.constant 0 : index
    %225 = vector.load %arg7[%c348_268, %c0_269] : memref<400x544xbf16, #tpu.memory_space<vmem>>, vector<4x544xbf16>
    tpu.vector_store %arg7[%c348_268, %c0_269], %224 {strides = array<i32>} : memref<400x544xbf16, #tpu.memory_space<vmem>>, vector<4x544xbf16>,
    %c0_270 = arith.constant 0 : index
    %c560 = arith.constant 560 : index
    %226 = vector.load %arg6[%c0_270, %c560] : memref<4x1280xbf16, #tpu.memory_space<vmem>>, vector<4x544xbf16>
    %c352_271 = arith.constant 352 : index
    %c0_272 = arith.constant 0 : index
    %227 = vector.load %arg7[%c352_271, %c0_272] : memref<400x544xbf16, #tpu.memory_space<vmem>>, vector<4x544xbf16>
    tpu.vector_store %arg7[%c352_271, %c0_272], %226 {strides = array<i32>} : memref<400x544xbf16, #tpu.memory_space<vmem>>, vector<4x544xbf16>,
    %c0_273 = arith.constant 0 : index
    %c562 = arith.constant 562 : index
    %228 = vector.load %arg6[%c0_273, %c562] : memref<4x1280xbf16, #tpu.memory_space<vmem>>, vector<4x544xbf16>
    %c356_274 = arith.constant 356 : index
    %c0_275 = arith.constant 0 : index
    %229 = vector.load %arg7[%c356_274, %c0_275] : memref<400x544xbf16, #tpu.memory_space<vmem>>, vector<4x544xbf16>
    tpu.vector_store %arg7[%c356_274, %c0_275], %228 {strides = array<i32>} : memref<400x544xbf16, #tpu.memory_space<vmem>>, vector<4x544xbf16>,
    %c0_276 = arith.constant 0 : index
    %c612 = arith.constant 612 : index
    %230 = vector.load %arg6[%c0_276, %c612] : memref<4x1280xbf16, #tpu.memory_space<vmem>>, vector<4x544xbf16>
    %c360 = arith.constant 360 : index
    %c0_277 = arith.constant 0 : index
    %231 = vector.load %arg7[%c360, %c0_277] : memref<400x544xbf16, #tpu.memory_space<vmem>>, vector<4x544xbf16>
    tpu.vector_store %arg7[%c360, %c0_277], %230 {strides = array<i32>} : memref<400x544xbf16, #tpu.memory_space<vmem>>, vector<4x544xbf16>,
    %c0_278 = arith.constant 0 : index
    %c614 = arith.constant 614 : index
    %232 = vector.load %arg6[%c0_278, %c614] : memref<4x1280xbf16, #tpu.memory_space<vmem>>, vector<4x544xbf16>
    %c364 = arith.constant 364 : index
    %c0_279 = arith.constant 0 : index
    %233 = vector.load %arg7[%c364, %c0_279] : memref<400x544xbf16, #tpu.memory_space<vmem>>, vector<4x544xbf16>
    tpu.vector_store %arg7[%c364, %c0_279], %232 {strides = array<i32>} : memref<400x544xbf16, #tpu.memory_space<vmem>>, vector<4x544xbf16>,
    %c0_280 = arith.constant 0 : index
    %c616 = arith.constant 616 : index
    %234 = vector.load %arg6[%c0_280, %c616] : memref<4x1280xbf16, #tpu.memory_space<vmem>>, vector<4x544xbf16>
    %c368 = arith.constant 368 : index
    %c0_281 = arith.constant 0 : index
    %235 = vector.load %arg7[%c368, %c0_281] : memref<400x544xbf16, #tpu.memory_space<vmem>>, vector<4x544xbf16>
    tpu.vector_store %arg7[%c368, %c0_281], %234 {strides = array<i32>} : memref<400x544xbf16, #tpu.memory_space<vmem>>, vector<4x544xbf16>,
    %c0_282 = arith.constant 0 : index
    %c618 = arith.constant 618 : index
    %236 = vector.load %arg6[%c0_282, %c618] : memref<4x1280xbf16, #tpu.memory_space<vmem>>, vector<4x544xbf16>
    %c372 = arith.constant 372 : index
    %c0_283 = arith.constant 0 : index
    %237 = vector.load %arg7[%c372, %c0_283] : memref<400x544xbf16, #tpu.memory_space<vmem>>, vector<4x544xbf16>
    tpu.vector_store %arg7[%c372, %c0_283], %236 {strides = array<i32>} : memref<400x544xbf16, #tpu.memory_space<vmem>>, vector<4x544xbf16>,
    %c0_284 = arith.constant 0 : index
    %c620 = arith.constant 620 : index
    %238 = vector.load %arg6[%c0_284, %c620] : memref<4x1280xbf16, #tpu.memory_space<vmem>>, vector<4x544xbf16>
    %c376 = arith.constant 376 : index
    %c0_285 = arith.constant 0 : index
    %239 = vector.load %arg7[%c376, %c0_285] : memref<400x544xbf16, #tpu.memory_space<vmem>>, vector<4x544xbf16>
    tpu.vector_store %arg7[%c376, %c0_285], %238 {strides = array<i32>} : memref<400x544xbf16, #tpu.memory_space<vmem>>, vector<4x544xbf16>,
    %c0_286 = arith.constant 0 : index
    %c622 = arith.constant 622 : index
    %240 = vector.load %arg6[%c0_286, %c622] : memref<4x1280xbf16, #tpu.memory_space<vmem>>, vector<4x544xbf16>
    %c380 = arith.constant 380 : index
    %c0_287 = arith.constant 0 : index
    %241 = vector.load %arg7[%c380, %c0_287] : memref<400x544xbf16, #tpu.memory_space<vmem>>, vector<4x544xbf16>
    tpu.vector_store %arg7[%c380, %c0_287], %240 {strides = array<i32>} : memref<400x544xbf16, #tpu.memory_space<vmem>>, vector<4x544xbf16>,
    %c0_288 = arith.constant 0 : index
    %c624 = arith.constant 624 : index
    %242 = vector.load %arg6[%c0_288, %c624] : memref<4x1280xbf16, #tpu.memory_space<vmem>>, vector<4x544xbf16>
    %c384 = arith.constant 384 : index
    %c0_289 = arith.constant 0 : index
    %243 = vector.load %arg7[%c384, %c0_289] : memref<400x544xbf16, #tpu.memory_space<vmem>>, vector<4x544xbf16>
    tpu.vector_store %arg7[%c384, %c0_289], %242 {strides = array<i32>} : memref<400x544xbf16, #tpu.memory_space<vmem>>, vector<4x544xbf16>,
    %c0_290 = arith.constant 0 : index
    %c626 = arith.constant 626 : index
    %244 = vector.load %arg6[%c0_290, %c626] : memref<4x1280xbf16, #tpu.memory_space<vmem>>, vector<4x544xbf16>
    %c388 = arith.constant 388 : index
    %c0_291 = arith.constant 0 : index
    %245 = vector.load %arg7[%c388, %c0_291] : memref<400x544xbf16, #tpu.memory_space<vmem>>, vector<4x544xbf16>
    tpu.vector_store %arg7[%c388, %c0_291], %244 {strides = array<i32>} : memref<400x544xbf16, #tpu.memory_space<vmem>>, vector<4x544xbf16>,
    %c0_292 = arith.constant 0 : index
    %c628 = arith.constant 628 : index
    %246 = vector.load %arg6[%c0_292, %c628] : memref<4x1280xbf16, #tpu.memory_space<vmem>>, vector<4x544xbf16>
    %c392 = arith.constant 392 : index
    %c0_293 = arith.constant 0 : index
    %247 = vector.load %arg7[%c392, %c0_293] : memref<400x544xbf16, #tpu.memory_space<vmem>>, vector<4x544xbf16>
    tpu.vector_store %arg7[%c392, %c0_293], %246 {strides = array<i32>} : memref<400x544xbf16, #tpu.memory_space<vmem>>, vector<4x544xbf16>,
    %c0_294 = arith.constant 0 : index
    %c630 = arith.constant 630 : index
    %248 = vector.load %arg6[%c0_294, %c630] : memref<4x1280xbf16, #tpu.memory_space<vmem>>, vector<4x544xbf16>
    %c396 = arith.constant 396 : index
    %c0_295 = arith.constant 0 : index
    %249 = vector.load %arg7[%c396, %c0_295] : memref<400x544xbf16, #tpu.memory_space<vmem>>, vector<4x544xbf16>
    tpu.vector_store %arg7[%c396, %c0_295], %248 {strides = array<i32>} : memref<400x544xbf16, #tpu.memory_space<vmem>>, vector<4x544xbf16>,
    %c0_296 = arith.constant 0 : index
    %c0_297 = arith.constant 0 : index
    %250 = vector.load %arg2[%c0_296, %c0_297] : memref<8x400xbf16, #tpu.memory_space<vmem>>, vector<8x400xbf16>
    %c0_298 = arith.constant 0 : index
    %c0_299 = arith.constant 0 : index
    %251 = vector.load %arg7[%c0_298, %c0_299] : memref<400x544xbf16, #tpu.memory_space<vmem>>, vector<400x544xbf16>
    %cst_300 = arith.constant dense<0.000000e+00> : vector<8x544xf32>
    %252 = tpu.matmul %250, %251, %cst_300 {dimension_numbers = #tpu.dot_dimension_numbers<[1], [0], [0], [1], [0, 0, 1, 1], [], []>} : vector<8x400xbf16>, vector<400x544xbf16>, vector<8x544xf32> -> vector<8x544xf32>
    %253 = vector.extract_strided_slice %252 {offsets = [0, 0], sizes = [8, 16], strides = [1, 1]} : vector<8x544xf32> to vector<8x16xf32>
    %c0_301 = arith.constant 0 : index
    %c0_302 = arith.constant 0 : index
    %c0_303 = arith.constant 0 : index
    %254 = vector.load %arg3[%c0_301, %c0_302, %c0_303] : memref<1x8x256xf32, #tpu.memory_space<vmem>>, vector<1x8x16xf32>
    %255 = vector.shape_cast %254 : vector<1x8x16xf32> to vector<8x16xf32>
    %256 = vector.shape_cast %253 : vector<8x16xf32> to vector<1x8x16xf32>
    tpu.vector_store %arg3[%c0_301, %c0_302, %c0_303], %256 {strides = array<i32>} : memref<1x8x256xf32, #tpu.memory_space<vmem>>, vector<1x8x16xf32>,
    %257 = vector.extract_strided_slice %252 {offsets = [0, 34], sizes = [8, 16], strides = [1, 1]} : vector<8x544xf32> to vector<8x16xf32>
    %c0_304 = arith.constant 0 : index
    %c0_305 = arith.constant 0 : index
    %c16_306 = arith.constant 16 : index
    %258 = vector.load %arg3[%c0_304, %c0_305, %c16_306] : memref<1x8x256xf32, #tpu.memory_space<vmem>>, vector<1x8x16xf32>
    %259 = vector.shape_cast %258 : vector<1x8x16xf32> to vector<8x16xf32>
    %260 = vector.shape_cast %257 : vector<8x16xf32> to vector<1x8x16xf32>
    tpu.vector_store %arg3[%c0_304, %c0_305, %c16_306], %260 {strides = array<i32>} : memref<1x8x256xf32, #tpu.memory_space<vmem>>, vector<1x8x16xf32>,
    %261 = vector.extract_strided_slice %252 {offsets = [0, 68], sizes = [8, 16], strides = [1, 1]} : vector<8x544xf32> to vector<8x16xf32>
    %c0_307 = arith.constant 0 : index
    %c0_308 = arith.constant 0 : index
    %c32_309 = arith.constant 32 : index
    %262 = vector.load %arg3[%c0_307, %c0_308, %c32_309] : memref<1x8x256xf32, #tpu.memory_space<vmem>>, vector<1x8x16xf32>
    %263 = vector.shape_cast %262 : vector<1x8x16xf32> to vector<8x16xf32>
    %264 = vector.shape_cast %261 : vector<8x16xf32> to vector<1x8x16xf32>
    tpu.vector_store %arg3[%c0_307, %c0_308, %c32_309], %264 {strides = array<i32>} : memref<1x8x256xf32, #tpu.memory_space<vmem>>, vector<1x8x16xf32>,
    %265 = vector.extract_strided_slice %252 {offsets = [0, 102], sizes = [8, 16], strides = [1, 1]} : vector<8x544xf32> to vector<8x16xf32>
    %c0_310 = arith.constant 0 : index
    %c0_311 = arith.constant 0 : index
    %c48_312 = arith.constant 48 : index
    %266 = vector.load %arg3[%c0_310, %c0_311, %c48_312] : memref<1x8x256xf32, #tpu.memory_space<vmem>>, vector<1x8x16xf32>
    %267 = vector.shape_cast %266 : vector<1x8x16xf32> to vector<8x16xf32>
    %268 = vector.shape_cast %265 : vector<8x16xf32> to vector<1x8x16xf32>
    tpu.vector_store %arg3[%c0_310, %c0_311, %c48_312], %268 {strides = array<i32>} : memref<1x8x256xf32, #tpu.memory_space<vmem>>, vector<1x8x16xf32>,
    %269 = vector.extract_strided_slice %252 {offsets = [0, 136], sizes = [8, 16], strides = [1, 1]} : vector<8x544xf32> to vector<8x16xf32>
    %c0_313 = arith.constant 0 : index
    %c0_314 = arith.constant 0 : index
    %c64_315 = arith.constant 64 : index
    %270 = vector.load %arg3[%c0_313, %c0_314, %c64_315] : memref<1x8x256xf32, #tpu.memory_space<vmem>>, vector<1x8x16xf32>
    %271 = vector.shape_cast %270 : vector<1x8x16xf32> to vector<8x16xf32>
    %272 = vector.shape_cast %269 : vector<8x16xf32> to vector<1x8x16xf32>
    tpu.vector_store %arg3[%c0_313, %c0_314, %c64_315], %272 {strides = array<i32>} : memref<1x8x256xf32, #tpu.memory_space<vmem>>, vector<1x8x16xf32>,
    %273 = vector.extract_strided_slice %252 {offsets = [0, 170], sizes = [8, 16], strides = [1, 1]} : vector<8x544xf32> to vector<8x16xf32>
    %c0_316 = arith.constant 0 : index
    %c0_317 = arith.constant 0 : index
    %c80_318 = arith.constant 80 : index
    %274 = vector.load %arg3[%c0_316, %c0_317, %c80_318] : memref<1x8x256xf32, #tpu.memory_space<vmem>>, vector<1x8x16xf32>
    %275 = vector.shape_cast %274 : vector<1x8x16xf32> to vector<8x16xf32>
    %276 = vector.shape_cast %273 : vector<8x16xf32> to vector<1x8x16xf32>
    tpu.vector_store %arg3[%c0_316, %c0_317, %c80_318], %276 {strides = array<i32>} : memref<1x8x256xf32, #tpu.memory_space<vmem>>, vector<1x8x16xf32>,
    %277 = vector.extract_strided_slice %252 {offsets = [0, 204], sizes = [8, 16], strides = [1, 1]} : vector<8x544xf32> to vector<8x16xf32>
    %c0_319 = arith.constant 0 : index
    %c0_320 = arith.constant 0 : index
    %c96_321 = arith.constant 96 : index
    %278 = vector.load %arg3[%c0_319, %c0_320, %c96_321] : memref<1x8x256xf32, #tpu.memory_space<vmem>>, vector<1x8x16xf32>
    %279 = vector.shape_cast %278 : vector<1x8x16xf32> to vector<8x16xf32>
    %280 = vector.shape_cast %277 : vector<8x16xf32> to vector<1x8x16xf32>
    tpu.vector_store %arg3[%c0_319, %c0_320, %c96_321], %280 {strides = array<i32>} : memref<1x8x256xf32, #tpu.memory_space<vmem>>, vector<1x8x16xf32>,
    %281 = vector.extract_strided_slice %252 {offsets = [0, 238], sizes = [8, 16], strides = [1, 1]} : vector<8x544xf32> to vector<8x16xf32>
    %c0_322 = arith.constant 0 : index
    %c0_323 = arith.constant 0 : index
    %c112_324 = arith.constant 112 : index
    %282 = vector.load %arg3[%c0_322, %c0_323, %c112_324] : memref<1x8x256xf32, #tpu.memory_space<vmem>>, vector<1x8x16xf32>
    %283 = vector.shape_cast %282 : vector<1x8x16xf32> to vector<8x16xf32>
    %284 = vector.shape_cast %281 : vector<8x16xf32> to vector<1x8x16xf32>
    tpu.vector_store %arg3[%c0_322, %c0_323, %c112_324], %284 {strides = array<i32>} : memref<1x8x256xf32, #tpu.memory_space<vmem>>, vector<1x8x16xf32>,
    %285 = vector.extract_strided_slice %252 {offsets = [0, 272], sizes = [8, 16], strides = [1, 1]} : vector<8x544xf32> to vector<8x16xf32>
    %c0_325 = arith.constant 0 : index
    %c0_326 = arith.constant 0 : index
    %c128_327 = arith.constant 128 : index
    %286 = vector.load %arg3[%c0_325, %c0_326, %c128_327] : memref<1x8x256xf32, #tpu.memory_space<vmem>>, vector<1x8x16xf32>
    %287 = vector.shape_cast %286 : vector<1x8x16xf32> to vector<8x16xf32>
    %288 = vector.shape_cast %285 : vector<8x16xf32> to vector<1x8x16xf32>
    tpu.vector_store %arg3[%c0_325, %c0_326, %c128_327], %288 {strides = array<i32>} : memref<1x8x256xf32, #tpu.memory_space<vmem>>, vector<1x8x16xf32>,
    %289 = vector.extract_strided_slice %252 {offsets = [0, 306], sizes = [8, 16], strides = [1, 1]} : vector<8x544xf32> to vector<8x16xf32>
    %c0_328 = arith.constant 0 : index
    %c0_329 = arith.constant 0 : index
    %c144_330 = arith.constant 144 : index
    %290 = vector.load %arg3[%c0_328, %c0_329, %c144_330] : memref<1x8x256xf32, #tpu.memory_space<vmem>>, vector<1x8x16xf32>
    %291 = vector.shape_cast %290 : vector<1x8x16xf32> to vector<8x16xf32>
    %292 = vector.shape_cast %289 : vector<8x16xf32> to vector<1x8x16xf32>
    tpu.vector_store %arg3[%c0_328, %c0_329, %c144_330], %292 {strides = array<i32>} : memref<1x8x256xf32, #tpu.memory_space<vmem>>, vector<1x8x16xf32>,
    %293 = vector.extract_strided_slice %252 {offsets = [0, 340], sizes = [8, 16], strides = [1, 1]} : vector<8x544xf32> to vector<8x16xf32>
    %c0_331 = arith.constant 0 : index
    %c0_332 = arith.constant 0 : index
    %c160_333 = arith.constant 160 : index
    %294 = vector.load %arg3[%c0_331, %c0_332, %c160_333] : memref<1x8x256xf32, #tpu.memory_space<vmem>>, vector<1x8x16xf32>
    %295 = vector.shape_cast %294 : vector<1x8x16xf32> to vector<8x16xf32>
    %296 = vector.shape_cast %293 : vector<8x16xf32> to vector<1x8x16xf32>
    tpu.vector_store %arg3[%c0_331, %c0_332, %c160_333], %296 {strides = array<i32>} : memref<1x8x256xf32, #tpu.memory_space<vmem>>, vector<1x8x16xf32>,
    %297 = vector.extract_strided_slice %252 {offsets = [0, 374], sizes = [8, 16], strides = [1, 1]} : vector<8x544xf32> to vector<8x16xf32>
    %c0_334 = arith.constant 0 : index
    %c0_335 = arith.constant 0 : index
    %c176_336 = arith.constant 176 : index
    %298 = vector.load %arg3[%c0_334, %c0_335, %c176_336] : memref<1x8x256xf32, #tpu.memory_space<vmem>>, vector<1x8x16xf32>
    %299 = vector.shape_cast %298 : vector<1x8x16xf32> to vector<8x16xf32>
    %300 = vector.shape_cast %297 : vector<8x16xf32> to vector<1x8x16xf32>
    tpu.vector_store %arg3[%c0_334, %c0_335, %c176_336], %300 {strides = array<i32>} : memref<1x8x256xf32, #tpu.memory_space<vmem>>, vector<1x8x16xf32>,
    %301 = vector.extract_strided_slice %252 {offsets = [0, 408], sizes = [8, 16], strides = [1, 1]} : vector<8x544xf32> to vector<8x16xf32>
    %c0_337 = arith.constant 0 : index
    %c0_338 = arith.constant 0 : index
    %c192_339 = arith.constant 192 : index
    %302 = vector.load %arg3[%c0_337, %c0_338, %c192_339] : memref<1x8x256xf32, #tpu.memory_space<vmem>>, vector<1x8x16xf32>
    %303 = vector.shape_cast %302 : vector<1x8x16xf32> to vector<8x16xf32>
    %304 = vector.shape_cast %301 : vector<8x16xf32> to vector<1x8x16xf32>
    tpu.vector_store %arg3[%c0_337, %c0_338, %c192_339], %304 {strides = array<i32>} : memref<1x8x256xf32, #tpu.memory_space<vmem>>, vector<1x8x16xf32>,
    %305 = vector.extract_strided_slice %252 {offsets = [0, 442], sizes = [8, 16], strides = [1, 1]} : vector<8x544xf32> to vector<8x16xf32>
    %c0_340 = arith.constant 0 : index
    %c0_341 = arith.constant 0 : index
    %c208_342 = arith.constant 208 : index
    %306 = vector.load %arg3[%c0_340, %c0_341, %c208_342] : memref<1x8x256xf32, #tpu.memory_space<vmem>>, vector<1x8x16xf32>
    %307 = vector.shape_cast %306 : vector<1x8x16xf32> to vector<8x16xf32>
    %308 = vector.shape_cast %305 : vector<8x16xf32> to vector<1x8x16xf32>
    tpu.vector_store %arg3[%c0_340, %c0_341, %c208_342], %308 {strides = array<i32>} : memref<1x8x256xf32, #tpu.memory_space<vmem>>, vector<1x8x16xf32>,
    %309 = vector.extract_strided_slice %252 {offsets = [0, 476], sizes = [8, 16], strides = [1, 1]} : vector<8x544xf32> to vector<8x16xf32>
    %c0_343 = arith.constant 0 : index
    %c0_344 = arith.constant 0 : index
    %c224_345 = arith.constant 224 : index
    %310 = vector.load %arg3[%c0_343, %c0_344, %c224_345] : memref<1x8x256xf32, #tpu.memory_space<vmem>>, vector<1x8x16xf32>
    %311 = vector.shape_cast %310 : vector<1x8x16xf32> to vector<8x16xf32>
    %312 = vector.shape_cast %309 : vector<8x16xf32> to vector<1x8x16xf32>
    tpu.vector_store %arg3[%c0_343, %c0_344, %c224_345], %312 {strides = array<i32>} : memref<1x8x256xf32, #tpu.memory_space<vmem>>, vector<1x8x16xf32>,
    %313 = vector.extract_strided_slice %252 {offsets = [0, 510], sizes = [8, 16], strides = [1, 1]} : vector<8x544xf32> to vector<8x16xf32>
    %c0_346 = arith.constant 0 : index
    %c0_347 = arith.constant 0 : index
    %c240_348 = arith.constant 240 : index
    %314 = vector.load %arg3[%c0_346, %c0_347, %c240_348] : memref<1x8x256xf32, #tpu.memory_space<vmem>>, vector<1x8x16xf32>
    %315 = vector.shape_cast %314 : vector<1x8x16xf32> to vector<8x16xf32>
    %316 = vector.shape_cast %313 : vector<8x16xf32> to vector<1x8x16xf32>
    tpu.vector_store %arg3[%c0_346, %c0_347, %c240_348], %316 {strides = array<i32>} : memref<1x8x256xf32, #tpu.memory_space<vmem>>, vector<1x8x16xf32>,
    %c0_349 = arith.constant 0 : index
    %c0_350 = arith.constant 0 : index
    %c0_351 = arith.constant 0 : index
    %317 = vector.load %arg3[%c0_349, %c0_350, %c0_351] : memref<1x8x256xf32, #tpu.memory_space<vmem>>, vector<1x8x256xf32>
    %318 = vector.shape_cast %317 : vector<1x8x256xf32> to vector<8x256xf32>
    %cst_352 = arith.constant dense<0.000000e+00> : vector<8xf32>
    %319 = vector.multi_reduction <add>, %318, %cst_352 [1] : vector<8x256xf32> to vector<8xf32>
    %320 = vector.shape_cast %319 : vector<8xf32> to vector<8x1xf32>
    %c0_353 = arith.constant 0 : index
    %c0_354 = arith.constant 0 : index
    %c0_355 = arith.constant 0 : index
    %321 = vector.load %arg4[%c0_353, %c0_354, %c0_355] : memref<1x8x1xf32, #tpu.memory_space<vmem>>, vector<1x8x1xf32>
    %322 = vector.shape_cast %321 : vector<1x8x1xf32> to vector<8x1xf32>
    %323 = vector.shape_cast %320 : vector<8x1xf32> to vector<1x8x1xf32>
    tpu.vector_store %arg4[%c0_353, %c0_354, %c0_355], %323 {strides = array<i32>} : memref<1x8x1xf32, #tpu.memory_space<vmem>>, vector<1x8x1xf32>,
    %324 = arith.mulf %318, %318 : vector<8x256xf32>
    %cst_356 = arith.constant dense<0.000000e+00> : vector<8xf32>
    %325 = vector.multi_reduction <add>, %324, %cst_356 [1] : vector<8x256xf32> to vector<8xf32>
    %326 = vector.shape_cast %325 : vector<8xf32> to vector<8x1xf32>
    %c0_357 = arith.constant 0 : index
    %c0_358 = arith.constant 0 : index
    %c0_359 = arith.constant 0 : index
    %327 = vector.load %arg5[%c0_357, %c0_358, %c0_359] : memref<1x8x1xf32, #tpu.memory_space<vmem>>, vector<1x8x1xf32>
    %328 = vector.shape_cast %327 : vector<1x8x1xf32> to vector<8x1xf32>
    %329 = vector.shape_cast %326 : vector<8x1xf32> to vector<1x8x1xf32>
    tpu.vector_store %arg5[%c0_357, %c0_358, %c0_359], %329 {strides = array<i32>} : memref<1x8x1xf32, #tpu.memory_space<vmem>>, vector<1x8x1xf32>,
    return
  }
  func.func @transform_0(%arg0: i32) -> (i32, i32, i32) {
    %c0_i32 = arith.constant 0 : i32
    %c0_i32_0 = arith.constant 0 : i32
    %c0_i32_1 = arith.constant 0 : i32
    return %arg0, %c0_i32, %c0_i32_0 : i32, i32, i32
  }
  func.func @transform_1(%arg0: i32) -> (i32, i32) {
    %c0_i32 = arith.constant 0 : i32
    %c0_i32_0 = arith.constant 0 : i32
    %c0_i32_1 = arith.constant 0 : i32
    return %c0_i32, %c0_i32_0 : i32, i32
  }
  func.func @transform_2(%arg0: i32) -> (i32, i32, i32) {
    %c0_i32 = arith.constant 0 : i32
    %c0_i32_0 = arith.constant 0 : i32
    %c0_i32_1 = arith.constant 0 : i32
    return %arg0, %c0_i32, %c0_i32_0 : i32, i32, i32
  }
  func.func @transform_3(%arg0: i32) -> (i32, i32, i32) {
    %c0_i32 = arith.constant 0 : i32
    %c0_i32_0 = arith.constant 0 : i32
    %c0_i32_1 = arith.constant 0 : i32
    return %arg0, %c0_i32, %c0_i32_0 : i32, i32, i32
  }
  func.func @transform_4(%arg0: i32) -> (i32, i32, i32) {
    %c0_i32 = arith.constant 0 : i32
    %c0_i32_0 = arith.constant 0 : i32
    %c0_i32_1 = arith.constant 0 : i32
    return %arg0, %c0_i32, %c0_i32_0 : i32, i32, i32
  }
}

</mosaic_0001>

<bundles_post_ra>
// kernel: tpu_custom_call.1
= control target key start
LH: loop header
LB: loop body
LE: loop exit
PB: predicated region body
PF: predicated region fallthrough
CT: control target
= control target key end

     0   :  { %s9286_s0 = inlined_call_operand.hbm [shape: bf16[2,4,256], index: 0, kind: input, shape index: {}]   ;;  %s9287_s1 = inlined_call_operand.hbm [shape: bf16[8,400], index: 1, kind: input, shape index: {}]   ;;  %s9288_s2 = inlined_call_operand.hbm [shape: f32[2,8,256], index: 2, kind: output, shape index: {0}]   ;;  %s9289_s3 = inlined_call_operand.vmem [shape: f32[2,8,1], index: 3, kind: output, shape index: {1}]   ;;  %s9290_s4 = inlined_call_operand.vmem [shape: f32[2,8,1], index: 4, kind: output, shape index: {2}]  }
   0x1   :  { %9559 = sst [smem:[#allocation50_spill]] %s9286_s0 }
   0x2   :  { %9560 = sst [smem:[#allocation51_spill]] %s9287_s1 }
   0x3   :  { %9561 = sst [smem:[#allocation52_spill]] %s9288_s2 }
   0x4   :  { %9562 = sst [smem:[#allocation53_spill]] %s9289_s3 }
   0x5   :  { %9563 = sst [smem:[#allocation54_spill]] %s9290_s4 }
   0x6   :  { %10 = vsyncpa [#allocation5], 0 }
   0x7   :  { %12 = vsyncpa [#allocation5 + $0x1], 0 }
   0x8   :  { %13 = vsyncpa [#allocation8], 0 }
   0x9   :  { %14 = vsyncpa [#allocation6], 0 }
   0xa   :  { %16 = vsyncpa [#allocation6 + $0x1], 0  ;;  %s7115_s15 = smov 0   ;;  %s7117_s16 = smov 0  }
   0xb   :  { %s7119_s17 = smov 0   ;;  %s7121_s18 = smov 0  }
   0xc LB: > { %9564 = sst [smem:[#allocation13_spill]] %s7000_s15  ;;  %s7136_s19 = sadd.s32 4294967295, %s7012_s18   ;;  %s7012_s18 = sphi %s7121_s18, %s9936_s18   ;;  %s7008_s17 = sphi %s7119_s17, %s9939_s17   ;;  %s7004_s16 = sphi %s7117_s16, %s9938_s16   ;;  %s7000_s15 = sphi %s7115_s15, %s9937_s15  }
   0xd   : > { %9565 = sst [smem:[#allocation14_spill]] %s7004_s16  ;;  %s6299_s20 = sadd.s32 4294967294, %s7012_s18  }
   0xe   : > { %9566 = sst [smem:[#allocation15_spill]] %s7008_s17  ;;  %p42_p0 = scmp.ne.s32.totalorder %s7004_s16, %s7000_s15 }
   0xf   : > { %9567 = sst [smem:[#allocation16_spill]] %s7012_s18  ;;  %p9291_p1 = scmp.eq.s32.totalorder %s7136_s19, 0 }
  0x10   : > { %9568 = sst [smem:[#allocation17_spill]] %s7136_s19  ;;  %p93_p3 = scmp.eq.s32.totalorder %s6299_s20, 1 }
  0x11   : > { %p7145_p4 = por %p9291_p1, %p42_p0  ;;  %p6300_p5 = scmp.ge.s32.totalorder %s7012_s18, 1 }
  0x12   : > { %p7150_p6 = por %p93_p3, %p42_p0  ;;  %p152_p7 = scmp.lt.s32.totalorder %s7012_s18, 3 }
  0x13   : > { %s9569_s21 = scalar_select %p7145_p4, 1, 0 }
  0x14   : > { %s9570_s22 = scalar_select %p7150_p6, 1, 0 }
  0x15   : > { %p7155_p8 = pnand %p6300_p5, %p152_p7  ;;  %s7014_s24 = smov [#allocation7]  }
  0x16   : > { %9571 = sst [smem:[#allocation18_spill]] %s9570_s22  ;;  %s165_s25 = sshll.u32 %s7014_s24, 4  ;;  %s166_s25 = int_to_ptr.vmem [resolvable:$true] %s165_s25 }
  0x17   : > { %s9572_s23 = scalar_select %p7155_p8, 1, 0 }
  0x18   : > { %p6533_p10 = pneg %p7155_p8  ;;  %s7163_s26 = sadd.s32 1, %s7012_s18  }
  0x19   : > { %9573 = sst [smem:[#allocation19_spill]] %s7163_s26  ;;  %s26_s28 = ssub.s32 %s7012_s18, %s7163_s26 }
  0x1a   : > { %p7167_p11 = pnand %p6533_p10, %p9291_p1  ;;  %p7173_p12 = scmp.eq.s32.totalorder %s26_s28, 0 }
  0x1b   : > { %s29_s30 = sadd.s32 1, %s7008_s17  ;;  %p36_p13 = scmp.ne.s32.totalorder %s7008_s17, %s7004_s16 }
  0x1c   : > { %p6892_p0 = pneg %p7167_p11  ;;  %s6901_s5 = scalar_lea.vmem %s166_s25, 256 }
  0x1d   : > { %p6902_p3 = scmp.ne.s32.totalorder %s166_s25, %s6901_s5  ;;  %p6909_p9 = scmp.lt.s32.totalorder %s166_s25, %s166_s25 }
  0x1e   : > { %p6910_p2 = scmp.lt.s32.totalorder %s6901_s5, %s6901_s5 }
  0x1f   : > { %p6904_p5 = pnand %p6902_p3, %p6892_p0 }
  0x20   : > { %p6911_p10 = por %p6910_p2, %p6909_p9 }
  0x21   : > { %p6905_p7 = pneg %p6904_p5 }
  0x23   : > { %p6912_p1 = pnand %p6911_p10, %p6905_p7 }
  0x25   : > { %6915 = shalt.err (!%p6912_p1)
}
  0x26   : > { %s9576_s1 = sld [smem:[#allocation51_spill]]  ;;  %p37_p1 = scmp.eq.s32.totalorder %s7012_s18, 0 }
  0x27   : > { %s7190_s8 = scalar_select %p7173_p12, %s7008_s17, %s29_s30  }
  0x28   : > { %p9578_p2 = scmp.eq.s32.totalorder %s7136_s19, 1  ;;  %p6546_p0 = scmp.lt.s32.totalorder %s7012_s18, 2 }
  0x29   : > { %9577 = sst [smem:[#allocation20_spill]] %s7190_s8  ;;  %s176_s10 = sand.u32 1, %s7008_s17  }
  0x2a   : > { %p7198_p9 = por %p9578_p2, %p36_p13  ;;  %p38_p3 = por %p37_p1, %p36_p13 }
  0x2b   : > { %s6303_s11 = sshll.u32 %s176_s10, 2  ;;  %s6501_s12 = sshll.u32 %s7012_s18, 6 }
  0x2c   : > { %6536 = dma.hbm_to_vmem [thread:$0]  (!%p7167_p11), %s9576_s1, 256, %s166_s25, [#allocation8]  }
  0x2d   : > { %s9579_s9 = scalar_select %p7198_p9, 1, 0 }
  0x2e   : > { %s9581_s0 = sld [smem:[#allocation50_spill]]  ;;  %s180_s24 = scalar_lea.vmem [#allocation4], %s6303_s11 }
  0x2f   : > { %9580 = sst [smem:[#allocation21_spill]] %s9579_s9  ;;  %s188_s25 = sshll.u32 %s180_s24, 4  ;;  %s189_s25 = int_to_ptr.vmem [resolvable:$true] %s188_s25 }
  0x30   : > { %p7213_p11 = pnand %p6546_p0, %p38_p3  ;;  %s177_s28 = scalar_lea.sflag [#allocation5], %s176_s10 }
  0x32   : > { %p6918_p13 = pneg %p7213_p11 }
  0x34   : > { %s7211_s20 = scalar_lea.hbm %s9581_s0, %s6501_s12  ;;  %s6921_s6 = scalar_lea.hbm %s9581_s0, 128 }
  0x35   : > { %s6916_s29 = scalar_lea.hbm %s7211_s20, 64  ;;  %p6922_p10 = scmp.lt.s32.totalorder %s7211_s20, %s9581_s0 }
  0x36   : > { %p6917_p12 = scmp.ne.s32.totalorder %s7211_s20, %s6916_s29  ;;  %p6923_p1 = scmp.lt.s32.totalorder %s6921_s6, %s6916_s29 }
  0x38   : > { %p6919_p5 = pnand %p6918_p13, %p6917_p12  ;;  %p6924_p2 = por %p6923_p1, %p6922_p10 }
  0x3a   : > { %p6920_p7 = pneg %p6919_p5 }
  0x3c   : > { %p6925_p0 = pnand %p6924_p2, %p6920_p7 }
  0x3e   : > { %6928 = shalt.err (!%p6925_p0)
}
  0x3f   : > { %s6929_s12 = scalar_lea.vmem %s189_s25, 64  ;;  %s7015_s10 = smov [#allocation4]  }
  0x40   : > { %p6930_p3 = scmp.ne.s32.totalorder %s189_s25, %s6929_s12  ;;  %s6934_s13 = sshll.u32 %s7015_s10, 4  ;;  %s6935_s13 = int_to_ptr.vmem [resolvable:$false] %s6934_s13 }
  0x41   : > { %s6936_s14 = scalar_lea.vmem %s6935_s13, 128  ;;  %p6937_p12 = scmp.lt.s32.totalorder %s189_s25, %s6935_s13 }
  0x42   : > { %p6932_p6 = pnand %p6930_p3, %p6918_p13  ;;  %p6938_p5 = scmp.lt.s32.totalorder %s6936_s14, %s6929_s12 }
  0x44   : > { %p6933_p9 = pneg %p6932_p6  ;;  %p6939_p4 = por %p6938_p5, %p6937_p12 }
  0x46   : > { %p6940_p8 = pnand %p6939_p4, %p6933_p9 }
  0x48   : > { %6943 = shalt.err (!%p6940_p8)
}
  0x49   : > { %6540 = dma.hbm_to_vmem [thread:$0]  (!%p7213_p11), %s7211_s20, 64, %s189_s25, %s177_s28  }
  0x4a   : > { %p9583_p7 = scmp.ne.s32.totalorder %s9572_s23, 0 }
  0x4c   : > { %197 = sbr.rel (%p9583_p7) target bundleno = 1454 (0x5ae), region = 28 }
  0x51   : > { %s7234_s24 = sand.u32 1, %s7004_s16   ;;  %p9584_p6 = scmp.ne.s32.totalorder %s9569_s21, 0 }
  0x52   : > { %s6307_s29 = sshll.u32 %s7234_s24, 2  ;;  %s200_s30 = scalar_lea.sflag [#allocation5], %s7234_s24 }
  0x53   : > { %s7238_s5 = scalar_lea.vmem [#allocation4], %s6307_s29 }
  0x54   : > { %6987 = dma.done.wait (%p9584_p6), %s200_s30, 64  }
  0x55   : > { %6989 = vsyncadd (%p9584_p6), %s200_s30, 4294967232  ;;  %p9585_p4 = scmp.eq.s32.totalorder %s7136_s19, 0 }
  0x57   : > { %6991 = dma.done.wait (%p9585_p4), [#allocation8], 256   ;;  %p9586_p8 = pmov %p9585_p4 }
  0x58   : > { %v9361_v0 = vmov 0   ;;  %v266_v1 = vld [vmem:[%s7238_s5] sm:$0x3]  ;;  %s7017_s21 = smov 95   ;;  %s7018_s23 = smov 59   ;;  %vm257_vm0 = vcmask 607704   ;;  %v415_v32 = vlaneseq }
  0x59   : > { %6993 = vsyncadd (%p9586_p8), [#allocation8], 4294967040  ;;  %249 = vst [vmem:[#allocation2] sm:$0xff] %v9361_v0  ;;  %v252_v2 = vld [vmem:[%s7238_s5] sm:$0x3]  ;;  %268 = vrot.lane.b32.xlu1 %v266_v1, %s7017_s21  ;;  %s7019_s20 = smov 113  }
  0x5a   : > { %250 = vst [vmem:[#allocation2 + $0x8] sm:$0xff] %v9361_v0  ;;  %251 = vst [vmem:[#allocation2 + $0x10] sm:$0xf] %v9361_v0  ;;  %254 = vrot.lane.b32.xlu0 %v252_v2, %s7018_s23  ;;  %v278_v3 = vld [vmem:[%s7238_s5] sm:$0x3]  ;;  %s7020_s25 = smov 77  }
  0x5b   : > { %v259_v4 = vld [vmem:[%s7238_s5] sm:$0x3]  ;;  %s7021_s27 = smov 21   ;;  %s7022_s28 = smov 3   ;;  %v320_v9 = vld [vmem:[%s7238_s5 + $0x2] sm:$0x3] }
  0x5c   : > { %v292_v5 = vld [vmem:[%s7238_s5] sm:$0x3]  ;;  %s7023_s6 = smov 57   ;;  %s7024_s7 = smov 39   ;;  %v313_v10 = vld [vmem:[%s7238_s5 + $0x2] sm:$0x3] }
  0x5d   : > { %280 = vrot.lane.b32.xlu1 %v278_v3, %s7019_s20  ;;  %v285_v6 = vld [vmem:[%s7238_s5] sm:$0x3]  ;;  %s7025_s11 = smov 93   ;;  %s7026_s12 = smov 75   ;;  %v334_v11 = vld [vmem:[%s7238_s5 + $0x2] sm:$0x3] }
  0x5e   : > { %261 = vrot.lane.b32.xlu0 %v259_v4, %s7020_s25  ;;  %v306_v7 = vld [vmem:[%s7238_s5] sm:$0x3]  ;;  %v327_v12 = vld [vmem:[%s7238_s5 + $0x2] sm:$0x3]  ;;  %s7027_s10 = smov 1   ;;  %s7028_s13 = smov 111  }
  0x5f   : > { %v299_v8 = vld [vmem:[%s7238_s5] sm:$0x3]  ;;  %v348_v13 = vld [vmem:[%s7238_s5 + $0x2] sm:$0x3]  ;;  %s7029_s14 = smov 37   ;;  %s7030_s29 = smov 19  }
  0x60   : > { %v341_v14 = vld [vmem:[%s7238_s5 + $0x2] sm:$0x3]  ;;  %s7031_s30 = smov 55   ;;  %s7032_s21 = smov 73   ;;  %vm274_vm1 = vcmask 1042424   ;;  %vm275_vm2 = vcmask 117762  }
  0x61   : > { %294 = vrot.lane.b32.xlu1 %v292_v5, %s7021_s27  ;;  %v360_v15 = vld [vmem:[%s7238_s5 + $0x2] sm:$0x3]  ;;  %vm271_vm3 = vcmask 777216   ;;  %vm264_vm4 = vcmask 886504   ;;  %vm276_vm5 = vmor %vm275_vm2, %vm274_vm1  ;;  %vm283_vm6 = vcmask 394504   ;;  %vm290_vm7 = vcmask 673304  }
  0x62   : > { %287 = vrot.lane.b32.xlu0 %v285_v6, %s7022_s28  ;;  %v367_v16 = vld [vmem:[%s7238_s5 + $0x2] sm:$0x3]  ;;  %vm297_vm8 = vcmask 952104   ;;  %vm304_vm9 = vcmask 181304   ;;  %vm311_vm10 = vcmask 460104   ;;  %vm318_vm11 = vcmask 738904  }
  0x63   : > { %vm325_vm12 = vcmask 1017704   ;;  %v7033_v29 = vmov 1983009808   ;;  %vm332_vm13 = vcmask 246904   ;;  %vm339_vm14 = vcmask 525704   ;;  %s7034_s5 = smov 124  }
  0x64   : > { %v413_v30 = vunpack.c.l.s4 %v7033_v29  ;;  %vm346_vm15 = vcmask 804504   ;;  %vm357_vm1 = vcmask 35842   ;;  %v416_v37 = vshrl.u32 %v415_v32, 7  ;;  %s9319_s23 = smov 120   ;;  %s7036_s20 = smov 126  }
  0x65   : > { %308 = vrot.lane.b32.xlu1 %v306_v7, %s7023_s6  ;;  %vm353_vm2 = vcmask 302080   ;;  %s9318_s25 = smov 116   ;;  %s7038_s27 = smov 122  }
  0x66   : > { %301 = vrot.lane.b32.xlu0 %v299_v8, %s7024_s7  ;;  %v414_v36 = vunpack.c.0.s8 %v413_v30  ;;  %s9305_s28 = smov 112   ;;  %s9315_s6 = smov 118  }
  0x67   : > { %s7041_s7 = smov 60   ;;  %s9644_s0 = smov 102  }
  0x68   : > { %v7268_v42 = vsub.s32 %v414_v36, %v416_v37  ;;  %s9648_s1 = smov 32   ;;  %s9649_s8 = smov 78  }
  0x69   : > { %322 = vrot.lane.b32.xlu1 %v320_v9, %s7025_s11  ;;  %s9316_s11 = smov 114   ;;  %s9657_s17 = smov 88  }
  0x6a   : > { %315 = vrot.lane.b32.xlu0 %v313_v10, %s7026_s12  ;;  %s9299_s12 = smov 56   ;;  %s9658_s16 = smov 30  }
  0x6b   : > { %s9661_s26 = smov 84   ;;  %s9665_s18 = smov 86  }
  0x6c   : > { %s9666_s22 = smov 36   ;;  %s9667_s15 = smov 82  }
  0x6d   : > { %336 = vrot.lane.b32.xlu1 %v334_v11, %s7027_s10  ;;  %s9307_s10 = smov 110   ;;  %s9670_s4 = smov 38  }
  0x6e   : > { %329 = vrot.lane.b32.xlu0 %v327_v12, %s7028_s13  ;;  %s9304_s13 = smov 52   ;;  %s9674_s3 = smov 92  }
  0x6f   : > { %s9675_s2 = smov 34   ;;  %s9678_s9 = smov 94  }
  0x70   : > { %s9681_s19 = smov 90  }
  0x71   : > { %350 = vrot.lane.b32.xlu1 %v348_v13, %s7029_s14  ;;  %s9300_s14 = smov 58  }
  0x72   : > { %343 = vrot.lane.b32.xlu0 %v341_v14, %s7030_s29  ;;  %s9295_s29 = smov 48  }
  0x75   : > { %369 = vrot.lane.b32.xlu1 %v367_v16, %s7032_s21  ;;  %s9297_s21 = smov 50  }
  0x76   : > { %362 = vrot.lane.b32.xlu0 %v360_v15, %s7031_s30  ;;  %s7048_s30 = smov 54  }
  0xcb   : > { %v269_v17 = vpop.permute.xlu1 %268 }
  0xcc   : > { %v255_v18 = vpop.permute.xlu0 %254  ;;  %v270_v19 = vrot.slane %v269_v17, 6 }
  0xcd   : > { %258 = vst.msk [vmem:[#allocation2 + $0x4] sm:$0x3] %vm257_vm0, %v255_v18  ;;  %vm356_vm0 = vcmask 1042344  }
  0xce   : > { %v272_v22 = vsel %vm271_vm3, %v270_v19, %v269_v17  ;;  %vm358_vm3 = vmor %vm357_vm1, %vm356_vm0  ;;  %vm9356_vm0 = vcmask 949248   ;;  %vm9328_vm1 = vcmask 474112  }
  0xcf   : > { %v281_v20 = vpop.permute.xlu1 %280 }
  0xd0   : > { %v262_v21 = vpop.permute.xlu0 %261 }
  0xd1   : > { %265 = vst.msk [vmem:[#allocation2 + $0x4] sm:$0x3] %vm264_vm4, %v262_v21  ;;  %vm365_vm4 = vcmask 312504  }
  0xd2   : > { %277 = vst.msk [vmem:[#allocation2 + $0x4] sm:$0xf] %vm276_vm5, %v272_v22  ;;  %vm372_vm5 = vcmask 591304  }
  0xd3   : > { %284 = vst.msk [vmem:[#allocation2 + $0x6] sm:$0x3] %vm283_vm6, %v281_v20  ;;  %v295_v23 = vpop.permute.xlu1 %294  ;;  %vm9382_vm6 = vcmask 254976  }
  0xd4   : > { %v288_v24 = vpop.permute.xlu0 %287 }
  0xd5   : > { %291 = vst.msk [vmem:[#allocation2 + $0x6] sm:$0x3] %vm290_vm7, %v288_v24  ;;  %vm9376_vm7 = vcmask 257026  }
  0xd6   : > { %298 = vst.msk [vmem:[#allocation2 + $0x6] sm:$0x3] %vm297_vm8, %v295_v23  ;;  %vm443_vm8 = vcmask 1043456  }
  0xd7   : > { %v309_v25 = vpop.permute.xlu1 %308 }
  0xd8   : > { %v302_v26 = vpop.permute.xlu0 %301 }
  0xd9   : > { %305 = vst.msk [vmem:[#allocation2 + $0x8] sm:$0x3] %vm304_vm9, %v302_v26  ;;  %vm445_vm9 = vcmask 1031168  }
  0xda   : > { %312 = vst.msk [vmem:[#allocation2 + $0x8] sm:$0x3] %vm311_vm10, %v309_v25  ;;  %vm539_vm10 = vcmask 998400  }
  0xdb   : > { %v323_v27 = vpop.permute.xlu1 %322 }
  0xdc   : > { %v316_v28 = vpop.permute.xlu0 %315 }
  0xdd   : > { %319 = vst.msk [vmem:[#allocation2 + $0x8] sm:$0x3] %vm318_vm11, %v316_v28  ;;  %v374_v31 = vld [vmem:[#allocation2] sm:$0xff]  ;;  %vm9350_vm11 = vcmask 965632  }
  0xde   : > { %326 = vst.msk [vmem:[#allocation2 + $0x8] sm:$0x3] %vm325_vm12, %v323_v27  ;;  %6313 = vst.sshfl [vmem:[#allocation3] sm:$0xf pattern:$0x76325410] %v374_v31  ;;  %v378_v33 = vcombine.high %v374_v31, %v374_v31 }
  0xdf   : > { %v337_v34 = vpop.permute.xlu1 %336  ;;  %v407_v61 = vld [vmem:[#allocation2] sm:$0xff]  ;;  %vm492_vm12 = vcmask 1014784  }
  0xe0   : > { %v330_v35 = vpop.permute.xlu0 %329  ;;  %6314 = vst.sshfl [vmem:[#allocation3 + $0x8] sm:$0xf pattern:$0x76325410] %v378_v33  ;;  %v7293_v63 = vrot.slane %v407_v61, %v7268_v42  ;;  %v411_v6 = vcombine.low %v407_v61, %v407_v61  ;;  %v460_v8 = vcombine.high %v407_v61, %v407_v61 }
  0xe1   : > { %333 = vst.msk [vmem:[#allocation2 + $0xa] sm:$0x3] %vm332_vm13, %v330_v35  ;;  %vm9353_vm13 = vcmask 932864  }
  0xe2   : > { %340 = vst.msk [vmem:[#allocation2 + $0xa] sm:$0x3] %vm339_vm14, %v337_v34  ;;  %v7311_v7 = vrot.slane %v411_v6, %v7268_v42  ;;  %v7318_v9 = vrot.slane %v460_v8, %v7268_v42  ;;  %vm9359_vm14 = vcmask 982016  }
  0xe3   : > { %v351_v38 = vpop.permute.xlu1 %350 }
  0xe4   : > { %v344_v39 = vpop.permute.xlu0 %343  ;;  %v352_v40 = vrot.slane %v351_v38, 6 }
  0xe5   : > { %347 = vst.msk [vmem:[#allocation2 + $0xa] sm:$0x3] %vm346_vm15, %v344_v39  ;;  %v6315_v41 = vld.sshfl [vmem:[#allocation2 + $0x8] sm:$0x3 pattern:$0x76325410] }
  0xe6   : > { %486 = vrot.lane.b32.xlu1 %v6315_v41, %s7034_s5  ;;  %v6655_v43 = vld [vmem:[#allocation2 + $0x8] ss:$0 sps:$4 sm:$0x33]   ;;  %v354_v44 = vsel %vm353_vm2, %v352_v40, %v351_v38  ;;  %vm9339_vm15 = vcmask 900096   ;;  %vm9336_vm2 = vcmask 916480  }
  0xe7   : > { %359 = vst.msk [vmem:[#allocation2 + $0xa] sm:$0xf] %vm358_vm3, %v354_v44  ;;  %v370_v46 = vpop.permute.xlu1 %369  ;;  %v433_v47 = vrot.slane %v6655_v43, %v7268_v42  ;;  %v6656_v48 = vld [vmem:[#allocation2 + $0x8] ss:$0 sps:$4 sm:$0x33]   ;;  %vm1004_vm3 = vcmask 441344  }
  0xe8   : > { %v363_v45 = vpop.permute.xlu0 %362  ;;  %v528_v49 = vrot.slane %v6656_v48, %v7268_v42  ;;  %v6657_v50 = vld [vmem:[#allocation2 + $0x8] ss:$0 sps:$4 sm:$0x33]  }
  0xe9   : > { %366 = vst.msk [vmem:[#allocation2 + $0xc] sm:$0x3] %vm365_vm4, %v363_v45  ;;  %438 = vrot.lane.b32.xlu0 %v433_v47, %s7036_s20  ;;  %v621_v51 = vrot.slane %v6657_v50, %v7268_v42  ;;  %v6658_v52 = vld [vmem:[#allocation2 + $0x8] ss:$0 sps:$4 sm:$0x33]   ;;  %vm864_vm4 = vcmask 490496  }
  0xea   : > { %373 = vst.msk [vmem:[#allocation2 + $0xc] sm:$0x3] %vm372_vm5, %v370_v46  ;;  %579 = vrot.lane.b32.xlu1 %v6315_v41, %s9319_s23  ;;  %v714_v53 = vrot.slane %v6658_v52, %v7268_v42  ;;  %v6659_v54 = vld [vmem:[#allocation2 + $0x8] ss:$0 sps:$4 sm:$0x33]   ;;  %vm9333_vm5 = vcmask 408576  }
  0xeb   : > { %v807_v55 = vrot.slane %v6659_v54, %v7268_v42  ;;  %v6660_v56 = vld [vmem:[#allocation2 + $0x8] ss:$0 sps:$4 sm:$0x33]  }
  0xec   : > { %v900_v57 = vrot.slane %v6660_v56, %v7268_v42  ;;  %v6661_v58 = vld [vmem:[#allocation2 + $0x8] ss:$0 sps:$4 sm:$0x33]  }
  0xed   : > { %533 = vrot.lane.b32.xlu0 %v528_v49, %s7038_s27  ;;  %v993_v59 = vrot.slane %v6661_v58, %v7268_v42  ;;  %v6662_v60 = vld [vmem:[#allocation2 + $0x8] ss:$0 sps:$4 sm:$0x33]  }
  0xee   : > { %672 = vrot.lane.b32.xlu1 %v6315_v41, %s9318_s25  ;;  %v1086_v62 = vrot.slane %v6662_v60, %v7268_v42  ;;  %v6663_v1 = vld [vmem:[#allocation2 + $0x8] ss:$0 sps:$4 sm:$0x33]  }
  0xef   : > { %v1179_v2 = vrot.slane %v6663_v1, %v7268_v42  ;;  %v1705_v3 = vld [vmem:[#allocation2 + $0x2] sm:$0xff] }
  0xf0   : > { %v6312_v4 = vld.sshfl [vmem:[#allocation2 + $0x8] sm:$0x3 pattern:$0x76325410]  ;;  %v7304_v5 = vrot.slane %v1705_v3, %v7268_v42  ;;  %v1709_v10 = vcombine.low %v1705_v3, %v1705_v3  ;;  %v1663_v12 = vcombine.high %v1705_v3, %v1705_v3 }
  0xf1   : > { %626 = vrot.lane.b32.xlu0 %v621_v51, %s9315_s6  ;;  %406 = vst.msk [vmem:[#allocation3 + $0x10] sm:$0x3] %vm9382_vm6, %v6312_v4  ;;  %v4609_v14 = vld [vmem:[#allocation2 + $0x8] sm:$0xff] }
  0xf2   : > { %765 = vrot.lane.b32.xlu1 %v6315_v41, %s9305_s28  ;;  %v7381_v11 = vrot.slane %v1709_v10, %v7268_v42  ;;  %v7388_v13 = vrot.slane %v1663_v12, %v7268_v42  ;;  %v7397_v16 = vrot.slane %v4609_v14, %v7268_v42  ;;  %v4659_v17 = vcombine.low %v4609_v14, %v4609_v14  ;;  %v2943_v0 = vld [vmem:[#allocation2 + $0x4] sm:$0xff] }
  0xf3   : > { %v4613_v21 = vcombine.high %v4609_v14, %v4609_v14 }
  0xf4   : > { %v7408_v20 = vrot.slane %v4659_v17, %v7268_v42 }
  0xf5   : > { %719 = vrot.lane.b32.xlu0 %v714_v53, %s9316_s11  ;;  %v7422_v24 = vrot.slane %v4613_v21, %v7268_v42 }
  0xf6   : > { %858 = vrot.lane.b32.xlu1 %v6315_v41, %s7041_s7 }
  0xf9   : > { %812 = vrot.lane.b32.xlu0 %v807_v55, %s9307_s10 }
  0xfa   : > { %951 = vrot.lane.b32.xlu1 %v6315_v41, %s9299_s12 }
  0xfd   : > { %905 = vrot.lane.b32.xlu0 %v900_v57, %s9300_s14 }
  0xfe   : > { %1044 = vrot.lane.b32.xlu1 %v6315_v41, %s9304_s13 }
 0x101   : > { %998 = vrot.lane.b32.xlu0 %v993_v59, %s7048_s30 }
 0x102   : > { %1137 = vrot.lane.b32.xlu1 %v6315_v41, %s9295_s29  ;;  %s9302_s29 = smov 46  }
 0x105   : > { %1091 = vrot.lane.b32.xlu0 %v1086_v62, %s9297_s21  ;;  %s9483_s21 = smov 102  }
 0x106   : > { %436 = vrot.lane.b32.xlu1 %v7293_v63, %s7036_s20 }
 0x109   : > { %1184 = vrot.lane.b32.xlu0 %v1179_v2, %s9302_s29 }
 0x10a   : > { %482 = vrot.lane.b32.xlu1 %v7293_v63, %s7034_s5 }
 0x10d   : > { %1734 = vrot.lane.b32.xlu0 %v7304_v5, %s9483_s21 }
 0x10e   : > { %531 = vrot.lane.b32.xlu1 %v7293_v63, %s7038_s27 }
 0x111   : > { %434 = vrot.lane.b32.xlu0 %v7311_v7, %s7036_s20  ;;  %s9588_s20 = smov 48  }
 0x112   : > { %575 = vrot.lane.b32.xlu1 %v7293_v63, %s9319_s23 }
 0x115   : > { %484 = vrot.lane.b32.xlu0 %v7318_v9, %s7034_s5  ;;  %s9587_s5 = smov 50  }
 0x116   : > { %624 = vrot.lane.b32.xlu1 %v7293_v63, %s9315_s6 }
 0x119   : > { %529 = vrot.lane.b32.xlu0 %v7311_v7, %s7038_s27  ;;  %s9482_s27 = smov 104  }
 0x11a   : > { %668 = vrot.lane.b32.xlu1 %v7293_v63, %s9318_s25 }
 0x11d   : > { %577 = vrot.lane.b32.xlu0 %v7318_v9, %s9319_s23 }
 0x11e   : > { %717 = vrot.lane.b32.xlu1 %v7293_v63, %s9316_s11 }
 0x121   : > { %622 = vrot.lane.b32.xlu0 %v7311_v7, %s9315_s6 }
 0x122   : > { %761 = vrot.lane.b32.xlu1 %v7293_v63, %s9305_s28 }
 0x125   : > { %670 = vrot.lane.b32.xlu0 %v7318_v9, %s9318_s25 }
 0x126   : > { %810 = vrot.lane.b32.xlu1 %v7293_v63, %s9307_s10 }
 0x129   : > { %715 = vrot.lane.b32.xlu0 %v7311_v7, %s9316_s11 }
 0x12a   : > { %854 = vrot.lane.b32.xlu1 %v7293_v63, %s7041_s7 }
 0x12d   : > { %763 = vrot.lane.b32.xlu0 %v7318_v9, %s9305_s28 }
 0x12e   : > { %903 = vrot.lane.b32.xlu1 %v7293_v63, %s9300_s14 }
 0x131   : > { %808 = vrot.lane.b32.xlu0 %v7311_v7, %s9307_s10 }
 0x132   : > { %947 = vrot.lane.b32.xlu1 %v7293_v63, %s9299_s12 }
 0x135   : > { %856 = vrot.lane.b32.xlu0 %v7318_v9, %s7041_s7  ;;  %s9326_s7 = smov 24  }
 0x136   : > { %996 = vrot.lane.b32.xlu1 %v7293_v63, %s7048_s30 }
 0x139   : > { %901 = vrot.lane.b32.xlu0 %v7311_v7, %s9300_s14  ;;  %s9334_s14 = smov 18  }
 0x13a   : > { %1040 = vrot.lane.b32.xlu1 %v7293_v63, %s9304_s13 }
 0x13d   : > { %949 = vrot.lane.b32.xlu0 %v7318_v9, %s9299_s12  ;;  %s9337_s12 = smov 20  }
 0x13e   : > { %1089 = vrot.lane.b32.xlu1 %v7293_v63, %s9587_s5 }
 0x141   : > { %994 = vrot.lane.b32.xlu0 %v7311_v7, %s7048_s30  ;;  %s9329_s30 = smov 22  }
 0x142   : > { %1133 = vrot.lane.b32.xlu1 %v7293_v63, %s9588_s20 }
 0x145   : > { %1042 = vrot.lane.b32.xlu0 %v7318_v9, %s9304_s13 }
 0x146   : > { %1182 = vrot.lane.b32.xlu1 %v7293_v63, %s9302_s29 }
 0x149   : > { %1087 = vrot.lane.b32.xlu0 %v7311_v7, %s9587_s5 }
 0x14a   : > { %1685 = vrot.lane.b32.xlu1 %v7304_v5, %s9482_s27 }
 0x14d   : > { %1135 = vrot.lane.b32.xlu0 %v7318_v9, %s9588_s20 }
 0x14e   : > { %1778 = vrot.lane.b32.xlu1 %v7304_v5, %s9304_s13 }
 0x151   : > { %1180 = vrot.lane.b32.xlu0 %v7311_v7, %s9302_s29  ;;  %s9309_s29 = smov 108  }
 0x152   : > { %1732 = vrot.lane.b32.xlu1 %v7381_v11, %s9483_s21 }
 0x155   : > { %1687 = vrot.lane.b32.xlu0 %v7388_v13, %s9482_s27 }
 0x156   : > { %1824 = vrot.lane.b32.xlu1 %v7381_v11, %s9587_s5 }
 0x158   : > { %v7394_v15 = vpop.permute.xlu1 %486 }
 0x159   : > { %501 = vst.msk [vmem:[#allocation3 + $0x24] sm:$0x3] %vm9382_vm6, %v7394_v15  ;;  %1780 = vrot.lane.b32.xlu0 %v7388_v13, %s9304_s13  ;;  %s9311_s13 = smov 106   ;;  %v490_v54 = vrot.slane %v7394_v15, 4 }
 0x15a   : > { %4635 = vrot.lane.b32.xlu1 %v7397_v16, %s9326_s7 }
 0x15b   : > { %v439_v19 = vpop.permute.xlu0 %438 }
 0x15c   : > { %v7405_v18 = vpop.permute.xlu1 %579  ;;  %455 = vst.msk [vmem:[#allocation3 + $0x10] sm:$0xc] %vm9376_vm7, %v439_v19  ;;  %v442_v37 = vrot.slane %v439_v19, 4 }
 0x15d   : > { %594 = vst.msk [vmem:[#allocation3 + $0x38] sm:$0x3] %vm9382_vm6, %v7405_v18  ;;  %1826 = vrot.lane.b32.xlu0 %v7304_v5, %s9587_s5  ;;  %v583_v15 = vrot.slane %v7405_v18, 4 }
 0x15e   : > { %4682 = vrot.lane.b32.xlu1 %v7408_v20, %s9329_s30 }
 0x15f   : > { %v7419_v23 = vpop.permute.xlu0 %533 }
 0x160   : > { %v7417_v22 = vpop.permute.xlu1 %672  ;;  %548 = vst.msk [vmem:[#allocation3 + $0x24] sm:$0xc] %vm9376_vm7, %v7419_v23  ;;  %v537_v46 = vrot.slane %v7419_v23, 4 }
 0x161   : > { %687 = vst.msk [vmem:[#allocation3 + $0x4c] sm:$0x3] %vm9382_vm6, %v7417_v22  ;;  %4637 = vrot.lane.b32.xlu0 %v7422_v24, %s9326_s7 }
 0x162   : > { %4728 = vrot.lane.b32.xlu1 %v7397_v16, %s9337_s12 }
 0x163   : > { %v7434_v26 = vpop.permute.xlu0 %626 }
 0x164   : > { %v7432_v25 = vpop.permute.xlu1 %765  ;;  %641 = vst.msk [vmem:[#allocation3 + $0x38] sm:$0xc] %vm9376_vm7, %v7434_v26  ;;  %v630_v58 = vrot.slane %v7434_v26, 4 }
 0x165   : > { %780 = vst.msk [vmem:[#allocation3 + $0x60] sm:$0x3] %vm9382_vm6, %v7432_v25  ;;  %4684 = vrot.lane.b32.xlu0 %v7397_v16, %s9329_s30 }
 0x166   : > { %4775 = vrot.lane.b32.xlu1 %v7408_v20, %s9334_s14 }
 0x167   : > { %v7446_v28 = vpop.permute.xlu0 %719 }
 0x168   : > { %v7444_v27 = vpop.permute.xlu1 %858  ;;  %734 = vst.msk [vmem:[#allocation3 + $0x4c] sm:$0xc] %vm9376_vm7, %v7446_v28  ;;  %v723_v23 = vrot.slane %v7446_v28, 4 }
 0x169   : > { %873 = vst.msk [vmem:[#allocation3 + $0x74] sm:$0x3] %vm9382_vm6, %v7444_v27  ;;  %4730 = vrot.lane.b32.xlu0 %v7422_v24, %s9337_s12 }
 0x16a   : > { %1501 = vrot.lane.b32.xlu1 %v7304_v5, %s9305_s28 }
 0x16b   : > { %v7458_v30 = vpop.permute.xlu0 %812 }
 0x16c   : > { %v7456_v29 = vpop.permute.xlu1 %951  ;;  %827 = vst.msk [vmem:[#allocation3 + $0x60] sm:$0xc] %vm9376_vm7, %v7458_v30 }
 0x16d   : > { %966 = vst.msk [vmem:[#allocation3 + $0x88] sm:$0x3] %vm9382_vm6, %v7456_v29  ;;  %4777 = vrot.lane.b32.xlu0 %v7397_v16, %s9334_s14 }
 0x16e   : > { %1547 = vrot.lane.b32.xlu1 %v7381_v11, %s9307_s10 }
 0x16f   : > { %v7470_v32 = vpop.permute.xlu0 %905 }
 0x170   : > { %v7468_v31 = vpop.permute.xlu1 %1044  ;;  %920 = vst.msk [vmem:[#allocation3 + $0x74] sm:$0xc] %vm9376_vm7, %v7470_v32 }
 0x171   : > { %1059 = vst.msk [vmem:[#allocation3 + $0x9c] sm:$0x3] %vm9382_vm6, %v7468_v31  ;;  %1503 = vrot.lane.b32.xlu0 %v7388_v13, %s9305_s28  ;;  %s9314_s28 = smov 80  }
 0x172   : > { %1592 = vrot.lane.b32.xlu1 %v7304_v5, %s9309_s29 }
 0x173   : > { %v7482_v34 = vpop.permute.xlu0 %998 }
 0x174   : > { %v7480_v33 = vpop.permute.xlu1 %1137  ;;  %1013 = vst.msk [vmem:[#allocation3 + $0x88] sm:$0xc] %vm9376_vm7, %v7482_v34 }
 0x175   : > { %1152 = vst.msk [vmem:[#allocation3 + $0xb0] sm:$0x3] %vm9382_vm6, %v7480_v33  ;;  %1549 = vrot.lane.b32.xlu0 %v7304_v5, %s9307_s10  ;;  %s9313_s10 = smov 78   ;;  %vm9440_vm6 = vcmask 736256  }
 0x176   : > { %1639 = vrot.lane.b32.xlu1 %v7381_v11, %s9311_s13 }
 0x177   : > { %v7492_v35 = vpop.permute.xlu0 %1091 }
 0x178   : > { %v437_v36 = vpop.permute.xlu1 %436  ;;  %1106 = vst.msk [vmem:[#allocation3 + $0x9c] sm:$0xc] %vm9376_vm7, %v7492_v35 }
 0x179   : > { %v441_v38 = vrot.slane %v437_v36, 4  ;;  %1594 = vrot.lane.b32.xlu0 %v7388_v13, %s9309_s29  ;;  %s9416_s29 = smov 28  }
 0x17a   : > { %4449 = vrot.lane.b32.xlu1 %v7397_v16, %s9314_s28 }
 0x17b   : > { %v447_v39 = vsel %vm443_vm8, %v441_v38, %v442_v37  ;;  %v7502_v41 = vpop.permute.xlu0 %1184 }
 0x17c   : > { %v448_v40 = vsel %vm445_vm9, %v437_v36, %v447_v39  ;;  %v483_v43 = vpop.permute.xlu1 %482  ;;  %1199 = vst.msk [vmem:[#allocation3 + $0xb0] sm:$0xc] %vm9376_vm7, %v7502_v41  ;;  %vm9458_vm7 = vcmask 130048  }
 0x17d   : > { %453 = vst [vmem:[#allocation3 + $0x8] sm:$0xcc] %v448_v40  ;;  %1641 = vrot.lane.b32.xlu0 %v7304_v5, %s9311_s13  ;;  %s9400_s13 = smov 26   ;;  %v488_v59 = vrot.slane %v483_v43, 4 }
 0x17e   : > { %4496 = vrot.lane.b32.xlu1 %v7408_v20, %s9313_s10 }
 0x17f   : > { %v7510_v44 = vpop.permute.xlu0 %1734 }
 0x180   : > { %v532_v45 = vpop.permute.xlu1 %531 }
 0x181   : > { %v536_v47 = vrot.slane %v532_v45, 4  ;;  %4451 = vrot.lane.b32.xlu0 %v7422_v24, %s9314_s28  ;;  %s9348_s28 = smov 86  }
 0x182   : > { %4542 = vrot.lane.b32.xlu1 %v7397_v16, %s9416_s29 }
 0x183   : > { %v541_v48 = vsel %vm443_vm8, %v536_v47, %v537_v46  ;;  %v435_v51 = vpop.permute.xlu0 %434 }
 0x184   : > { %v542_v49 = vsel %vm539_vm10, %v532_v45, %v541_v48  ;;  %v576_v50 = vpop.permute.xlu1 %575  ;;  %v440_v52 = vrot.slane %v435_v51, 4 }
 0x185   : > { %547 = vst [vmem:[#allocation3 + $0x1c] sm:$0xcc] %v542_v49  ;;  %4498 = vrot.lane.b32.xlu0 %v7397_v16, %s9313_s10  ;;  %v581_v26 = vrot.slane %v576_v50, 4  ;;  %v676_v49 = vrot.slane %v7417_v22, 4  ;;  %s9351_s10 = smov 88  }
 0x186   : > { %4589 = vrot.lane.b32.xlu1 %v7408_v20, %s9400_s13  ;;  %v444_v53 = vsel %vm443_vm8, %v440_v52, %v441_v38 }
 0x187   : > { %v446_v55 = vsel %vm445_vm9, %v435_v51, %v444_v53  ;;  %v485_v57 = vpop.permute.xlu0 %484  ;;  %v816_v53 = vrot.slane %v7458_v30, 4  ;;  %vm957_vm9 = vcmask 457728  }
 0x188   : > { %v625_v56 = vpop.permute.xlu1 %624  ;;  %452 = vst [vmem:[#allocation3] sm:$0xcc] %v446_v55  ;;  %v489_v61 = vrot.slane %v485_v57, 4 }
 0x189   : > { %v629_v60 = vrot.slane %v625_v56, 4  ;;  %4544 = vrot.lane.b32.xlu0 %v7422_v24, %s9416_s29 }
 0x18a   : > { %1319 = vrot.lane.b32.xlu1 %v7304_v5, %s9319_s23  ;;  %v491_v1 = vsel %vm443_vm8, %v488_v59, %v489_v61  ;;  %v494_v2 = vsel %vm443_vm8, %v489_v61, %v490_v54 }
 0x18b   : > { %v634_v62 = vsel %vm443_vm8, %v629_v60, %v630_v58  ;;  %v493_v4 = vsel %vm492_vm12, %v483_v43, %v491_v1  ;;  %v495_v6 = vsel %vm492_vm12, %v485_v57, %v494_v2  ;;  %v530_v10 = vpop.permute.xlu0 %529  ;;  %v769_v1 = vrot.slane %v7432_v25, 4 }
 0x18c   : > { %v635_v3 = vsel %vm9350_vm11, %v625_v56, %v634_v62  ;;  %v669_v8 = vpop.permute.xlu1 %668  ;;  %499 = vst [vmem:[#allocation3 + $0x14] sm:$0x33] %v493_v4  ;;  %500 = vst [vmem:[#allocation3 + $0x1c] sm:$0x33] %v495_v6  ;;  %v535_v12 = vrot.slane %v530_v10, 4  ;;  %v909_v6 = vrot.slane %v7470_v32, 4 }
 0x18d   : > { %640 = vst [vmem:[#allocation3 + $0x30] sm:$0xcc] %v635_v3  ;;  %4591 = vrot.lane.b32.xlu0 %v7397_v16, %s9400_s13  ;;  %v674_v54 = vrot.slane %v669_v8, 4  ;;  %vm9378_vm12 = vcmask 424960  }
 0x18e   : > { %1365 = vrot.lane.b32.xlu1 %v7381_v11, %s9315_s6  ;;  %v538_v14 = vsel %vm443_vm8, %v535_v12, %v536_v47 }
 0x18f   : > { %v540_v17 = vsel %vm539_vm10, %v530_v10, %v538_v14  ;;  %v578_v21 = vpop.permute.xlu0 %577  ;;  %vm9331_vm10 = vcmask 375808  }
 0x190   : > { %v718_v19 = vpop.permute.xlu1 %717  ;;  %546 = vst [vmem:[#allocation3 + $0x14] sm:$0xcc] %v540_v17  ;;  %v582_v37 = vrot.slane %v578_v21, 4 }
 0x191   : > { %v722_v36 = vrot.slane %v718_v19, 4  ;;  %1321 = vrot.lane.b32.xlu0 %v7388_v13, %s9319_s23  ;;  %s9324_s23 = smov 42  }
 0x192   : > { %1410 = vrot.lane.b32.xlu1 %v7304_v5, %s9318_s25  ;;  %v584_v38 = vsel %vm443_vm8, %v581_v26, %v582_v37  ;;  %v587_v39 = vsel %vm443_vm8, %v582_v37, %v583_v15 }
 0x193   : > { %v727_v18 = vsel %vm443_vm8, %v722_v36, %v723_v23  ;;  %v586_v28 = vsel %vm9359_vm14, %v576_v50, %v584_v38  ;;  %v588_v43 = vsel %vm9359_vm14, %v578_v21, %v587_v39  ;;  %v623_v46 = vpop.permute.xlu0 %622  ;;  %v1002_v39 = vrot.slane %v7482_v34, 4 }
 0x194   : > { %v728_v40 = vsel %vm9353_vm13, %v718_v19, %v727_v18  ;;  %v762_v45 = vpop.permute.xlu1 %761  ;;  %592 = vst [vmem:[#allocation3 + $0x28] sm:$0x33] %v586_v28  ;;  %593 = vst [vmem:[#allocation3 + $0x30] sm:$0x33] %v588_v43  ;;  %v628_v47 = vrot.slane %v623_v46, 4 }
 0x195   : > { %733 = vst [vmem:[#allocation3 + $0x44] sm:$0xcc] %v728_v40  ;;  %1367 = vrot.lane.b32.xlu0 %v7304_v5, %s9315_s6  ;;  %s9320_s6 = smov 84  }
 0x196   : > { %1456 = vrot.lane.b32.xlu1 %v7381_v11, %s9316_s11  ;;  %v631_v48 = vsel %vm443_vm8, %v628_v47, %v629_v60 }
 0x197   : > { %v633_v50 = vsel %vm9350_vm11, %v623_v46, %v631_v48  ;;  %v671_v52 = vpop.permute.xlu0 %670 }
 0x198   : > { %v811_v51 = vpop.permute.xlu1 %810  ;;  %639 = vst [vmem:[#allocation3 + $0x28] sm:$0xcc] %v633_v50  ;;  %v675_v56 = vrot.slane %v671_v52, 4 }
 0x199   : > { %v815_v55 = vrot.slane %v811_v51, 4  ;;  %1412 = vrot.lane.b32.xlu0 %v7388_v13, %s9318_s25  ;;  %s9322_s25 = smov 44  }
 0x19a   : > { %4265 = vrot.lane.b32.xlu1 %v7397_v16, %s9351_s10  ;;  %v677_v22 = vsel %vm443_vm8, %v674_v54, %v675_v56  ;;  %v680_v57 = vsel %vm443_vm8, %v675_v56, %v676_v49 }
 0x19b   : > { %v820_v11 = vsel %vm443_vm8, %v815_v55, %v816_v53  ;;  %v679_v30 = vsel %vm9356_vm0, %v669_v8, %v677_v22  ;;  %v681_v59 = vsel %vm9356_vm0, %v671_v52, %v680_v57  ;;  %v716_v61 = vpop.permute.xlu0 %715  ;;  %v767_v8 = vrot.slane %v762_v45, 4 }
 0x19c   : > { %v821_v58 = vsel %vm9339_vm15, %v811_v51, %v820_v11  ;;  %v855_v60 = vpop.permute.xlu1 %854  ;;  %685 = vst [vmem:[#allocation3 + $0x3c] sm:$0x33] %v679_v30  ;;  %686 = vst [vmem:[#allocation3 + $0x44] sm:$0x33] %v681_v59  ;;  %v721_v62 = vrot.slane %v716_v61, 4  ;;  %v955_v53 = vrot.slane %v7456_v29, 4 }
 0x19d   : > { %826 = vst [vmem:[#allocation3 + $0x58] sm:$0xcc] %v821_v58  ;;  %1458 = vrot.lane.b32.xlu0 %v7304_v5, %s9316_s11  ;;  %s9321_s11 = smov 82   ;;  %v860_v40 = vrot.slane %v855_v60, 4  ;;  %v1095_v11 = vrot.slane %v7492_v35, 4 }
 0x19e   : > { %4311 = vrot.lane.b32.xlu1 %v7408_v20, %s9348_s28  ;;  %v724_v13 = vsel %vm443_vm8, %v721_v62, %v722_v36  ;;  %v862_v36 = vrot.slane %v7444_v27, 4 }
 0x19f   : > { %v726_v2 = vsel %vm9353_vm13, %v716_v61, %v724_v13  ;;  %v764_v4 = vpop.permute.xlu0 %763 }
 0x1a0   : > { %v904_v3 = vpop.permute.xlu1 %903  ;;  %732 = vst [vmem:[#allocation3 + $0x3c] sm:$0xcc] %v726_v2  ;;  %v768_v12 = vrot.slane %v764_v4, 4 }
 0x1a1   : > { %v908_v10 = vrot.slane %v904_v3, 4  ;;  %4267 = vrot.lane.b32.xlu0 %v7422_v24, %s9351_s10 }
 0x1a2   : > { %4356 = vrot.lane.b32.xlu1 %v7397_v16, %s9320_s6  ;;  %v770_v25 = vsel %vm443_vm8, %v767_v8, %v768_v12  ;;  %v773_v14 = vsel %vm443_vm8, %v768_v12, %v769_v1  ;;  %v1048_v1 = vrot.slane %v7468_v31, 4 }
 0x1a3   : > { %v913_v5 = vsel %vm443_vm8, %v908_v10, %v909_v6  ;;  %v772_v32 = vsel %vm9336_vm2, %v762_v45, %v770_v25  ;;  %v774_v17 = vsel %vm9336_vm2, %v764_v4, %v773_v14  ;;  %v809_v21 = vpop.permute.xlu0 %808  ;;  %v1188_v6 = vrot.slane %v7502_v41, 4 }
 0x1a4   : > { %v914_v15 = vsel %vm9328_vm1, %v904_v3, %v913_v5  ;;  %v948_v19 = vpop.permute.xlu1 %947  ;;  %778 = vst [vmem:[#allocation3 + $0x50] sm:$0x33] %v772_v32  ;;  %779 = vst [vmem:[#allocation3 + $0x58] sm:$0x33] %v774_v17  ;;  %v814_v23 = vrot.slane %v809_v21, 4 }
 0x1a5   : > { %919 = vst [vmem:[#allocation3 + $0x6c] sm:$0xcc] %v914_v15  ;;  %4313 = vrot.lane.b32.xlu0 %v7397_v16, %s9348_s28  ;;  %v953_v22 = vrot.slane %v948_v19, 4 }
 0x1a6   : > { %4403 = vrot.lane.b32.xlu1 %v7408_v20, %s9321_s11  ;;  %v817_v26 = vsel %vm443_vm8, %v814_v23, %v815_v55 }
 0x1a7   : > { %v819_v37 = vsel %vm9339_vm15, %v809_v21, %v817_v26  ;;  %v857_v38 = vpop.permute.xlu0 %856 }
 0x1a8   : > { %v997_v18 = vpop.permute.xlu1 %996  ;;  %825 = vst [vmem:[#allocation3 + $0x50] sm:$0xcc] %v819_v37  ;;  %v861_v43 = vrot.slane %v857_v38, 4 }
 0x1a9   : > { %v1001_v28 = vrot.slane %v997_v18, 4  ;;  %4358 = vrot.lane.b32.xlu0 %v7422_v24, %s9320_s6  ;;  %s9431_s6 = smov 96  }
 0x1aa   : > { %1226 = vrot.lane.b32.xlu1 %v7293_v63, %s9322_s25  ;;  %v863_v45 = vsel %vm443_vm8, %v860_v40, %v861_v43  ;;  %v866_v46 = vsel %vm443_vm8, %v861_v43, %v862_v36 }
 0x1ab   : > { %v1006_v27 = vsel %vm443_vm8, %v1001_v28, %v1002_v39  ;;  %v865_v34 = vsel %vm864_vm4, %v855_v60, %v863_v45  ;;  %v867_v48 = vsel %vm864_vm4, %v857_v38, %v866_v46  ;;  %v902_v50 = vpop.permute.xlu0 %901  ;;  %v1141_v38 = vrot.slane %v7480_v33, 4 }
 0x1ac   : > { %v1007_v47 = vsel %vm1004_vm3, %v997_v18, %v1006_v27  ;;  %v1041_v49 = vpop.permute.xlu1 %1040  ;;  %871 = vst [vmem:[#allocation3 + $0x64] sm:$0x33] %v865_v34  ;;  %872 = vst [vmem:[#allocation3 + $0x6c] sm:$0x33] %v867_v48  ;;  %v907_v51 = vrot.slane %v902_v50, 4  ;;  %v9424_v34 = vrot.slane %v7510_v44, 4 }
 0x1ad   : > { %1012 = vst [vmem:[#allocation3 + $0x80] sm:$0xcc] %v1007_v47  ;;  %4405 = vrot.lane.b32.xlu0 %v7397_v16, %s9321_s11  ;;  %s9428_s11 = smov 94   ;;  %v1046_v8 = vrot.slane %v1041_v49, 4  ;;  %vm1742_vm4 = vcmask 834560  }
 0x1ae   : > { %1273 = vrot.lane.b32.xlu1 %v7311_v7, %s9324_s23  ;;  %v910_v52 = vsel %vm443_vm8, %v907_v51, %v908_v10 }
 0x1af   : > { %v912_v54 = vsel %vm9328_vm1, %v902_v50, %v910_v52  ;;  %v950_v56 = vpop.permute.xlu0 %949  ;;  %vm9464_vm1 = vcmask 195584  }
 0x1b0   : > { %v1090_v55 = vpop.permute.xlu1 %1089  ;;  %918 = vst [vmem:[#allocation3 + $0x64] sm:$0xcc] %v912_v54  ;;  %v954_v58 = vrot.slane %v950_v56, 4 }
 0x1b1   : > { %v1094_v57 = vrot.slane %v1090_v55, 4  ;;  %1228 = vrot.lane.b32.xlu0 %v7318_v9, %s9322_s25  ;;  %s9344_s25 = smov 92  }
 0x1b2   : > { %4083 = vrot.lane.b32.xlu1 %v7397_v16, %s9431_s6  ;;  %v956_v29 = vsel %vm443_vm8, %v953_v22, %v954_v58  ;;  %v959_v30 = vsel %vm443_vm8, %v954_v58, %v955_v53 }
 0x1b3   : > { %v1099_v7 = vsel %vm443_vm8, %v1094_v57, %v1095_v11  ;;  %v958_v35 = vsel %vm957_vm9, %v948_v19, %v956_v29  ;;  %v960_v60 = vsel %vm957_vm9, %v950_v56, %v959_v30  ;;  %v995_v62 = vpop.permute.xlu0 %994  ;;  %v3867_v19 = vld [vmem:[#allocation2 + $0x6] sm:$0xff]  ;;  %vm1695_vm9 = vcmask 850944  }
 0x1b4   : > { %v1100_v59 = vsel %vm9333_vm5, %v1090_v55, %v1099_v7  ;;  %v1134_v61 = vpop.permute.xlu1 %1133  ;;  %964 = vst [vmem:[#allocation3 + $0x78] sm:$0x33] %v958_v35  ;;  %965 = vst [vmem:[#allocation3 + $0x80] sm:$0x33] %v960_v60  ;;  %v1000_v13 = vrot.slane %v995_v62, 4  ;;  %v7646_v37 = vrot.slane %v3867_v19, %v7268_v42  ;;  %v3918_v18 = vcombine.low %v3867_v19, %v3867_v19 }
 0x1b5   : > { %1105 = vst [vmem:[#allocation3 + $0x94] sm:$0xcc] %v1100_v59  ;;  %1275 = vrot.lane.b32.xlu0 %v7293_v63, %s9324_s23  ;;  %s9346_s23 = smov 90   ;;  %v1139_v39 = vrot.slane %v1134_v61, 4  ;;  %v3871_v47 = vcombine.high %v3867_v19, %v3867_v19 }
 0x1b6   : > { %4129 = vrot.lane.b32.xlu1 %v7408_v20, %s9428_s11  ;;  %v1003_v9 = vsel %vm443_vm8, %v1000_v13, %v1001_v28  ;;  %v7658_v46 = vrot.slane %v3918_v18, %v7268_v42 }
 0x1b7   : > { %v1005_v2 = vsel %vm1004_vm3, %v995_v62, %v1003_v9  ;;  %v1043_v4 = vpop.permute.xlu0 %1042  ;;  %vm9332_vm3 = vcmask 392192   ;;  %v7674_v55 = vrot.slane %v3871_v47, %v7268_v42 }
 0x1b8   : > { %v1183_v3 = vpop.permute.xlu1 %1182  ;;  %1011 = vst [vmem:[#allocation3 + $0x78] sm:$0xcc] %v1005_v2  ;;  %v1047_v12 = vrot.slane %v1043_v4, 4 }
 0x1b9   : > { %v1187_v10 = vrot.slane %v1183_v3, 4  ;;  %4085 = vrot.lane.b32.xlu0 %v7422_v24, %s9431_s6 }
 0x1ba   : > { %4174 = vrot.lane.b32.xlu1 %v7397_v16, %s9344_s25  ;;  %v1049_v31 = vsel %vm443_vm8, %v1046_v8, %v1047_v12  ;;  %v1052_v5 = vsel %vm443_vm8, %v1047_v12, %v1048_v1 }
 0x1bb   : > { %v1192_v63 = vsel %vm443_vm8, %v1187_v10, %v1188_v6  ;;  %v1051_v41 = vsel %vm9378_vm12, %v1041_v49, %v1049_v31  ;;  %v1053_v14 = vsel %vm9378_vm12, %v1043_v4, %v1052_v5  ;;  %v1088_v32 = vpop.permute.xlu0 %1087 }
 0x1bc   : > { %v1193_v25 = vsel %vm9331_vm10, %v1183_v3, %v1192_v63  ;;  %v1686_v15 = vpop.permute.xlu1 %1685  ;;  %1057 = vst [vmem:[#allocation3 + $0x8c] sm:$0x33] %v1051_v41  ;;  %1058 = vst [vmem:[#allocation3 + $0x94] sm:$0x33] %v1053_v14  ;;  %v1093_v17 = vrot.slane %v1088_v32, 4 }
 0x1bd   : > { %1198 = vst [vmem:[#allocation3 + $0xa8] sm:$0xcc] %v1193_v25  ;;  %4131 = vrot.lane.b32.xlu0 %v7397_v16, %s9428_s11  ;;  %v1691_v56 = vrot.slane %v1686_v15, 4 }
 0x1be   : > { %4220 = vrot.lane.b32.xlu1 %v7408_v20, %s9346_s23  ;;  %v1096_v21 = vsel %vm443_vm8, %v1093_v17, %v1094_v57 }
 0x1bf   : > { %v1098_v23 = vsel %vm9333_vm5, %v1088_v32, %v1096_v21  ;;  %v1136_v36 = vpop.permute.xlu0 %1135 }
 0x1c0   : > { %v1779_v26 = vpop.permute.xlu1 %1778  ;;  %1104 = vst [vmem:[#allocation3 + $0x8c] sm:$0xcc] %v1098_v23  ;;  %v1140_v40 = vrot.slane %v1136_v36, 4 }
 0x1c1   : > { %4176 = vrot.lane.b32.xlu0 %v7422_v24, %s9344_s25  ;;  %v1784_v7 = vrot.slane %v1779_v26, 4 }
 0x1c2   : > { %3893 = vrot.lane.b32.xlu1 %v7646_v37, %s9326_s7  ;;  %v1142_v20 = vsel %vm443_vm8, %v1139_v39, %v1140_v40  ;;  %v1145_v28 = vsel %vm443_vm8, %v1140_v40, %v1141_v38 }
 0x1c3   : > { %v1144_v43 = vsel %vm9332_vm3, %v1134_v61, %v1142_v20  ;;  %v1146_v27 = vsel %vm9332_vm3, %v1136_v36, %v1145_v28  ;;  %v1181_v33 = vpop.permute.xlu0 %1180  ;;  %vm9455_vm3 = vcmask 162816  }
 0x1c4   : > { %v1733_v45 = vpop.permute.xlu1 %1732  ;;  %1150 = vst [vmem:[#allocation3 + $0xa0] sm:$0x33] %v1144_v43  ;;  %1151 = vst [vmem:[#allocation3 + $0xa8] sm:$0x33] %v1146_v27  ;;  %v1186_v48 = vrot.slane %v1181_v33, 4 }
 0x1c5   : > { %v1738_v24 = vrot.slane %v1733_v45, 4  ;;  %4222 = vrot.lane.b32.xlu0 %v7397_v16, %s9346_s23 }
 0x1c6   : > { %3941 = vrot.lane.b32.xlu1 %v7658_v46, %s9329_s30  ;;  %v1189_v50 = vsel %vm443_vm8, %v1186_v48, %v1187_v10 }
 0x1c7   : > { %v1741_v49 = vsel %vm443_vm8, %v1738_v24, %v9424_v34  ;;  %v1191_v52 = vsel %vm9331_vm10, %v1181_v33, %v1189_v50  ;;  %v7671_v54 = vpop.permute.xlu0 %1687  ;;  %vm9398_vm10 = vcmask 179200  }
 0x1c8   : > { %v1743_v51 = vsel %vm1742_vm4, %v1733_v45, %v1741_v49  ;;  %v1825_v53 = vpop.permute.xlu1 %1824  ;;  %1197 = vst [vmem:[#allocation3 + $0xa0] sm:$0xcc] %v1191_v52  ;;  %v9427_v16 = vrot.slane %v7671_v54, 4 }
 0x1c9   : > { %1749 = vst [vmem:[#allocation3 + $0x118] sm:$0xcc] %v1743_v51  ;;  %3895 = vrot.lane.b32.xlu0 %v7674_v55, %s9326_s7  ;;  %v1830_v61 = vrot.slane %v1825_v53, 4  ;;  %s9410_s7 = smov 32  }
 0x1ca   : > { %3988 = vrot.lane.b32.xlu1 %v7646_v37, %s9337_s12  ;;  %v1694_v11 = vsel %vm443_vm8, %v1691_v56, %v9427_v16 }
 0x1cb   : > { %v1696_v22 = vsel %vm1695_vm9, %v1686_v15, %v1694_v11  ;;  %v7685_v58 = vpop.permute.xlu0 %1780 }
 0x1cc   : > { %v4636_v57 = vpop.permute.xlu1 %4635  ;;  %1702 = vst [vmem:[#allocation3 + $0x118] sm:$0x33] %v1696_v22  ;;  %v9426_v29 = vrot.slane %v7685_v58, 4 }
 0x1cd   : > { %3943 = vrot.lane.b32.xlu0 %v7646_v37, %s9329_s30  ;;  %v4641_v3 = vrot.slane %v4636_v57, 4  ;;  %s9396_s30 = smov 30  }
 0x1ce   : > { %4036 = vrot.lane.b32.xlu1 %v7658_v46, %s9334_s14  ;;  %v1787_v30 = vsel %vm443_vm8, %v1784_v7, %v9426_v29 }
 0x1cf   : > { %v1788_v59 = vsel %vm9378_vm12, %v1779_v26, %v1787_v30  ;;  %v7696_v60 = vpop.permute.xlu0 %1826  ;;  %vm9444_vm12 = vcmask 752640  }
 0x1d0   : > { %v4683_v35 = vpop.permute.xlu1 %4682  ;;  %1794 = vst [vmem:[#allocation3 + $0x12c] sm:$0x33] %v1788_v59  ;;  %v9421_v62 = vrot.slane %v7696_v60, 4 }
 0x1d1   : > { %3990 = vrot.lane.b32.xlu0 %v7674_v55, %s9337_s12  ;;  %v4688_v63 = vrot.slane %v4683_v35, 4  ;;  %s9472_s12 = smov 34  }
 0x1d2   : > { %3708 = vrot.lane.b32.xlu1 %v7646_v37, %s9410_s7  ;;  %v1833_v13 = vsel %vm443_vm8, %v1830_v61, %v9421_v62 }
 0x1d3   : > { %v1834_v9 = vsel %vm9333_vm5, %v1825_v53, %v1833_v13  ;;  %v7707_v2 = vpop.permute.xlu0 %4637  ;;  %vm9399_vm5 = vcmask 146432  }
 0x1d4   : > { %v4729_v1 = vpop.permute.xlu1 %4728  ;;  %1840 = vst [vmem:[#allocation3 + $0x12c] sm:$0xcc] %v1834_v9  ;;  %v9383_v4 = vrot.slane %v7707_v2, 4 }
 0x1d5   : > { %4038 = vrot.lane.b32.xlu0 %v7646_v37, %s9334_s14  ;;  %v4734_v17 = vrot.slane %v4729_v1, 4  ;;  %s9478_s14 = smov 36  }
 0x1d6   : > { %3754 = vrot.lane.b32.xlu1 %v7658_v46, %s9396_s30  ;;  %v4644_v6 = vsel %vm443_vm8, %v4641_v3, %v9383_v4 }
 0x1d7   : > { %v4645_v8 = vsel %vm9464_vm1, %v4636_v57, %v4644_v6  ;;  %v7718_v12 = vpop.permute.xlu0 %4684 }
 0x1d8   : > { %v4776_v10 = vpop.permute.xlu1 %4775  ;;  %4652 = vst [vmem:[#allocation3 + $0x398] sm:$0x33] %v4645_v8  ;;  %v9379_v31 = vrot.slane %v7718_v12, 4 }
 0x1d9   : > { %3710 = vrot.lane.b32.xlu0 %v7674_v55, %s9410_s7  ;;  %v4781_v18 = vrot.slane %v4776_v10, 4 }
 0x1da   : > { %3800 = vrot.lane.b32.xlu1 %v7646_v37, %s9416_s29  ;;  %v4691_v5 = vsel %vm443_vm8, %v4688_v63, %v9379_v31 }
 0x1db   : > { %v4692_v25 = vsel %vm9398_vm10, %v4683_v35, %v4691_v5  ;;  %v7729_v14 = vpop.permute.xlu0 %4730  ;;  %v6670_v15 = vld [vmem:[#allocation3 + $0x11c] ss:$20 sps:$4 sm:$0xff]   ;;  %v6672_v32 = vld [vmem:[#allocation3 + $0x118] ss:$20 sps:$4 sm:$0xff]  }
 0x1dc   : > { %v1502_v41 = vpop.permute.xlu1 %1501  ;;  %4699 = vst [vmem:[#allocation3 + $0x398] sm:$0xcc] %v4692_v25  ;;  %v9381_v19 = vrot.slane %v7729_v14, 4  ;;  %5804 = vmatprep.subr.bf16.mxu0 %v6670_v15 }
 0x1dd   : > { %3756 = vrot.lane.b32.xlu0 %v7646_v37, %s9396_s30  ;;  %5805 = vmatpush1.bf16.msra.mxu0 %v6672_v32  ;;  %v1507_v43 = vrot.slane %v1502_v41, 4 }
 0x1de   : > { %3847 = vrot.lane.b32.xlu1 %v7658_v46, %s9400_s13  ;;  %v4737_v21 = vsel %vm443_vm8, %v4734_v17, %v9381_v19 }
 0x1df   : > { %v4738_v23 = vsel %vm9455_vm3, %v4729_v1, %v4737_v21  ;;  %v7740_v36 = vpop.permute.xlu0 %4777 }
 0x1e0   : > { %v1548_v26 = vpop.permute.xlu1 %1547  ;;  %4745 = vst [vmem:[#allocation3 + $0x3ac] sm:$0x33] %v4738_v23  ;;  %v9373_v38 = vrot.slane %v7740_v36, 4 }
 0x1e1   : > { %3802 = vrot.lane.b32.xlu0 %v7674_v55, %s9416_s29  ;;  %v1553_v48 = vrot.slane %v1548_v26, 4 }
 0x1e2   : > { %3524 = vrot.lane.b32.xlu1 %v7646_v37, %s9351_s10  ;;  %v4784_v39 = vsel %vm443_vm8, %v4781_v18, %v9373_v38 }
 0x1e3   : > { %v4785_v40 = vsel %vm9399_vm5, %v4776_v10, %v4784_v39  ;;  %v7751_v28 = vpop.permute.xlu0 %1503 }
 0x1e4   : > { %v1593_v20 = vpop.permute.xlu1 %1592  ;;  %4792 = vst [vmem:[#allocation3 + $0x3ac] sm:$0xcc] %v4785_v40  ;;  %v9419_v27 = vrot.slane %v7751_v28, 4 }
 0x1e5   : > { %3849 = vrot.lane.b32.xlu0 %v7646_v37, %s9400_s13  ;;  %v1598_v22 = vrot.slane %v1593_v20, 4 }
 0x1e6   : > { %3571 = vrot.lane.b32.xlu1 %v7658_v46, %s9348_s28  ;;  %v1510_v45 = vsel %vm443_vm8, %v1507_v43, %v9419_v27 }
 0x1e7   : > { %v1511_v33 = vsel %vm9336_vm2, %v1502_v41, %v1510_v45  ;;  %v7762_v24 = vpop.permute.xlu0 %1549  ;;  %vm9340_vm2 = vcmask 883712  }
 0x1e8   : > { %v1640_v47 = vpop.permute.xlu1 %1639  ;;  %1517 = vst [vmem:[#allocation3 + $0xf0] sm:$0x33] %v1511_v33  ;;  %v9408_v49 = vrot.slane %v7762_v24, 4 }
 0x1e9   : > { %3526 = vrot.lane.b32.xlu0 %v7674_v55, %s9351_s10  ;;  %v1645_v61 = vrot.slane %v1640_v47, 4  ;;  %s9363_s10 = smov 14  }
 0x1ea   : > { %3617 = vrot.lane.b32.xlu1 %v7646_v37, %s9478_s14  ;;  %v1556_v50 = vsel %vm443_vm8, %v1553_v48, %v9408_v49  ;;  %v6718_v49 = vld [vmem:[#allocation2 + $0xa] ss:$0 sps:$4 sm:$0x33]  }
 0x1eb   : > { %v1557_v51 = vsel %vm9339_vm15, %v1548_v26, %v1556_v50  ;;  %v7773_v53 = vpop.permute.xlu0 %1594  ;;  %v6673_v56 = vld [vmem:[#allocation3 + $0x39c] ss:$20 sps:$4 sm:$0xff]   ;;  %v6675_v11 = vld [vmem:[#allocation3 + $0x398] ss:$20 sps:$4 sm:$0xff]   ;;  %vm9341_vm15 = vcmask 867328  }
 0x1ec   : > { %v4450_v52 = vpop.permute.xlu1 %4449  ;;  %1563 = vst [vmem:[#allocation3 + $0xf0] sm:$0xcc] %v1557_v51  ;;  %v9409_v57 = vrot.slane %v7773_v53, 4  ;;  %5845 = vmatprep.subr.bf16.mxu1 %v6673_v56 }
 0x1ed   : > { %3573 = vrot.lane.b32.xlu0 %v7646_v37, %s9348_s28  ;;  %5846 = vmatpush1.bf16.msra.mxu1 %v6675_v11  ;;  %v4455_v8 = vrot.slane %v4450_v52, 4  ;;  %s9395_s28 = smov 16  }
 0x1ee   : > { %3663 = vrot.lane.b32.xlu1 %v7658_v46, %s9472_s12  ;;  %v1601_v7 = vsel %vm443_vm8, %v1598_v22, %v9409_v57 }
 0x1ef   : > { %v1603_v30 = vsel %vm9340_vm2, %v1593_v20, %v1601_v7  ;;  %v7784_v35 = vpop.permute.xlu0 %1641  ;;  %vm9342_vm2 = vcmask 654336  }
 0x1f0   : > { %v4497_v59 = vpop.permute.xlu1 %4496  ;;  %1609 = vst [vmem:[#allocation3 + $0x104] sm:$0x33] %v1603_v30  ;;  %v9406_v13 = vrot.slane %v7784_v35, 4 }
 0x1f1   : > { %3619 = vrot.lane.b32.xlu0 %v7674_v55, %s9478_s14  ;;  %v4502_v15 = vrot.slane %v4497_v59, 4 }
 0x1f2   : > { %3340 = vrot.lane.b32.xlu1 %v7646_v37, %s9431_s6  ;;  %v1648_v9 = vsel %vm443_vm8, %v1645_v61, %v9406_v13 }
 0x1f3   : > { %v1650_v1 = vsel %vm9341_vm15, %v1640_v47, %v1648_v9  ;;  %v7795_v6 = vpop.permute.xlu0 %4451  ;;  %vm9343_vm15 = vcmask 637952  }
 0x1f4   : > { %v4543_v3 = vpop.permute.xlu1 %4542  ;;  %1656 = vst [vmem:[#allocation3 + $0x104] sm:$0xcc] %v1650_v1  ;;  %v9372_v10 = vrot.slane %v7795_v6, 4 }
 0x1f5   : > { %3665 = vrot.lane.b32.xlu0 %v7646_v37, %s9472_s12  ;;  %v4548_v40 = vrot.slane %v4543_v3, 4 }
 0x1f6   : > { %3386 = vrot.lane.b32.xlu1 %v7658_v46, %s9428_s11  ;;  %v4458_v63 = vsel %vm443_vm8, %v4455_v8, %v9372_v10  ;;  %v2947_v10 = vcombine.high %v2943_v0, %v2943_v0 }
 0x1f7   : > { %v4460_v5 = vsel %vm9342_vm2, %v4450_v52, %v4458_v63  ;;  %v7806_v41 = vpop.permute.xlu0 %4498  ;;  %vm3073_vm2 = vcmask 228352  }
 0x1f8   : > { %v4590_v25 = vpop.permute.xlu1 %4589  ;;  %4466 = vst [vmem:[#allocation3 + $0x370] sm:$0x33] %v4460_v5  ;;  %v9370_v32 = vrot.slane %v7806_v41, 4 }
 0x1f9   : > { %3342 = vrot.lane.b32.xlu0 %v7674_v55, %s9431_s6  ;;  %v4595_v48 = vrot.slane %v4590_v25, 4 }
 0x1fa   : > { %3431 = vrot.lane.b32.xlu1 %v7646_v37, %s9344_s25  ;;  %v4505_v17 = vsel %vm443_vm8, %v4502_v15, %v9370_v32 }
 0x1fb   : > { %v4507_v21 = vsel %vm9343_vm15, %v4497_v59, %v4505_v17  ;;  %v7817_v26 = vpop.permute.xlu0 %4544  ;;  %v6676_v18 = vld [vmem:[#allocation3 + $0xf4] ss:$20 sps:$4 sm:$0xff]   ;;  %v6678_v39 = vld [vmem:[#allocation3 + $0xf0] ss:$20 sps:$4 sm:$0xff]   ;;  %vm3121_vm15 = vcmask 211968  }
 0x1fc   : > { %v1320_v23 = vpop.permute.xlu1 %1319  ;;  %4513 = vst [vmem:[#allocation3 + $0x370] sm:$0xcc] %v4507_v21  ;;  %v9371_v20 = vrot.slane %v7817_v26, 4  ;;  %5806 = vmatprep.subr.bf16.mxu0 %v6676_v18  ;;  %v4795_v18 = vld [vmem:[#allocation2 + $0x8] sm:$0xff] }
 0x1fd   : > { %3388 = vrot.lane.b32.xlu0 %v7646_v37, %s9428_s11  ;;  %5807 = vmatpush1.bf16.msra.mxu0 %v6678_v39  ;;  %v1325_v22 = vrot.slane %v1320_v23, 4 }
 0x1fe   : > { %3478 = vrot.lane.b32.xlu1 %v7658_v46, %s9346_s23  ;;  %v4551_v43 = vsel %vm443_vm8, %v4548_v40, %v9371_v20 }
 0x1ff   : > { %v4552_v45 = vsel %vm3073_vm2, %v4543_v3, %v4551_v43  ;;  %v7828_v47 = vpop.permute.xlu0 %4591 }
 0x200   : > { %v1366_v33 = vpop.permute.xlu1 %1365  ;;  %4559 = vst [vmem:[#allocation3 + $0x384] sm:$0x33] %v4552_v45  ;;  %v9369_v50 = vrot.slane %v7828_v47, 4 }
 0x201   : > { %3433 = vrot.lane.b32.xlu0 %v7674_v55, %s9344_s25  ;;  %v1371_v1 = vrot.slane %v1366_v33, 4  ;;  %s9354_s25 = smov 100  }
 0x202   : > { %3158 = vrot.lane.b32.xlu1 %v7646_v37, %s9482_s27  ;;  %v4598_v51 = vsel %vm443_vm8, %v4595_v48, %v9369_v50  ;;  %v4846_v48 = vcombine.low %v4795_v18, %v4795_v18 }
 0x203   : > { %v4599_v52 = vsel %vm3121_vm15, %v4590_v25, %v4598_v51  ;;  %v7839_v11 = vpop.permute.xlu0 %1321 }
 0x204   : > { %v1411_v56 = vpop.permute.xlu1 %1410  ;;  %4606 = vst [vmem:[#allocation3 + $0x384] sm:$0xcc] %v4599_v52  ;;  %v9394_v7 = vrot.slane %v7839_v11, 4 }
 0x205   : > { %3480 = vrot.lane.b32.xlu0 %v7646_v37, %s9346_s23  ;;  %v1416_v21 = vrot.slane %v1411_v56, 4  ;;  %s9357_s23 = smov 98  }
 0x206   : > { %3204 = vrot.lane.b32.xlu1 %v7658_v46, %s9483_s21  ;;  %v1328_v30 = vsel %vm443_vm8, %v1325_v22, %v9394_v7 }
 0x207   : > { %v1329_v59 = vsel %vm9359_vm14, %v1320_v23, %v1328_v30  ;;  %v7850_v9 = vpop.permute.xlu0 %1367  ;;  %vm9368_vm14 = vcmask 670720  }
 0x208   : > { %v1457_v61 = vpop.permute.xlu1 %1456  ;;  %1335 = vst [vmem:[#allocation3 + $0xc8] sm:$0x33] %v1329_v59  ;;  %v9389_v3 = vrot.slane %v7850_v9, 4  ;;  %v4853_v59 = vrot.slane %v4846_v48, %v7268_v42 }
 0x209   : > { %3160 = vrot.lane.b32.xlu0 %v7674_v55, %s9482_s27  ;;  %v1462_v51 = vrot.slane %v1457_v61, 4 }
 0x20a   : > { %3249 = vrot.lane.b32.xlu1 %v7646_v37, %s9354_s25  ;;  %v1374_v8 = vsel %vm443_vm8, %v1371_v1, %v9389_v3  ;;  %v4799_v1 = vcombine.high %v4795_v18, %v4795_v18 }
 0x20b   : > { %v1375_v63 = vsel %vm9350_vm11, %v1366_v33, %v1374_v8  ;;  %v7861_v25 = vpop.permute.xlu0 %1412  ;;  %v6679_v15 = vld [vmem:[#allocation3 + $0x374] ss:$20 sps:$4 sm:$0xff]   ;;  %v6681_v17 = vld [vmem:[#allocation3 + $0x370] ss:$20 sps:$4 sm:$0xff]   ;;  %v7875_v33 = vrot.slane %v4795_v18, %v7268_v42  ;;  %vm9414_vm11 = vcmask 719872  }
 0x20c   : > { %v4266_v5 = vpop.permute.xlu1 %4265  ;;  %1381 = vst [vmem:[#allocation3 + $0xc8] sm:$0xcc] %v1375_v63  ;;  %v9393_v23 = vrot.slane %v7861_v25, 4  ;;  %5847 = vmatprep.subr.bf16.mxu1 %v6679_v15 }
 0x20d   : > { %3206 = vrot.lane.b32.xlu0 %v7646_v37, %s9483_s21  ;;  %5848 = vmatpush1.bf16.msra.mxu1 %v6681_v17  ;;  %v4271_v8 = vrot.slane %v4266_v5, 4 }
 0x20e   : > { %3295 = vrot.lane.b32.xlu1 %v7658_v46, %s9357_s23  ;;  %v1419_v39 = vsel %vm443_vm8, %v1416_v21, %v9393_v23  ;;  %v4813_v21 = vrot.slane %v4799_v1, %v7268_v42 }
 0x20f   : > { %v1420_v40 = vsel %vm9356_vm0, %v1411_v56, %v1419_v39  ;;  %v7872_v45 = vpop.permute.xlu0 %1458  ;;  %vm9360_vm0 = vcmask 687104  }
 0x210   : > { %v4312_v43 = vpop.permute.xlu1 %4311  ;;  %1426 = vst [vmem:[#allocation3 + $0xdc] sm:$0x33] %v1420_v40  ;;  %v9388_v46 = vrot.slane %v7872_v45, 4 }
 0x211   : > { %3251 = vrot.lane.b32.xlu0 %v7674_v55, %s9354_s25  ;;  %v4317_v18 = vrot.slane %v4312_v43, 4  ;;  %s9391_s25 = smov 12  }
 0x212   : > { %4821 = vrot.lane.b32.xlu1 %v7875_v33, %s9395_s28  ;;  %v1465_v52 = vsel %vm443_vm8, %v1462_v51, %v9388_v46 }
 0x213   : > { %v1466_v56 = vsel %vm9353_vm13, %v1457_v61, %v1465_v52  ;;  %v7886_v30 = vpop.permute.xlu0 %4267  ;;  %vm9420_vm13 = vcmask 703488  }
 0x214   : > { %v4357_v22 = vpop.permute.xlu1 %4356  ;;  %1472 = vst [vmem:[#allocation3 + $0xdc] sm:$0xcc] %v1466_v56  ;;  %v9367_v63 = vrot.slane %v7886_v30, 4 }
 0x215   : > { %3297 = vrot.lane.b32.xlu0 %v7646_v37, %s9357_s23  ;;  %v4362_v56 = vrot.slane %v4357_v22, 4  ;;  %s9390_s23 = smov 10  }
 0x216   : > { %4869 = vrot.lane.b32.xlu1 %v4853_v59, %s9363_s10  ;;  %v4274_v55 = vsel %vm443_vm8, %v4271_v8, %v9367_v63 }
 0x217   : > { %v4275_v61 = vsel %vm9414_vm11, %v4266_v5, %v4274_v55  ;;  %v7897_v17 = vpop.permute.xlu0 %4313 }
 0x218   : > { %v4404_v15 = vpop.permute.xlu1 %4403  ;;  %4281 = vst [vmem:[#allocation3 + $0x348] sm:$0x33] %v4275_v61  ;;  %v9365_v39 = vrot.slane %v7897_v17, 4 }
 0x219   : > { %4823 = vrot.lane.b32.xlu0 %v4813_v21, %s9395_s28  ;;  %s9470_s28 = smov 38  }
 0x21a   : > { %4916 = vrot.lane.b32.xlu1 %v7875_v33, %s9391_s25  ;;  %v4320_v37 = vsel %vm443_vm8, %v4317_v18, %v9365_v39  ;;  %v7920_v18 = vld.sshfl [vmem:[#allocation2 + $0xa] sm:$0x3 pattern:$0x76325410]  ;;  %v2993_v39 = vcombine.low %v2943_v0, %v2943_v0 }
 0x21b   : > { %v4321_v5 = vsel %vm9420_vm13, %v4312_v43, %v4320_v37  ;;  %v7908_v48 = vpop.permute.xlu0 %4358  ;;  %v6684_v51 = vld [vmem:[#allocation3 + $0xcc] ss:$20 sps:$4 sm:$0xff]   ;;  %v6686_v52 = vld [vmem:[#allocation3 + $0xc8] ss:$20 sps:$4 sm:$0xff]   ;;  %v4409_v37 = vrot.slane %v4404_v15, 4 }
 0x21c   : > { %v1227_v40 = vpop.permute.xlu1 %1226  ;;  %4327 = vst [vmem:[#allocation3 + $0x348] sm:$0xcc] %v4321_v5  ;;  %v9366_v1 = vrot.slane %v7908_v48, 4  ;;  %5808 = vmatprep.subr.bf16.mxu0 %v6684_v51  ;;  %v7958_v50 = vrot.slane %v2993_v39, %v7268_v42 }
 0x21d   : > { %4871 = vrot.lane.b32.xlu0 %v7875_v33, %s9363_s10  ;;  %5809 = vmatpush1.bf16.msra.mxu0 %v6686_v52  ;;  %s9589_s10 = smov 52  }
 0x21e   : > { %4964 = vrot.lane.b32.xlu1 %v4853_v59, %s9390_s23  ;;  %v4365_v43 = vsel %vm443_vm8, %v4362_v56, %v9366_v1  ;;  %v6687_v56 = vld [vmem:[#allocation2 + $0xa] ss:$0 sps:$4 sm:$0x33]  }
 0x21f   : > { %v4367_v8 = vsel %vm9360_vm0, %v4357_v22, %v4365_v43  ;;  %v7918_v61 = vpop.permute.xlu0 %4405  ;;  %v1232_v43 = vrot.slane %v1227_v40, 4  ;;  %vm9374_vm0 = vcmask 359424   ;;  %v6689_v1 = vld [vmem:[#allocation2 + $0xa] ss:$0 sps:$4 sm:$0x33]  }
 0x220   : > { %v1274_v55 = vpop.permute.xlu1 %1273  ;;  %4373 = vst [vmem:[#allocation3 + $0x35c] sm:$0x33] %v4367_v8  ;;  %v9364_v59 = vrot.slane %v7918_v61, 4 }
 0x221   : > { %4918 = vrot.lane.b32.xlu0 %v4813_v21, %s9391_s25  ;;  %v1279_v63 = vrot.slane %v1274_v55, 4  ;;  %s9592_s25 = smov 110  }
 0x222   : > { %1689 = vrot.lane.b32.xlu1 %v7920_v18, %s9482_s27  ;;  %v4412_v22 = vsel %vm443_vm8, %v4409_v37, %v9364_v59  ;;  %v1731_v59 = vrot.slane %v6687_v56, %v7268_v42 }
 0x223   : > { %v4414_v5 = vsel %vm9368_vm14, %v4404_v15, %v4412_v22  ;;  %v7930_v52 = vpop.permute.xlu0 %1228  ;;  %vm9375_vm14 = vcmask 343040  }
 0x224   : > { %v4084_v51 = vpop.permute.xlu1 %4083  ;;  %4420 = vst [vmem:[#allocation3 + $0x35c] sm:$0xcc] %v4414_v5  ;;  %v9387_v8 = vrot.slane %v7930_v52, 4  ;;  %v7944_v5 = vrot.slane %v2943_v0, %v7268_v42 }
 0x225   : > { %4966 = vrot.lane.b32.xlu0 %v7875_v33, %s9390_s23  ;;  %v4089_v38 = vrot.slane %v4084_v51, 4  ;;  %s9480_s23 = smov 40  }
 0x226   : > { %1782 = vrot.lane.b32.xlu1 %v7920_v18, %s9589_s10  ;;  %v1235_v15 = vsel %vm443_vm8, %v1232_v43, %v9387_v8  ;;  %s9590_s10 = smov 112   ;;  %v6709_v8 = vld [vmem:[#allocation2 + $0xa] ss:$0 sps:$4 sm:$0x33]  }
 0x227   : > { %v1237_v21 = vsel %vm9374_vm0, %v1227_v40, %v1235_v15  ;;  %v7941_v22 = vpop.permute.xlu0 %1275  ;;  %vm2613_vm0 = vcmask 785408  }
 0x228   : > { %v4130_v37 = vpop.permute.xlu1 %4129  ;;  %1243 = vst [vmem:[#allocation3 + $0xb4] sm:$0x33] %v1237_v21  ;;  %v9385_v33 = vrot.slane %v7941_v22, 4  ;;  %v1823_v21 = vrot.slane %v6689_v1, %v7268_v42 }
 0x229   : > { %1736 = vrot.lane.b32.xlu0 %v1731_v59, %s9483_s21 }
 0x22a   : > { %2969 = vrot.lane.b32.xlu1 %v7944_v5, %s9410_s7  ;;  %v1282_v40 = vsel %vm443_vm8, %v1279_v63, %v9385_v33 }
 0x22b   : > { %v1284_v43 = vsel %vm9375_vm14, %v1274_v55, %v1282_v40  ;;  %v7955_v56 = vpop.permute.xlu0 %4085  ;;  %v6690_v32 = vld [vmem:[#allocation3 + $0x34c] ss:$20 sps:$4 sm:$0xff]   ;;  %v6692_v20 = vld [vmem:[#allocation3 + $0x348] ss:$20 sps:$4 sm:$0xff]   ;;  %v7972_v55 = vrot.slane %v2947_v10, %v7268_v42  ;;  %v4135_v40 = vrot.slane %v4130_v37, 4  ;;  %vm9512_vm14 = vcmask 769024  }
 0x22c   : > { %v4175_v15 = vpop.permute.xlu1 %4174  ;;  %1290 = vst [vmem:[#allocation3 + $0xb4] sm:$0xcc] %v1284_v43  ;;  %v9377_v59 = vrot.slane %v7955_v56, 4  ;;  %5849 = vmatprep.subr.bf16.mxu1 %v6690_v32 }
 0x22d   : > { %1828 = vrot.lane.b32.xlu0 %v1823_v21, %s9587_s5  ;;  %5850 = vmatpush1.bf16.msra.mxu1 %v6692_v20  ;;  %s9591_s5 = smov 108  }
 0x22e   : > { %3016 = vrot.lane.b32.xlu1 %v7958_v50, %s9396_s30  ;;  %v4092_v63 = vsel %vm443_vm8, %v4089_v38, %v9377_v59  ;;  %v7979_v38 = vld [vmem:[#allocation7 + $0x8] sm:$0xff]  ;;  %v4180_v59 = vrot.slane %v4175_v15, 4 }
 0x22f   : > { %v4093_v39 = vsel %vm2613_vm0, %v4084_v51, %v4092_v63  ;;  %v7969_v0 = vpop.permute.xlu0 %4131  ;;  %v7986_v10 = vcombine.high %v7979_v38, %v7979_v38 }
 0x230   : > { %v4221_v1 = vpop.permute.xlu1 %4220  ;;  %4099 = vst [vmem:[#allocation3 + $0x320] sm:$0x33] %v4093_v39  ;;  %v9380_v43 = vrot.slane %v7969_v0, 4 }
 0x231   : > { %2971 = vrot.lane.b32.xlu0 %v7972_v55, %s9410_s7  ;;  %6493 = vmatprep.mubr.msk.bf16.mxu1 %vm9458_vm7, %v7986_v10  ;;  %v4226_v19 = vrot.slane %v4221_v1, 4  ;;  %s9602_s7 = smov 114  }
 0x232   : > { %3063 = vrot.lane.b32.xlu1 %v7944_v5, %s9416_s29  ;;  %v4138_v32 = vsel %vm443_vm8, %v4135_v40, %v9380_v43  ;;  %v6697_v40 = vld [vmem:[#allocation3 + $0x7c] ss:$20 sps:$4 sm:$0xff]  }
 0x233   : > { %v4139_v20 = vsel %vm9512_vm14, %v4130_v37, %v4138_v32  ;;  %v7989_v21 = vpop.permute.xlu0 %4176  ;;  %v6694_v63 = vld [vmem:[#allocation3 + $0xa4] ss:$20 sps:$4 sm:$0xff]   ;;  %v6696_v39 = vld [vmem:[#allocation3 + $0xa0] ss:$20 sps:$4 sm:$0xff]  }
 0x234   : > { %v3894_v51 = vpop.permute.xlu1 %3893  ;;  %4145 = vst [vmem:[#allocation3 + $0x320] sm:$0xcc] %v4139_v20  ;;  %v9384_v31 = vrot.slane %v7989_v21, 4  ;;  %5810 = vmatprep.subr.bf16.mxu0 %v6694_v63  ;;  %v6700_v63 = vld [vmem:[#allocation3 + $0x54] ss:$20 sps:$4 sm:$0xff]  }
 0x235   : > { %3018 = vrot.lane.b32.xlu0 %v7944_v5, %s9396_s30  ;;  %5811 = vmatpush1.bf16.msra.mxu0 %v6696_v39  ;;  %s9593_s30 = smov 106  }
 0x236   : > { %3111 = vrot.lane.b32.xlu1 %v7958_v50, %s9400_s13  ;;  %v4183_v37 = vsel %vm443_vm8, %v4180_v59, %v9384_v31  ;;  %5812 = vmatprep.subr.bf16.mxu0 %v6697_v40  ;;  %v6699_v59 = vld [vmem:[#allocation3 + $0x78] ss:$20 sps:$4 sm:$0xff]   ;;  %v6705_v31 = vld [vmem:[#allocation2 + $0xa] ss:$0 sps:$4 sm:$0x33]   ;;  %v3899_v40 = vrot.slane %v3894_v51, 4 }
 0x237   : > { %v4184_v32 = vsel %vm9444_vm12, %v4175_v15, %v4183_v37  ;;  %v8002_v43 = vpop.permute.xlu0 %4222 }
 0x238   : > { %v3942_v20 = vpop.permute.xlu1 %3941  ;;  %4190 = vst [vmem:[#allocation3 + $0x334] sm:$0x33] %v4184_v32  ;;  %v9386_v4 = vrot.slane %v8002_v43, 4 }
 0x239   : > { %3065 = vrot.lane.b32.xlu0 %v7972_v55, %s9416_s29  ;;  %5813 = vmatpush1.bf16.msra.mxu0 %v6699_v59  ;;  %v6703_v59 = vld [vmem:[#allocation3 + $0x2c] ss:$20 sps:$4 sm:$0xff]   ;;  %v3947_v46 = vrot.slane %v3942_v20, 4  ;;  %s9606_s29 = smov 42  }
 0x23a   : > { %1505 = vrot.lane.b32.xlu1 %v7920_v18, %s9590_s10  ;;  %v4229_v15 = vsel %vm443_vm8, %v4226_v19, %v9386_v4  ;;  %5814 = vmatprep.subr.bf16.mxu0 %v6700_v63  ;;  %v6702_v19 = vld [vmem:[#allocation3 + $0x50] ss:$20 sps:$4 sm:$0xff]   ;;  %v1546_v63 = vrot.slane %v6705_v31, %v7268_v42 }
 0x23b   : > { %v4230_v39 = vsel %vm9440_vm6, %v4221_v1, %v4229_v15  ;;  %v8013_v32 = vpop.permute.xlu0 %3895 }
 0x23c   : > { %v3989_v37 = vpop.permute.xlu1 %3988  ;;  %4236 = vst [vmem:[#allocation3 + $0x334] sm:$0xcc] %v4230_v39  ;;  %v9392_v33 = vrot.slane %v8013_v32, 4 }
 0x23d   : > { %3113 = vrot.lane.b32.xlu0 %v7944_v5, %s9400_s13  ;;  %5815 = vmatpush1.bf16.msra.mxu0 %v6702_v19  ;;  %v6707_v19 = vld [vmem:[#allocation3 + $0x4] ss:$20 sps:$4 sm:$0xff]   ;;  %v3994_v7 = vrot.slane %v3989_v37, 4  ;;  %s9596_s13 = smov 120  }
 0x23e   : > { %1596 = vrot.lane.b32.xlu1 %v7920_v18, %s9591_s5  ;;  %v3902_v1 = vsel %vm443_vm8, %v3899_v40, %v9392_v33  ;;  %5816 = vmatprep.subr.bf16.mxu0 %v6703_v59  ;;  %v6706_v40 = vld [vmem:[#allocation3 + $0x28] ss:$20 sps:$4 sm:$0xff]   ;;  %v1638_v59 = vrot.slane %v6709_v8, %v7268_v42 }
 0x23f   : > { %v3904_v15 = vsel %vm9464_vm1, %v3894_v51, %v3902_v1  ;;  %v8024_v39 = vpop.permute.xlu0 %3943  ;;  %vm9617_vm1 = vcmask 254976  }
 0x240   : > { %v4037_v4 = vpop.permute.xlu1 %4036  ;;  %3911 = vst [vmem:[#allocation3 + $0x2f8] sm:$0x33] %v3904_v15  ;;  %v9404_v3 = vrot.slane %v8024_v39, 4 }
 0x241   : > { %1551 = vrot.lane.b32.xlu0 %v1546_v63, %s9592_s25  ;;  %5817 = vmatpush1.bf16.msra.mxu0 %v6706_v40 }
 0x242   : > { %2787 = vrot.lane.b32.xlu1 %v7944_v5, %s9480_s23  ;;  %v3950_v51 = vsel %vm443_vm8, %v3947_v46, %v9404_v3  ;;  %5818 = vmatprep.subr.bf16.mxu0 %v6707_v19  ;;  %v6713_v46 = vld [vmem:[#allocation3] ss:$20 sps:$4 sm:$0xff]   ;;  %v4042_v19 = vrot.slane %v4037_v4, 4 }
 0x243   : > { %v3952_v31 = vsel %vm9398_vm10, %v3942_v20, %v3950_v51  ;;  %v8035_v15 = vpop.permute.xlu0 %3990  ;;  %v6710_v33 = vld [vmem:[#allocation3 + $0x324] ss:$20 sps:$4 sm:$0xff]   ;;  %v6712_v23 = vld [vmem:[#allocation3 + $0x320] ss:$20 sps:$4 sm:$0xff]   ;;  %vm2979_vm10 = vcmask 261120  }
 0x244   : > { %v3709_v1 = vpop.permute.xlu1 %3708  ;;  %3959 = vst [vmem:[#allocation3 + $0x2f8] sm:$0xcc] %v3952_v31  ;;  %v9405_v63 = vrot.slane %v8035_v15, 4  ;;  %5851 = vmatprep.subr.bf16.mxu1 %v6710_v33 }
 0x245   : > { %1643 = vrot.lane.b32.xlu0 %v1638_v59, %s9593_s30  ;;  %5852 = vmatpush1.bf16.msra.mxu1 %v6712_v23  ;;  %v3714_v59 = vrot.slane %v3709_v1, 4 }
 0x246   : > { %2833 = vrot.lane.b32.xlu1 %v7958_v50, %s9470_s28  ;;  %v3997_v20 = vsel %vm443_vm8, %v3994_v7, %v9405_v63  ;;  %5819 = vmatpush1.bf16.msra.mxu0 %v6713_v46 }
 0x247   : > { %v3999_v8 = vsel %vm9455_vm3, %v3989_v37, %v3997_v20  ;;  %v8046_v51 = vpop.permute.xlu0 %4038  ;;  %vm9468_vm3 = vcmask 113664  }
 0x248   : > { %v3755_v40 = vpop.permute.xlu1 %3754  ;;  %4006 = vst [vmem:[#allocation3 + $0x30c] sm:$0x33] %v3999_v8  ;;  %v9403_v31 = vrot.slane %v8046_v51, 4 }
 0x249   : > { %2789 = vrot.lane.b32.xlu0 %v7972_v55, %s9480_s23 }
 0x24a   : > { %2878 = vrot.lane.b32.xlu1 %v7944_v5, %s9478_s14  ;;  %v4045_v7 = vsel %vm443_vm8, %v4042_v19, %v9403_v31 }
 0x24b   : > { %v4047_v33 = vsel %vm9399_vm5, %v4037_v4, %v4045_v7  ;;  %v8057_v37 = vpop.permute.xlu0 %3710  ;;  %v3760_v7 = vrot.slane %v3755_v40, 4  ;;  %vm9497_vm5 = vcmask 244736  }
 0x24c   : > { %v3801_v23 = vpop.permute.xlu1 %3800  ;;  %9594 = vst [vmem:[#allocation22_spill] sm:$0xff] %v8057_v37  ;;  %4054 = vst [vmem:[#allocation3 + $0x30c] sm:$0xcc] %v4047_v33  ;;  %v9402_v46 = vrot.slane %v8057_v37, 4  ;;  %v6785_v37 = vld [vmem:[#allocation3 + $0x8] ss:$20 sps:$4 sm:$0xff]  }
 0x24d   : > { %2835 = vrot.lane.b32.xlu0 %v7944_v5, %s9470_s28  ;;  %v3806_v63 = vrot.slane %v3801_v23, 4 }
 0x24e   : > { %2924 = vrot.lane.b32.xlu1 %v7958_v50, %s9472_s12  ;;  %v3717_v20 = vsel %vm443_vm8, %v3714_v59, %v9402_v46  ;;  %v6717_v46 = vld [vmem:[#allocation2 + $0xa] ss:$0 sps:$4 sm:$0x33]  }
 0x24f   : > { %v3718_v4 = vsel %vm2979_vm10, %v3709_v1, %v3717_v20  ;;  %v8068_v19 = vpop.permute.xlu0 %3756 }
 0x250   : > { %v3848_v8 = vpop.permute.xlu1 %3847  ;;  %9595 = vst [vmem:[#allocation23_spill] sm:$0xff] %v8068_v19  ;;  %3724 = vst [vmem:[#allocation3 + $0x2d0] sm:$0x33] %v3718_v4  ;;  %v9407_v33 = vrot.slane %v8068_v19, 4 }
 0x251   : > { %2880 = vrot.lane.b32.xlu0 %v7972_v55, %s9478_s14  ;;  %v3853_v57 = vrot.slane %v3848_v8, 4 }
 0x252   : > { %1323 = vrot.lane.b32.xlu1 %v7920_v18, %s9596_s13  ;;  %v3763_v59 = vsel %vm443_vm8, %v3760_v7, %v9407_v33  ;;  %s9598_s13 = smov 116  }
 0x253   : > { %v3764_v1 = vsel %vm9497_vm5, %v3755_v40, %v3763_v59  ;;  %v8079_v31 = vpop.permute.xlu0 %3802  ;;  %v6714_v4 = vld [vmem:[#allocation3 + $0x2fc] ss:$20 sps:$4 sm:$0xff]   ;;  %v6716_v3 = vld [vmem:[#allocation3 + $0x2f8] ss:$20 sps:$4 sm:$0xff]  }
 0x254   : > { %v3525_v20 = vpop.permute.xlu1 %3524  ;;  %9597 = vst [vmem:[#allocation24_spill] sm:$0xff] %v8079_v31  ;;  %3771 = vst [vmem:[#allocation3 + $0x2d0] sm:$0xcc] %v3764_v1  ;;  %v9415_v13 = vrot.slane %v8079_v31, 4  ;;  %5853 = vmatprep.subr.bf16.mxu1 %v6714_v4  ;;  %v1364_v1 = vrot.slane %v6717_v46, %v7268_v42  ;;  %v1455_v46 = vrot.slane %v6718_v49, %v7268_v42 }
 0x255   : > { %2926 = vrot.lane.b32.xlu0 %v7944_v5, %s9472_s12  ;;  %5854 = vmatpush1.bf16.msra.mxu1 %v6716_v3 }
 0x256   : > { %1414 = vrot.lane.b32.xlu1 %v7920_v18, %s9598_s13  ;;  %v3809_v7 = vsel %vm443_vm8, %v3806_v63, %v9415_v13  ;;  %s9600_s13 = smov 118  }
 0x257   : > { %v3810_v40 = vsel %vm3073_vm2, %v3801_v23, %v3809_v7  ;;  %v8090_v33 = vpop.permute.xlu0 %3849  ;;  %v3530_v7 = vrot.slane %v3525_v20, 4 }
 0x258   : > { %v3572_v59 = vpop.permute.xlu1 %3571  ;;  %9599 = vst [vmem:[#allocation25_spill] sm:$0xff] %v8090_v33  ;;  %3817 = vst [vmem:[#allocation3 + $0x2e4] sm:$0x33] %v3810_v40  ;;  %v9412_v18 = vrot.slane %v8090_v33, 4 }
 0x259   : > { %1369 = vrot.lane.b32.xlu0 %v1364_v1, %s9600_s13  ;;  %s9604_s13 = smov 44  }
 0x25a   : > { %2603 = vrot.lane.b32.xlu1 %v7944_v5, %s9431_s6  ;;  %v3856_v63 = vsel %vm443_vm8, %v3853_v57, %v9412_v18  ;;  %v3577_v18 = vrot.slane %v3572_v59, 4 }
 0x25b   : > { %v3857_v3 = vsel %vm3121_vm15, %v3848_v8, %v3856_v63  ;;  %v8101_v4 = vpop.permute.xlu0 %3526 }
 0x25c   : > { %v3618_v23 = vpop.permute.xlu1 %3617  ;;  %9601 = vst [vmem:[#allocation26_spill] sm:$0xff] %v8101_v4  ;;  %3864 = vst [vmem:[#allocation3 + $0x2e4] sm:$0xcc] %v3857_v3  ;;  %v9413_v40 = vrot.slane %v8101_v4, 4 }
 0x25d   : > { %1460 = vrot.lane.b32.xlu0 %v1455_v46, %s9602_s7 }
 0x25e   : > { %2650 = vrot.lane.b32.xlu1 %v7958_v50, %s9428_s11  ;;  %v3533_v57 = vsel %vm443_vm8, %v3530_v7, %v9413_v40 }
 0x25f   : > { %v3535_v8 = vsel %vm9414_vm11, %v3525_v20, %v3533_v57  ;;  %v8112_v63 = vpop.permute.xlu0 %3573  ;;  %vm2154_vm11 = vcmask 293888  }
 0x260   : > { %v3664_v1 = vpop.permute.xlu1 %3663  ;;  %9603 = vst [vmem:[#allocation27_spill] sm:$0xff] %v8112_v63  ;;  %3541 = vst [vmem:[#allocation3 + $0x2a8] sm:$0x33] %v3535_v8  ;;  %v9418_v49 = vrot.slane %v8112_v63, 4  ;;  %v3623_v8 = vrot.slane %v3618_v23, 4 }
 0x261   : > { %2605 = vrot.lane.b32.xlu0 %v7972_v55, %s9431_s6  ;;  %v3669_v27 = vrot.slane %v3664_v1, 4  ;;  %s9613_s6 = smov 98  }
 0x262   : > { %2696 = vrot.lane.b32.xlu1 %v7944_v5, %s9604_s13  ;;  %v3580_v3 = vsel %vm443_vm8, %v3577_v18, %v9418_v49 }
 0x263   : > { %v3582_v46 = vsel %vm9420_vm13, %v3572_v59, %v3580_v3  ;;  %v8123_v7 = vpop.permute.xlu0 %3619  ;;  %v6719_v57 = vld [vmem:[#allocation3 + $0x2d4] ss:$20 sps:$4 sm:$0xff]   ;;  %v6721_v40 = vld [vmem:[#allocation3 + $0x2d0] ss:$20 sps:$4 sm:$0xff]   ;;  %vm9557_vm13 = vcmask 277504  }
 0x264   : > { %v3341_v20 = vpop.permute.xlu1 %3340  ;;  %9605 = vst [vmem:[#allocation28_spill] sm:$0xff] %v8123_v7  ;;  %3588 = vst [vmem:[#allocation3 + $0x2a8] sm:$0xcc] %v3582_v46  ;;  %v9422_v13 = vrot.slane %v8123_v7, 4  ;;  %5855 = vmatprep.subr.bf16.mxu1 %v6719_v57 }
 0x265   : > { %2652 = vrot.lane.b32.xlu0 %v7944_v5, %s9428_s11  ;;  %5856 = vmatpush1.bf16.msra.mxu1 %v6721_v40  ;;  %v6323_v46 = vld.sshfl [vmem:[#allocation2 + $0x8] sm:$0x3 pattern:$0x76325410]  ;;  %s9611_s11 = smov 100  }
 0x266   : > { %2742 = vrot.lane.b32.xlu1 %v7958_v50, %s9606_s29  ;;  %v3626_v59 = vsel %vm443_vm8, %v3623_v8, %v9422_v13  ;;  %v3346_v13 = vrot.slane %v3341_v20, 4 }
 0x267   : > { %v3627_v18 = vsel %vm2154_vm11, %v3618_v23, %v3626_v59  ;;  %v8134_v49 = vpop.permute.xlu0 %3665  ;;  %v6722_v59 = vld [vmem:[#allocation2 + $0x8] ss:$0 sps:$4 sm:$0x33]  }
 0x268   : > { %v3387_v3 = vpop.permute.xlu1 %3386  ;;  %9607 = vst [vmem:[#allocation29_spill] sm:$0xff] %v8134_v49  ;;  %3633 = vst [vmem:[#allocation3 + $0x2bc] sm:$0x33] %v3627_v18  ;;  %v9423_v62 = vrot.slane %v8134_v49, 4  ;;  %v2025_v49 = vld [vmem:[#allocation2 + $0x2] sm:$0xff] }
 0x269   : > { %2698 = vrot.lane.b32.xlu0 %v7972_v55, %s9604_s13 }
 0x26a   : > { %1230 = vrot.lane.b32.xlu1 %v6323_v46, %s9604_s13  ;;  %v3672_v57 = vsel %vm443_vm8, %v3669_v27, %v9423_v62  ;;  %v1272_v62 = vrot.slane %v6722_v59, %v7268_v42 }
 0x26b   : > { %v3673_v23 = vsel %vm9557_vm13, %v3664_v1, %v3672_v57  ;;  %v8144_v8 = vpop.permute.xlu0 %3342 }
 0x26c   : > { %v3432_v40 = vpop.permute.xlu1 %3431  ;;  %9608 = vst [vmem:[#allocation30_spill] sm:$0xff] %v8144_v8  ;;  %3679 = vst [vmem:[#allocation3 + $0x2bc] sm:$0xcc] %v3673_v23  ;;  %v9425_v18 = vrot.slane %v8144_v8, 4  ;;  %v3392_v23 = vrot.slane %v3387_v3, 4 }
 0x26d   : > { %2744 = vrot.lane.b32.xlu0 %v7944_v5, %s9606_s29  ;;  %v3437_v16 = vrot.slane %v3432_v40, 4 }
 0x26e   : > { %2419 = vrot.lane.b32.xlu1 %v7944_v5, %s9482_s27  ;;  %v3349_v27 = vsel %vm443_vm8, %v3346_v13, %v9425_v18 }
 0x26f   : > { %v3350_v1 = vsel %vm2613_vm0, %v3341_v20, %v3349_v27  ;;  %v8155_v57 = vpop.permute.xlu0 %3388 }
 0x270   : > { %v3479_v46 = vpop.permute.xlu1 %3478  ;;  %9609 = vst [vmem:[#allocation31_spill] sm:$0xff] %v8155_v57  ;;  %3356 = vst [vmem:[#allocation3 + $0x280] sm:$0x33] %v3350_v1  ;;  %v9430_v34 = vrot.slane %v8155_v57, 4 }
 0x271   : > { %1277 = vrot.lane.b32.xlu0 %v1272_v62, %s9606_s29 }
 0x272   : > { %2465 = vrot.lane.b32.xlu1 %v7958_v50, %s9483_s21  ;;  %v3395_v13 = vsel %vm443_vm8, %v3392_v23, %v9430_v34 }
 0x273   : > { %v3396_v20 = vsel %vm9512_vm14, %v3387_v3, %v3395_v13  ;;  %v8166_v18 = vpop.permute.xlu0 %3433  ;;  %v6723_v29 = vld [vmem:[#allocation3 + $0x2ac] ss:$20 sps:$4 sm:$0xff]   ;;  %v6725_v59 = vld [vmem:[#allocation3 + $0x2a8] ss:$20 sps:$4 sm:$0xff]  }
 0x274   : > { %v3159_v27 = vpop.permute.xlu1 %3158  ;;  %9610 = vst [vmem:[#allocation32_spill] sm:$0xff] %v8166_v18  ;;  %3402 = vst [vmem:[#allocation3 + $0x280] sm:$0xcc] %v3396_v20  ;;  %v9433_v1 = vrot.slane %v8166_v18, 4  ;;  %5857 = vmatprep.subr.bf16.mxu1 %v6723_v29  ;;  %v3484_v20 = vrot.slane %v3479_v46, 4 }
 0x275   : > { %2421 = vrot.lane.b32.xlu0 %v7972_v55, %s9482_s27  ;;  %5858 = vmatpush1.bf16.msra.mxu1 %v6725_v59 }
 0x276   : > { %2510 = vrot.lane.b32.xlu1 %v7944_v5, %s9611_s11  ;;  %v3440_v62 = vsel %vm443_vm8, %v3437_v16, %v9433_v1 }
 0x277   : > { %v3442_v3 = vsel %vm9444_vm12, %v3432_v40, %v3440_v62  ;;  %v8177_v13 = vpop.permute.xlu0 %3480  ;;  %v3164_v62 = vrot.slane %v3159_v27, 4  ;;  %vm2567_vm12 = vcmask 801792  }
 0x278   : > { %v3205_v23 = vpop.permute.xlu1 %3204  ;;  %9612 = vst [vmem:[#allocation33_spill] sm:$0xff] %v8177_v13  ;;  %3448 = vst [vmem:[#allocation3 + $0x294] sm:$0x33] %v3442_v3  ;;  %v9434_v34 = vrot.slane %v8177_v13, 4 }
 0x279   : > { %2467 = vrot.lane.b32.xlu0 %v7944_v5, %s9483_s21  ;;  %s9643_s21 = smov 80  }
 0x27a   : > { %2557 = vrot.lane.b32.xlu1 %v7958_v50, %s9613_s6  ;;  %v3487_v16 = vsel %vm443_vm8, %v3484_v20, %v9434_v34  ;;  %v3210_v34 = vrot.slane %v3205_v23, 4 }
 0x27b   : > { %v3489_v29 = vsel %vm9440_vm6, %v3479_v46, %v3487_v16  ;;  %v8188_v59 = vpop.permute.xlu0 %3160  ;;  %vm2520_vm6 = vcmask 818176  }
 0x27c   : > { %v3250_v40 = vpop.permute.xlu1 %3249  ;;  %3495 = vst [vmem:[#allocation3 + $0x294] sm:$0xcc] %v3489_v29  ;;  %v9437_v3 = vrot.slane %v8188_v59, 4 }
 0x27d   : > { %2512 = vrot.lane.b32.xlu0 %v7972_v55, %s9611_s11 }
 0x27e   : > { %2237 = vrot.lane.b32.xlu1 %v7944_v5, %s9590_s10  ;;  %v3167_v1 = vsel %vm443_vm8, %v3164_v62, %v9437_v3 }
 0x27f   : > { %v3168_v20 = vsel %vm1695_vm9, %v3159_v27, %v3167_v1  ;;  %v8199_v16 = vpop.permute.xlu0 %3206 }
 0x280   : > { %v3296_v46 = vpop.permute.xlu1 %3295  ;;  %3174 = vst [vmem:[#allocation3 + $0x258] sm:$0x33] %v3168_v20  ;;  %v9443_v29 = vrot.slane %v8199_v16, 4  ;;  %v3255_v20 = vrot.slane %v3250_v40, 4 }
 0x281   : > { %2559 = vrot.lane.b32.xlu0 %v7944_v5, %s9613_s6 }
 0x282   : > { %2283 = vrot.lane.b32.xlu1 %v7958_v50, %s9592_s25  ;;  %v3213_v13 = vsel %vm443_vm8, %v3210_v34, %v9443_v29 }
 0x283   : > { %v3214_v62 = vsel %vm1742_vm4, %v3205_v23, %v3213_v13  ;;  %v8210_v1 = vpop.permute.xlu0 %3251  ;;  %v6726_v3 = vld [vmem:[#allocation3 + $0x284] ss:$20 sps:$4 sm:$0xff]   ;;  %v6728_v57 = vld [vmem:[#allocation3 + $0x280] ss:$20 sps:$4 sm:$0xff]  }
 0x284   : > { %v4822_v27 = vpop.permute.xlu1 %4821  ;;  %3220 = vst [vmem:[#allocation3 + $0x258] sm:$0xcc] %v3214_v62  ;;  %v9449_v18 = vrot.slane %v8210_v1, 4  ;;  %5859 = vmatprep.subr.bf16.mxu1 %v6726_v3  ;;  %v3301_v62 = vrot.slane %v3296_v46, 4 }
 0x285   : > { %2239 = vrot.lane.b32.xlu0 %v7972_v55, %s9590_s10  ;;  %5860 = vmatpush1.bf16.msra.mxu1 %v6728_v57 }
 0x286   : > { %2328 = vrot.lane.b32.xlu1 %v7944_v5, %s9591_s5  ;;  %v3258_v34 = vsel %vm443_vm8, %v3255_v20, %v9449_v18  ;;  %v4827_v18 = vrot.slane %v4822_v27, 4 }
 0x287   : > { %v3259_v23 = vsel %vm2520_vm6, %v3250_v40, %v3258_v34  ;;  %v8221_v29 = vpop.permute.xlu0 %3297  ;;  %v8235_v34 = vrot.slane %v2025_v49, %v7268_v42 }
 0x288   : > { %v4870_v13 = vpop.permute.xlu1 %4869  ;;  %3265 = vst [vmem:[#allocation3 + $0x26c] sm:$0x33] %v3259_v23  ;;  %v9450_v8 = vrot.slane %v8221_v29, 4  ;;  %v2075_v23 = vcombine.low %v2025_v49, %v2025_v49 }
 0x289   : > { %2285 = vrot.lane.b32.xlu0 %v7944_v5, %s9592_s25  ;;  %v4875_v7 = vrot.slane %v4870_v13, 4 }
 0x28a   : > { %2374 = vrot.lane.b32.xlu1 %v7958_v50, %s9593_s30  ;;  %v3304_v40 = vsel %vm443_vm8, %v3301_v62, %v9450_v8  ;;  %v8249_v63 = vrot.slane %v2075_v23, %v7268_v42 }
 0x28b   : > { %v3305_v57 = vsel %vm2567_vm12, %v3296_v46, %v3304_v40  ;;  %v8232_v20 = vpop.permute.xlu0 %4823 }
 0x28c   : > { %v4917_v3 = vpop.permute.xlu1 %4916  ;;  %9614 = vst [vmem:[#allocation34_spill] sm:$0xff] %v8232_v20  ;;  %3311 = vst [vmem:[#allocation3 + $0x26c] sm:$0xcc] %v3305_v57  ;;  %v9459_v50 = vrot.slane %v8232_v20, 4  ;;  %v2029_v57 = vcombine.high %v2025_v49, %v2025_v49 }
 0x28d   : > { %2330 = vrot.lane.b32.xlu0 %v7972_v55, %s9591_s5  ;;  %v4922_v20 = vrot.slane %v4917_v3, 4 }
 0x28e   : > { %2051 = vrot.lane.b32.xlu1 %v8235_v34, %s9480_s23  ;;  %v4830_v46 = vsel %vm443_vm8, %v4827_v18, %v9459_v50  ;;  %v8263_v23 = vrot.slane %v2029_v57, %v7268_v42 }
 0x28f   : > { %v4832_v62 = vsel %vm9458_vm7, %v4822_v27, %v4830_v46  ;;  %v8246_v8 = vpop.permute.xlu0 %4871  ;;  %vm9469_vm7 = vcmask 97280   ;;  %v5077_v46 = vld [vmem:[#allocation3 + $0x258] sm:$0xff] }
 0x290   : > { %v4965_v40 = vpop.permute.xlu1 %4964  ;;  %9615 = vst [vmem:[#allocation35_spill] sm:$0xff] %v8246_v8  ;;  %4839 = vst [vmem:[#allocation3 + $0x3c0] sm:$0x33] %v4832_v62  ;;  %v9465_v4 = vrot.slane %v8246_v8, 4 }
 0x291   : > { %2376 = vrot.lane.b32.xlu0 %v7944_v5, %s9593_s30 }
 0x292   : > { %2098 = vrot.lane.b32.xlu1 %v8249_v63, %s9470_s28  ;;  %v4878_v55 = vsel %vm443_vm8, %v4875_v7, %v9465_v4  ;;  %v4970_v4 = vrot.slane %v4965_v40, 4 }
 0x293   : > { %v4880_v18 = vsel %vm9468_vm3, %v4870_v13, %v4878_v55  ;;  %v8260_v49 = vpop.permute.xlu0 %4918  ;;  %v5080_v62 = vld [vmem:[#allocation3 + $0x26c] sm:$0xff]  ;;  %v9618_v13 = vrot.slane %v7671_v54, 4  ;;  %vm9491_vm3 = vcmask 80896  }
 0x294   : > { %v1690_v27 = vpop.permute.xlu1 %1689  ;;  %9616 = vst [vmem:[#allocation36_spill] sm:$0xff] %v8260_v49  ;;  %v6730_v50 = vld [vmem:[#allocation3 + $0x25c] ss:$20 sps:$4 sm:$0xff]   ;;  %4887 = vst [vmem:[#allocation3 + $0x3c0] sm:$0xcc] %v4880_v18  ;;  %v9475_v5 = vrot.slane %v8260_v49, 4  ;;  %v6443_v7 = vcombine.low %v5077_v46, %v5080_v62 }
 0x295   : > { %v1693_v33 = vrot.slane %v1690_v27, 4  ;;  %1704 = vst.msk [vmem:[#allocation3 + $0x128] sm:$0x3] %vm9617_vm1, %v1690_v27  ;;  %2053 = vrot.lane.b32.xlu0 %v8263_v23, %s9480_s23  ;;  %5820 = vmatprep.subr.bf16.mxu0 %v6730_v50  ;;  %s9637_s23 = smov 22  }
 0x296   : > { %2144 = vrot.lane.b32.xlu1 %v8235_v34, %s9478_s14  ;;  %v4925_v55 = vsel %vm443_vm8, %v4922_v20, %v9475_v5  ;;  %5821 = vmatpush2.bf16.msra.mxu0 %v6443_v7 }
 0x297   : > { %v1697_v57 = vsel %vm443_vm8, %v9618_v13, %v1693_v33  ;;  %v4927_v27 = vsel %vm9469_vm7, %v4917_v3, %v4925_v55  ;;  %v8280_v62 = vpop.permute.xlu0 %4966  ;;  %vm9621_vm7 = vcmask 424960  }
 0x298   : > { %v1698_v18 = vsel %vm1695_vm9, %v7671_v54, %v1697_v57  ;;  %v1783_v46 = vpop.permute.xlu1 %1782  ;;  %9619 = vst [vmem:[#allocation37_spill] sm:$0xff] %v8280_v62  ;;  %4934 = vst [vmem:[#allocation3 + $0x3d4] sm:$0x33] %v4927_v27  ;;  %v9474_v33 = vrot.slane %v8280_v62, 4  ;;  %v9620_v54 = vrot.slane %v7685_v58, 4 }
 0x299   : > { %1703 = vst [vmem:[#allocation3 + $0x120] sm:$0x33] %v1698_v18  ;;  %v1786_v8 = vrot.slane %v1783_v46, 4  ;;  %1796 = vst.msk [vmem:[#allocation3 + $0x13c] sm:$0x3] %vm9617_vm1, %v1783_v46  ;;  %2100 = vrot.lane.b32.xlu0 %v8235_v34, %s9470_s28  ;;  %vm9622_vm1 = vcmask 257026  }
 0x29a   : > { %2191 = vrot.lane.b32.xlu1 %v8249_v63, %s9472_s12  ;;  %v4973_v20 = vsel %vm443_vm8, %v4970_v4, %v9474_v33  ;;  %v9623_v4 = vrot.slane %v7510_v44, 4  ;;  %s9625_s28 = smov 46   ;;  %v9626_v46 = vrot.slane %v7696_v60, 4 }
 0x29b   : > { %v1789_v3 = vsel %vm443_vm8, %v9620_v54, %v1786_v8  ;;  %v4975_v7 = vsel %vm9491_vm3, %v4965_v40, %v4973_v20  ;;  %v1737_v57 = vpop.permute.xlu0 %1736  ;;  %vm9647_vm3 = vcmask 254976  }
 0x29c   : > { %v1790_v50 = vsel %vm9621_vm7, %v7685_v58, %v1789_v3  ;;  %v2970_v13 = vpop.permute.xlu1 %2969  ;;  %4982 = vst [vmem:[#allocation3 + $0x3d4] sm:$0xcc] %v4975_v7  ;;  %v1740_v55 = vrot.slane %v1737_v57, 4  ;;  %1751 = vst.msk [vmem:[#allocation3 + $0x128] sm:$0xc] %vm9622_vm1, %v1737_v57 }
 0x29d   : > { %1795 = vst [vmem:[#allocation3 + $0x134] sm:$0x33] %v1790_v50  ;;  %2146 = vrot.lane.b32.xlu0 %v8263_v23, %s9478_s14  ;;  %vm9624_vm7 = vmmov %vm9622_vm1  ;;  %vm9627_vm1 = vcmask 408576   ;;  %v2975_v57 = vrot.slane %v2970_v13, 4  ;;  %s9633_s14 = smov 20  }
 0x29e   : > { %1869 = vrot.lane.b32.xlu1 %v8235_v34, %s9588_s20  ;;  %v1744_v8 = vsel %vm443_vm8, %v9623_v4, %v1740_v55 }
 0x29f   : > { %v1745_v58 = vsel %vm1742_vm4, %v7510_v44, %v1744_v8  ;;  %v1829_v18 = vpop.permute.xlu0 %1828 }
 0x2a0   : > { %v3017_v40 = vpop.permute.xlu1 %3016  ;;  %1750 = vst [vmem:[#allocation3 + $0x120] sm:$0xcc] %v1745_v58  ;;  %v1832_v27 = vrot.slane %v1829_v18, 4  ;;  %1842 = vst.msk [vmem:[#allocation3 + $0x13c] sm:$0xc] %vm9624_vm7, %v1829_v18  ;;  %vm9629_vm7 = vcmask 254976  }
 0x2a1   : > { %2193 = vrot.lane.b32.xlu0 %v8235_v34, %s9472_s12  ;;  %s9630_s12 = smov 24  }
 0x2a2   : > { %1915 = vrot.lane.b32.xlu1 %v8249_v63, %s9625_s28  ;;  %v1835_v54 = vsel %vm443_vm8, %v9626_v46, %v1832_v27  ;;  %v3022_v27 = vrot.slane %v3017_v40, 4 }
 0x2a3   : > { %v1836_v3 = vsel %vm9627_vm1, %v7696_v60, %v1835_v54  ;;  %v8317_v20 = vpop.permute.xlu0 %2971  ;;  %v6732_v50 = vld [vmem:[#allocation3 + $0x3c4] ss:$20 sps:$4 sm:$0xff]   ;;  %v6734_v7 = vld [vmem:[#allocation3 + $0x3c0] ss:$20 sps:$4 sm:$0xff]   ;;  %v8329_v60 = vcombine.low %v7979_v38, %v7979_v38  ;;  %vm9632_vm1 = vcmask 916480  }
 0x2a4   : > { %v3064_v44 = vpop.permute.xlu1 %3063  ;;  %1841 = vst [vmem:[#allocation3 + $0x134] sm:$0xcc] %v1836_v3  ;;  %v9477_v55 = vrot.slane %v8317_v20, 4  ;;  %5875 = vmatprep.subr.bf16.mxu1 %v6732_v50 }
 0x2a5   : > { %1871 = vrot.lane.b32.xlu0 %v8263_v23, %s9588_s20  ;;  %9628 = vst [vmem:[#allocation38_spill] sm:$0xff] %v8329_v60  ;;  %5876 = vmatpush2.bf16.msra.mxu1 %v6734_v7  ;;  %v8342_v54 = vld.sshfl [vmem:[#allocation2 + $0x10] sm:$0x33 pattern:$0x76325410] }
 0x2a6   : > { %1960 = vrot.lane.b32.xlu1 %v8235_v34, %s9604_s13  ;;  %v2978_v4 = vsel %vm443_vm8, %v2975_v57, %v9477_v55 }
 0x2a7   : > { %v2980_v8 = vsel %vm2979_vm10, %v2970_v13, %v2978_v4  ;;  %v8332_v18 = vpop.permute.xlu0 %3018  ;;  %v3069_v4 = vrot.slane %v3064_v44, 4 }
 0x2a8   : > { %v3112_v58 = vpop.permute.xlu1 %3111  ;;  %2986 = vst [vmem:[#allocation3 + $0x230] sm:$0x33] %v2980_v8  ;;  %v9476_v46 = vrot.slane %v8332_v18, 4  ;;  %5878 = vmatmul.mubr.bf16.vlgmr.msra.gmra.mxu1 %v8329_v60 }
 0x2a9   : > { %1917 = vrot.lane.b32.xlu0 %v8235_v34, %s9625_s28 }
 0x2aa   : > { %2006 = vrot.lane.b32.xlu1 %v8249_v63, %s9606_s29  ;;  %v3025_v38 = vsel %vm443_vm8, %v3022_v27, %v9476_v46  ;;  %v6739_v27 = vld [vmem:[#allocation2 + $0x10] ss:$0 sps:$4 sm:$0xff]  }
 0x2ab   : > { %v3027_v13 = vsel %vm9497_vm5, %v3017_v40, %v3025_v38  ;;  %v8346_v50 = vpop.permute.xlu0 %3065  ;;  %v6736_v7 = vld [vmem:[#allocation3 + $0x120] ss:$20 sps:$4 sm:$0xff]   ;;  %v6738_v57 = vld [vmem:[#allocation3 + $0x124] ss:$20 sps:$4 sm:$0xff]   ;;  %v9631_v40 = vrot.slane %v7751_v28, 4  ;;  %vm9652_vm5 = vcmask 254976  }
 0x2ac   : > { %v1506_v3 = vpop.permute.xlu1 %1505  ;;  %3034 = vst [vmem:[#allocation3 + $0x230] sm:$0xcc] %v3027_v13  ;;  %v9487_v8 = vrot.slane %v8346_v50, 4  ;;  %5886 = vmatprep.subr.bf16.mxu1 %v6738_v57 }
 0x2ad   : > { %v1509_v63 = vrot.slane %v1506_v3, 4  ;;  %1519 = vst.msk [vmem:[#allocation3 + $0x100] sm:$0x3] %vm9629_vm7, %v1506_v3  ;;  %1962 = vrot.lane.b32.xlu0 %v8263_v23, %s9604_s13  ;;  %5887 = vmatpush1.bf16.msra.mxu1 %v6736_v7  ;;  %v3117_v23 = vrot.slane %v3112_v58, 4  ;;  %v9634_v7 = vrot.slane %v7773_v53, 4 }
 0x2ae   : > { %4639 = vrot.lane.b32.xlu1 %v8342_v54, %s9630_s12  ;;  %v3072_v13 = vsel %vm443_vm8, %v3069_v4, %v9487_v8 }
 0x2af   : > { %v1512_v38 = vsel %vm443_vm8, %v9631_v40, %v1509_v63  ;;  %v3074_v33 = vsel %vm3073_vm2, %v3064_v44, %v3072_v13  ;;  %v8363_v46 = vpop.permute.xlu0 %3113  ;;  %v6740_v44 = vld [vmem:[#allocation2 + $0x10] ss:$0 sps:$4 sm:$0xff]   ;;  %v6741_v13 = vld [vmem:[#allocation2 + $0xe] ss:$0 sps:$4 sm:$0x33]  }
 0x2b0   : > { %v1513_v3 = vsel %vm9632_vm1, %v7751_v28, %v1512_v38  ;;  %v1597_v5 = vpop.permute.xlu1 %1596  ;;  %3081 = vst [vmem:[#allocation3 + $0x244] sm:$0x33] %v3074_v33  ;;  %v9485_v63 = vrot.slane %v8363_v46, 4  ;;  %v4681_v28 = vrot.slane %v6739_v27, %v7268_v42  ;;  %vm9635_vm1 = vcmask 883712  }
 0x2b1   : > { %1518 = vst [vmem:[#allocation3 + $0xf8] sm:$0x33] %v1513_v3  ;;  %v1600_v55 = vrot.slane %v1597_v5, 4  ;;  %1611 = vst.msk [vmem:[#allocation3 + $0x114] sm:$0x3] %vm9629_vm7, %v1597_v5  ;;  %2008 = vrot.lane.b32.xlu0 %v8235_v34, %s9606_s29  ;;  %vm9636_vm7 = vcmask 257026  }
 0x2b2   : > { %4732 = vrot.lane.b32.xlu1 %v8342_v54, %s9633_s14  ;;  %v3120_v33 = vsel %vm443_vm8, %v3117_v23, %v9485_v63  ;;  %v8378_v5 = vld.sshfl [vmem:[#allocation2 + $0xe] sm:$0x3 pattern:$0x76325410]  ;;  %v9638_v3 = vrot.slane %v7762_v24, 4 }
 0x2b3   : > { %v1604_v57 = vsel %vm443_vm8, %v9634_v7, %v1600_v55  ;;  %v3122_v40 = vsel %vm3121_vm15, %v3112_v58, %v3120_v33  ;;  %v1552_v34 = vpop.permute.xlu0 %1551  ;;  %v4774_v55 = vrot.slane %v6740_v44, %v7268_v42  ;;  %v6745_v44 = vld [vmem:[#allocation2 + $0xe] ss:$0 sps:$4 sm:$0x33]   ;;  %v9641_v33 = vrot.slane %v7784_v35, 4 }
 0x2b4   : > { %v1605_v4 = vsel %vm9635_vm1, %v7773_v53, %v1604_v57  ;;  %v2788_v38 = vpop.permute.xlu1 %2787  ;;  %3129 = vst [vmem:[#allocation3 + $0x244] sm:$0xcc] %v3122_v40  ;;  %v1555_v27 = vrot.slane %v1552_v34, 4  ;;  %1565 = vst.msk [vmem:[#allocation3 + $0x100] sm:$0xc] %vm9636_vm7, %v1552_v34  ;;  %vm9639_vm1 = vcmask 900096  }
 0x2b5   : > { %1610 = vst [vmem:[#allocation3 + $0x10c] sm:$0x33] %v1605_v4  ;;  %4686 = vrot.lane.b32.xlu0 %v4681_v28, %s9637_s23  ;;  %v3203_v28 = vrot.slane %v6741_v13, %v7268_v42  ;;  %v8401_v40 = vld.sshfl [vmem:[#allocation2 + $0x10] sm:$0x3 pattern:$0x76325410] }
 0x2b6   : > { %3162 = vrot.lane.b32.xlu1 %v8378_v5, %s9482_s27  ;;  %v1558_v53 = vsel %vm443_vm8, %v9638_v3, %v1555_v27  ;;  %s9640_s27 = smov 18   ;;  %v8408_v13 = vld [vmem:[#allocation7] sm:$0xff] }
 0x2b7   : > { %v1559_v58 = vsel %vm9639_vm1, %v7762_v24, %v1558_v53  ;;  %v1644_v7 = vpop.permute.xlu0 %1643  ;;  %vm9642_vm1 = vcmask 867328  }
 0x2b8   : > { %v2834_v23 = vpop.permute.xlu1 %2833  ;;  %1564 = vst [vmem:[#allocation3 + $0xf8] sm:$0xcc] %v1559_v58  ;;  %v1647_v57 = vrot.slane %v1644_v7, 4  ;;  %1658 = vst.msk [vmem:[#allocation3 + $0x114] sm:$0xc] %vm9636_vm7, %v1644_v7  ;;  %v2793_v58 = vrot.slane %v2788_v38, 4  ;;  %v3294_v7 = vrot.slane %v6745_v44, %v7268_v42 }
 0x2b9   : > { %4779 = vrot.lane.b32.xlu0 %v4774_v55, %s9640_s27  ;;  %vm2061_vm7 = vcmask 326656  }
 0x2ba   : > { %3253 = vrot.lane.b32.xlu1 %v8378_v5, %s9611_s11  ;;  %v1651_v4 = vsel %vm443_vm8, %v9641_v33, %v1647_v57  ;;  %v8416_v57 = vcombine.high %v8408_v13, %v8408_v13 }
 0x2bb   : > { %v1652_v24 = vsel %vm9642_vm1, %v7784_v35, %v1651_v4  ;;  %v8405_v27 = vpop.permute.xlu0 %2789  ;;  %v6742_v3 = vld [vmem:[#allocation3 + $0x234] ss:$20 sps:$4 sm:$0xff]   ;;  %v6744_v53 = vld [vmem:[#allocation3 + $0x230] ss:$20 sps:$4 sm:$0xff]   ;;  %vm9558_vm1 = vcmask 310272  }
 0x2bc   : > { %v2879_v34 = vpop.permute.xlu1 %2878  ;;  %1657 = vst [vmem:[#allocation3 + $0x10c] sm:$0xcc] %v1652_v24  ;;  %v9486_v55 = vrot.slane %v8405_v27, 4  ;;  %v6746_v35 = vld [vmem:[#allocation2 + $0x10] ss:$0 sps:$4 sm:$0x33]   ;;  %5822 = vmatprep.subr.bf16.mxu0 %v6742_v3  ;;  %5836 = vmatprep.mubr.bf16.mxu0 %v8416_v57 }
 0x2bd   : > { %3208 = vrot.lane.b32.xlu0 %v3203_v28, %s9644_s0  ;;  %9645 = vst [vmem:[#allocation39_spill] sm:$0xff] %v8416_v57  ;;  %5823 = vmatpush2.bf16.msra.mxu0 %v6744_v53  ;;  %v2839_v28 = vrot.slane %v2834_v23, 4  ;;  %v6750_v3 = vld [vmem:[#allocation2 + $0x10] ss:$0 sps:$4 sm:$0xff]   ;;  %v2884_v60 = vrot.slane %v2879_v34, 4 }
 0x2be   : > { %4453 = vrot.lane.b32.xlu1 %v8401_v40, %s9643_s21  ;;  %v2796_v33 = vsel %vm443_vm8, %v2793_v58, %v9486_v55  ;;  %5918 = vmatprep.mubr.bf16.mxu1 %v8416_v57  ;;  %s9646_s21 = smov 28   ;;  %v8434_v58 = vld.sshfl [vmem:[#allocation2 + $0xc] sm:$0x3 pattern:$0x76325410] }
 0x2bf   : > { %v2797_v4 = vsel %vm2061_vm7, %v2788_v38, %v2796_v33  ;;  %v8422_v63 = vpop.permute.xlu0 %2835  ;;  %v4495_v38 = vrot.slane %v6746_v35, %v7268_v42  ;;  %v4588_v35 = vrot.slane %v6750_v3, %v7268_v42  ;;  %v6751_v3 = vld [vmem:[#allocation2 + $0xc] ss:$0 sps:$4 sm:$0xff]  }
 0x2c0   : > { %v2925_v24 = vpop.permute.xlu1 %2924  ;;  %2803 = vst [vmem:[#allocation3 + $0x208] sm:$0x33] %v2797_v4  ;;  %v9492_v44 = vrot.slane %v8422_v63, 4 }
 0x2c1   : > { %3299 = vrot.lane.b32.xlu0 %v3294_v7, %s9613_s6  ;;  %v2930_v49 = vrot.slane %v2925_v24, 4 }
 0x2c2   : > { %4546 = vrot.lane.b32.xlu1 %v8342_v54, %s9646_s21  ;;  %v2842_v53 = vsel %vm443_vm8, %v2839_v28, %v9492_v44 }
 0x2c3   : > { %v2843_v33 = vsel %vm9558_vm1, %v2834_v23, %v2842_v53  ;;  %v8437_v55 = vpop.permute.xlu0 %2880  ;;  %v6747_v8 = vld [vmem:[#allocation3 + $0xf8] ss:$20 sps:$4 sm:$0xff]   ;;  %v6749_v57 = vld [vmem:[#allocation3 + $0xfc] ss:$20 sps:$4 sm:$0xff]   ;;  %v9650_v23 = vrot.slane %v7839_v11, 4 }
 0x2c4   : > { %v1324_v4 = vpop.permute.xlu1 %1323  ;;  %2849 = vst [vmem:[#allocation3 + $0x208] sm:$0xcc] %v2843_v33  ;;  %v9508_v7 = vrot.slane %v8437_v55, 4  ;;  %5888 = vmatprep.subr.bf16.mxu1 %v6749_v57 }
 0x2c5   : > { %v1327_v54 = vrot.slane %v1324_v4, 4  ;;  %1337 = vst.msk [vmem:[#allocation3 + $0xd8] sm:$0x3] %vm9647_vm3, %v1324_v4  ;;  %4500 = vrot.lane.b32.xlu0 %v4495_v38, %s9649_s8  ;;  %vm9651_vm3 = vcmask 982016   ;;  %5889 = vmatpush1.bf16.msra.mxu1 %v6747_v8  ;;  %s9653_s8 = smov 26  }
 0x2c6   : > { %2973 = vrot.lane.b32.xlu1 %v8434_v58, %s9648_s1  ;;  %v2887_v53 = vsel %vm443_vm8, %v2884_v60, %v9508_v7  ;;  %v6343_v38 = vld.sshfl [vmem:[#allocation2 + $0xc] sm:$0x33 pattern:$0x76325410] }
 0x2c7   : > { %v1330_v28 = vsel %vm443_vm8, %v9650_v23, %v1327_v54  ;;  %v2888_v4 = vsel %vm2154_vm11, %v2879_v34, %v2887_v53  ;;  %v8454_v62 = vpop.permute.xlu0 %2926  ;;  %v3015_v53 = vrot.slane %v6751_v3, %v7268_v42 }
 0x2c8   : > { %v1331_v33 = vsel %vm9651_vm3, %v7839_v11, %v1330_v28  ;;  %v1415_v44 = vpop.permute.xlu1 %1414  ;;  %2894 = vst [vmem:[#allocation3 + $0x21c] sm:$0x33] %v2888_v4  ;;  %v9507_v60 = vrot.slane %v8454_v62, 4  ;;  %v9654_v11 = vrot.slane %v7861_v25, 4  ;;  %vm9655_vm3 = vcmask 949248  }
 0x2c9   : > { %1336 = vst [vmem:[#allocation3 + $0xd0] sm:$0x33] %v1331_v33  ;;  %v1418_v54 = vrot.slane %v1415_v44, 4  ;;  %1428 = vst.msk [vmem:[#allocation3 + $0xec] sm:$0x3] %vm9652_vm5, %v1415_v44  ;;  %4593 = vrot.lane.b32.xlu0 %v4588_v35, %s9653_s8  ;;  %vm9656_vm5 = vcmask 257026  }
 0x2ca   : > { %3067 = vrot.lane.b32.xlu1 %v6343_v38, %s9646_s21  ;;  %v2933_v34 = vsel %vm443_vm8, %v2930_v49, %v9507_v60  ;;  %v6752_v33 = vld [vmem:[#allocation2 + $0xc] ss:$0 sps:$4 sm:$0xff]   ;;  %v6753_v49 = vld [vmem:[#allocation2 + $0x10] ss:$0 sps:$4 sm:$0x33]  }
 0x2cb   : > { %v1421_v8 = vsel %vm443_vm8, %v9654_v11, %v1418_v54  ;;  %v2934_v23 = vsel %vm9557_vm13, %v2925_v24, %v2933_v34  ;;  %v1370_v28 = vpop.permute.xlu0 %1369  ;;  %v3110_v54 = vrot.slane %v6752_v33, %v7268_v42  ;;  %v6757_v34 = vld [vmem:[#allocation2 + $0x10] ss:$0 sps:$4 sm:$0x33]  }
 0x2cc   : > { %v1422_v57 = vsel %vm9655_vm3, %v7861_v25, %v1421_v8  ;;  %v2604_v44 = vpop.permute.xlu1 %2603  ;;  %2940 = vst [vmem:[#allocation3 + $0x21c] sm:$0xcc] %v2934_v23  ;;  %v1373_v35 = vrot.slane %v1370_v28, 4  ;;  %1383 = vst.msk [vmem:[#allocation3 + $0xd8] sm:$0xc] %vm9656_vm5, %v1370_v28  ;;  %v9659_v25 = vrot.slane %v7850_v9, 4  ;;  %v4310_v8 = vrot.slane %v6753_v49, %v7268_v42 }
 0x2cd   : > { %1427 = vst [vmem:[#allocation3 + $0xe4] sm:$0x33] %v1422_v57  ;;  %3020 = vrot.lane.b32.xlu0 %v3015_v53, %s9658_s16  ;;  %vm9660_vm3 = vcmask 965632   ;;  %v9662_v57 = vrot.slane %v7872_v45, 4  ;;  %v4402_v49 = vrot.slane %v6757_v34, %v7268_v42 }
 0x2ce   : > { %4269 = vrot.lane.b32.xlu1 %v8401_v40, %s9657_s17  ;;  %v1376_v24 = vsel %vm443_vm8, %v9659_v25, %v1373_v35  ;;  %v2609_v25 = vrot.slane %v2604_v44, 4  ;;  %v6762_v34 = vld [vmem:[#allocation2 + $0xc] ss:$0 sps:$4 sm:$0x33]  }
 0x2cf   : > { %v1377_v4 = vsel %vm9660_vm3, %v7850_v9, %v1376_v24  ;;  %v1461_v3 = vpop.permute.xlu0 %1460  ;;  %vm9663_vm3 = vcmask 932864  }
 0x2d0   : > { %v2651_v38 = vpop.permute.xlu1 %2650  ;;  %1382 = vst [vmem:[#allocation3 + $0xd0] sm:$0xcc] %v1377_v4  ;;  %v1464_v11 = vrot.slane %v1461_v3, 4  ;;  %1474 = vst.msk [vmem:[#allocation3 + $0xec] sm:$0xc] %vm9656_vm5, %v1461_v3  ;;  %vm9668_vm5 = vcmask 254976  }
 0x2d1   : > { %3115 = vrot.lane.b32.xlu0 %v3110_v54, %s9653_s8 }
 0x2d2   : > { %4360 = vrot.lane.b32.xlu1 %v8401_v40, %s9661_s26  ;;  %v1467_v9 = vsel %vm443_vm8, %v9662_v57, %v1464_v11  ;;  %s9664_s26 = smov 40   ;;  %v6758_v11 = vld [vmem:[#allocation2 + $0xc] ss:$0 sps:$4 sm:$0x33]   ;;  %v2656_v57 = vrot.slane %v2651_v38, 4 }
 0x2d3   : > { %v1468_v23 = vsel %vm9663_vm3, %v7872_v45, %v1467_v9  ;;  %v8490_v53 = vpop.permute.xlu0 %2605  ;;  %v6754_v33 = vld [vmem:[#allocation3 + $0x20c] ss:$20 sps:$4 sm:$0xff]   ;;  %v6756_v35 = vld [vmem:[#allocation3 + $0x208] ss:$20 sps:$4 sm:$0xff]   ;;  %vm9672_vm3 = vcmask 359424  }
 0x2d4   : > { %v2697_v28 = vpop.permute.xlu1 %2696  ;;  %1473 = vst [vmem:[#allocation3 + $0xe4] sm:$0xcc] %v1468_v23  ;;  %v9505_v24 = vrot.slane %v8490_v53, 4  ;;  %5824 = vmatprep.subr.bf16.mxu0 %v6754_v33 }
 0x2d5   : > { %4315 = vrot.lane.b32.xlu0 %v4310_v8, %s9665_s18  ;;  %5825 = vmatpush2.bf16.msra.mxu0 %v6756_v35  ;;  %v2832_v35 = vrot.slane %v6758_v11, %v7268_v42 }
 0x2d6   : > { %2791 = vrot.lane.b32.xlu1 %v8434_v58, %s9664_s26  ;;  %v2612_v45 = vsel %vm443_vm8, %v2609_v25, %v9505_v24 }
 0x2d7   : > { %v2614_v4 = vsel %vm2613_vm0, %v2604_v44, %v2612_v45  ;;  %v8501_v54 = vpop.permute.xlu0 %2652 }
 0x2d8   : > { %v2743_v3 = vpop.permute.xlu1 %2742  ;;  %2620 = vst [vmem:[#allocation3 + $0x1e0] sm:$0x33] %v2614_v4  ;;  %v9506_v9 = vrot.slane %v8501_v54, 4  ;;  %v2702_v4 = vrot.slane %v2697_v28, 4 }
 0x2d9   : > { %4407 = vrot.lane.b32.xlu0 %v4402_v49, %s9667_s15  ;;  %s9669_s15 = smov 96   ;;  %v2748_v7 = vrot.slane %v2743_v3, 4 }
 0x2da   : > { %2882 = vrot.lane.b32.xlu1 %v8434_v58, %s9666_s22  ;;  %v2659_v8 = vsel %vm443_vm8, %v2656_v57, %v9506_v9  ;;  %v9671_v57 = vrot.slane %v7930_v52, 4 }
 0x2db   : > { %v2661_v44 = vsel %vm9512_vm14, %v2651_v38, %v2659_v8  ;;  %v8511_v33 = vpop.permute.xlu0 %2698  ;;  %v6759_v25 = vld [vmem:[#allocation3 + $0xd0] ss:$20 sps:$4 sm:$0xff]   ;;  %v6761_v45 = vld [vmem:[#allocation3 + $0xd4] ss:$20 sps:$4 sm:$0xff]  }
 0x2dc   : > { %v1231_v23 = vpop.permute.xlu1 %1230  ;;  %2667 = vst [vmem:[#allocation3 + $0x1e0] sm:$0xcc] %v2661_v44  ;;  %v9517_v49 = vrot.slane %v8511_v33, 4  ;;  %v6763_v38 = vld [vmem:[#allocation2 + $0x10] ss:$0 sps:$4 sm:$0x33]   ;;  %5890 = vmatprep.subr.bf16.mxu1 %v6761_v45 }
 0x2dd   : > { %v1234_v24 = vrot.slane %v1231_v23, 4  ;;  %1245 = vst.msk [vmem:[#allocation3 + $0xc4] sm:$0x3] %vm9668_vm5, %v1231_v23  ;;  %2837 = vrot.lane.b32.xlu0 %v2832_v35, %s9670_s4  ;;  %vm9673_vm5 = vmmov %vm9672_vm3  ;;  %5891 = vmatpush1.bf16.msra.mxu1 %v6759_v25  ;;  %v2923_v35 = vrot.slane %v6762_v34, %v7268_v42  ;;  %v6764_v45 = vld [vmem:[#allocation2 + $0x10] ss:$0 sps:$4 sm:$0x33]  }
 0x2de   : > { %4087 = vrot.lane.b32.xlu1 %v8401_v40, %s9669_s15  ;;  %v2705_v11 = vsel %vm443_vm8, %v2702_v4, %v9517_v49 }
 0x2df   : > { %v1238_v8 = vsel %vm443_vm8, %v9671_v57, %v1234_v24  ;;  %v2706_v23 = vsel %vm9673_vm5, %v2697_v28, %v2705_v11  ;;  %v8528_v60 = vpop.permute.xlu0 %2744  ;;  %vm9677_vm5 = vcmask 257026  }
 0x2e0   : > { %v1239_v44 = vsel %vm9672_vm3, %v7930_v52, %v1238_v8  ;;  %v2420_v9 = vpop.permute.xlu1 %2419  ;;  %2712 = vst [vmem:[#allocation3 + $0x1f4] sm:$0x33] %v2706_v23  ;;  %v9516_v24 = vrot.slane %v8528_v60, 4  ;;  %v4128_v52 = vrot.slane %v6763_v38, %v7268_v42  ;;  %vm9676_vm3 = vcmask 343040  }
 0x2e1   : > { %1244 = vst [vmem:[#allocation3 + $0xbc] sm:$0x33] %v1239_v44  ;;  %2928 = vrot.lane.b32.xlu0 %v2923_v35, %s9675_s2  ;;  %v9679_v38 = vrot.slane %v7941_v22, 4  ;;  %vm9680_vm14 = vmmov %vm9676_vm3  ;;  %v6765_v44 = vld [vmem:[#allocation2 + $0xc] ss:$0 sps:$4 sm:$0x33]  }
 0x2e2   : > { %4178 = vrot.lane.b32.xlu1 %v8401_v40, %s9674_s3  ;;  %v2751_v28 = vsel %vm443_vm8, %v2748_v7, %v9516_v24  ;;  %v4219_v40 = vrot.slane %v6764_v45, %v7268_v42  ;;  %v2425_v23 = vrot.slane %v2420_v9, 4 }
 0x2e3   : > { %v2752_v25 = vsel %vm9676_vm3, %v2743_v3, %v2751_v28  ;;  %v1278_v4 = vpop.permute.xlu0 %1277  ;;  %v8559_v28 = vld.sshfl [vmem:[#allocation2 + $0xe] sm:$0x33 pattern:$0x76325410]  ;;  %vm9688_vm3 = vcmask 900096  }
 0x2e4   : > { %v2466_v34 = vpop.permute.xlu1 %2465  ;;  %2758 = vst [vmem:[#allocation3 + $0x1f4] sm:$0xcc] %v2752_v25  ;;  %v1281_v57 = vrot.slane %v1278_v4, 4  ;;  %1292 = vst.msk [vmem:[#allocation3 + $0xc4] sm:$0xc] %vm9677_vm5, %v1278_v4  ;;  %vm9689_vm5 = vcmask 883712  }
 0x2e5   : > { %4133 = vrot.lane.b32.xlu0 %v4128_v52, %s9678_s9  ;;  %v6769_v52 = vld [vmem:[#allocation2 + $0xc] ss:$0 sps:$4 sm:$0x33]  }
 0x2e6   : > { %2607 = vrot.lane.b32.xlu1 %v8434_v58, %s9669_s15  ;;  %v1285_v8 = vsel %vm443_vm8, %v9679_v38, %v1281_v57  ;;  %v2649_v57 = vrot.slane %v6765_v44, %v7268_v42 }
 0x2e7   : > { %v1286_v7 = vsel %vm9680_vm14, %v7941_v22, %v1285_v8  ;;  %v8550_v11 = vpop.permute.xlu0 %2421  ;;  %vm9686_vm14 = vcmask 916480  }
 0x2e8   : > { %v2511_v3 = vpop.permute.xlu1 %2510  ;;  %1291 = vst [vmem:[#allocation3 + $0xbc] sm:$0xcc] %v1286_v7  ;;  %v9515_v35 = vrot.slane %v8550_v11, 4  ;;  %v2471_v7 = vrot.slane %v2466_v34, 4 }
 0x2e9   : > { %4224 = vrot.lane.b32.xlu0 %v4219_v40, %s9681_s19  ;;  %v2516_v19 = vrot.slane %v2511_v3, 4 }
 0x2ea   : > { %2700 = vrot.lane.b32.xlu1 %v8434_v58, %s9604_s13  ;;  %v2428_v45 = vsel %vm443_vm8, %v2425_v23, %v9515_v35  ;;  %v6776_v23 = vld [vmem:[#allocation2 + $0xe] ss:$0 sps:$4 sm:$0xff]  }
 0x2eb   : > { %v2429_v22 = vsel %vm1695_vm9, %v2420_v9, %v2428_v45  ;;  %v8562_v4 = vpop.permute.xlu0 %2467  ;;  %v6766_v38 = vld [vmem:[#allocation3 + $0x1e4] ss:$20 sps:$4 sm:$0xff]   ;;  %v6768_v8 = vld [vmem:[#allocation3 + $0x1e0] ss:$20 sps:$4 sm:$0xff]  }
 0x2ec   : > { %v2558_v25 = vpop.permute.xlu1 %2557  ;;  %9682 = vst [vmem:[#allocation40_spill] sm:$0xff] %v8562_v4  ;;  %2435 = vst [vmem:[#allocation3 + $0x1b8] sm:$0x33] %v2429_v22  ;;  %v9520_v40 = vrot.slane %v8562_v4, 4  ;;  %5826 = vmatprep.subr.bf16.mxu0 %v6766_v38  ;;  %v2741_v22 = vrot.slane %v6769_v52, %v7268_v42  ;;  %v3940_v38 = vrot.slane %v6776_v23, %v7268_v42  ;;  %v6775_v52 = vld [vmem:[#allocation3 + $0x84] ss:$20 sps:$4 sm:$0xff]  }
 0x2ed   : > { %2654 = vrot.lane.b32.xlu0 %v2649_v57, %s9678_s9  ;;  %5827 = vmatpush2.bf16.msra.mxu0 %v6768_v8 }
 0x2ee   : > { %3897 = vrot.lane.b32.xlu1 %v8559_v28, %s9630_s12  ;;  %v2474_v9 = vsel %vm443_vm8, %v2471_v7, %v9520_v40  ;;  %v2563_v40 = vrot.slane %v2558_v25, 4  ;;  %s9684_s12 = smov 104  }
 0x2ef   : > { %v2475_v45 = vsel %vm1742_vm4, %v2466_v34, %v2474_v9  ;;  %v8573_v35 = vpop.permute.xlu0 %2512  ;;  %v6770_v24 = vld [vmem:[#allocation3 + $0xa8] ss:$20 sps:$4 sm:$0xff]   ;;  %v6772_v49 = vld [vmem:[#allocation3 + $0xac] ss:$20 sps:$4 sm:$0xff]   ;;  %v6780_v34 = vld [vmem:[#allocation2 + $0xe] ss:$0 sps:$4 sm:$0xff]  }
 0x2f0   : > { %v2238_v44 = vpop.permute.xlu1 %2237  ;;  %2481 = vst [vmem:[#allocation3 + $0x1b8] sm:$0xcc] %v2475_v45  ;;  %v9523_v57 = vrot.slane %v8573_v35, 4  ;;  %5892 = vmatprep.subr.bf16.mxu1 %v6772_v49 }
 0x2f1   : > { %2746 = vrot.lane.b32.xlu0 %v2741_v22, %s9606_s29  ;;  %5893 = vmatpush1.bf16.msra.mxu1 %v6770_v24  ;;  %v6773_v22 = vld [vmem:[#allocation3 + $0x80] ss:$20 sps:$4 sm:$0xff]   ;;  %v6779_v24 = vld [vmem:[#allocation3 + $0x5c] ss:$20 sps:$4 sm:$0xff]  }
 0x2f2   : > { %3992 = vrot.lane.b32.xlu1 %v8559_v28, %s9633_s14  ;;  %v2519_v8 = vsel %vm443_vm8, %v2516_v19, %v9523_v57  ;;  %5894 = vmatprep.subr.bf16.mxu1 %v6775_v52  ;;  %v4035_v19 = vrot.slane %v6780_v34, %v7268_v42  ;;  %v6784_v52 = vld [vmem:[#allocation2 + $0xc] ss:$0 sps:$4 sm:$0x33]  }
 0x2f3   : > { %v2521_v7 = vsel %vm2520_vm6, %v2511_v3, %v2519_v8  ;;  %v8585_v45 = vpop.permute.xlu0 %2559 }
 0x2f4   : > { %v2284_v9 = vpop.permute.xlu1 %2283  ;;  %9683 = vst [vmem:[#allocation41_spill] sm:$0xff] %v8585_v45  ;;  %2527 = vst [vmem:[#allocation3 + $0x1cc] sm:$0x33] %v2521_v7  ;;  %v9524_v31 = vrot.slane %v8585_v45, 4  ;;  %v2243_v7 = vrot.slane %v2238_v44, 4 }
 0x2f5   : > { %3945 = vrot.lane.b32.xlu0 %v3940_v38, %s9637_s23  ;;  %5895 = vmatpush1.bf16.msra.mxu1 %v6773_v22  ;;  %v6777_v38 = vld [vmem:[#allocation3 + $0x58] ss:$20 sps:$4 sm:$0xff]  }
 0x2f6   : > { %2423 = vrot.lane.b32.xlu1 %v8434_v58, %s9684_s12  ;;  %v2566_v49 = vsel %vm443_vm8, %v2563_v40, %v9524_v31  ;;  %5896 = vmatprep.subr.bf16.mxu1 %v6779_v24  ;;  %v6783_v40 = vld [vmem:[#allocation3 + $0x34] ss:$20 sps:$4 sm:$0xff]   ;;  %v6788_v24 = vld [vmem:[#allocation2 + $0xc] ss:$0 sps:$4 sm:$0x33]   ;;  %v2289_v31 = vrot.slane %v2284_v9, 4 }
 0x2f7   : > { %v2568_v3 = vsel %vm2567_vm12, %v2558_v25, %v2566_v49  ;;  %v8596_v8 = vpop.permute.xlu0 %2239 }
 0x2f8   : > { %v2329_v23 = vpop.permute.xlu1 %2328  ;;  %9685 = vst [vmem:[#allocation42_spill] sm:$0xff] %v8596_v8  ;;  %2574 = vst [vmem:[#allocation3 + $0x1cc] sm:$0xcc] %v2568_v3  ;;  %v9527_v57 = vrot.slane %v8596_v8, 4  ;;  %v2464_v3 = vrot.slane %v6784_v52, %v7268_v42 }
 0x2f9   : > { %4040 = vrot.lane.b32.xlu0 %v4035_v19, %s9640_s27  ;;  %5897 = vmatpush1.bf16.msra.mxu1 %v6777_v38  ;;  %v6781_v19 = vld [vmem:[#allocation3 + $0x30] ss:$20 sps:$4 sm:$0xff]   ;;  %v6787_v38 = vld [vmem:[#allocation3 + $0xc] ss:$20 sps:$4 sm:$0xff]   ;;  %v2334_v4 = vrot.slane %v2329_v23, 4 }
 0x2fa   : > { %2514 = vrot.lane.b32.xlu1 %v8434_v58, %s9611_s11  ;;  %v2246_v25 = vsel %vm443_vm8, %v2243_v7, %v9527_v57  ;;  %5898 = vmatprep.subr.bf16.mxu1 %v6783_v40  ;;  %v6792_v7 = vld [vmem:[#allocation2 + $0xe] ss:$0 sps:$4 sm:$0xff]   ;;  %v2556_v40 = vrot.slane %v6788_v24, %v7268_v42 }
 0x2fb   : > { %v2247_v34 = vsel %vm9686_vm14, %v2238_v44, %v2246_v25  ;;  %v8606_v49 = vpop.permute.xlu0 %2285  ;;  %vm9691_vm14 = vcmask 867328  }
 0x2fc   : > { %v2375_v22 = vpop.permute.xlu1 %2374  ;;  %9687 = vst [vmem:[#allocation43_spill] sm:$0xff] %v8606_v49  ;;  %2253 = vst [vmem:[#allocation3 + $0x190] sm:$0x33] %v2247_v34  ;;  %v9536_v45 = vrot.slane %v8606_v49, 4 }
 0x2fd   : > { %2469 = vrot.lane.b32.xlu0 %v2464_v3, %s9644_s0  ;;  %5899 = vmatpush1.bf16.msra.mxu1 %v6781_v19  ;;  %s9715_s0 = smov 16  }
 0x2fe   : > { %3712 = vrot.lane.b32.xlu1 %v8378_v5, %s9648_s1  ;;  %v2292_v44 = vsel %vm443_vm8, %v2289_v31, %v9536_v45  ;;  %5900 = vmatprep.subr.bf16.mxu1 %v6787_v38  ;;  %v3753_v31 = vrot.slane %v6792_v7, %v7268_v42  ;;  %v2380_v38 = vrot.slane %v2375_v22, 4  ;;  %s9723_s1 = smov 12  }
 0x2ff   : > { %v2293_v52 = vsel %vm9688_vm3, %v2284_v9, %v2292_v44  ;;  %v8617_v34 = vpop.permute.xlu0 %2330  ;;  %v6789_v57 = vld [vmem:[#allocation3 + $0x1bc] ss:$20 sps:$4 sm:$0xff]   ;;  %v6791_v8 = vld [vmem:[#allocation3 + $0x1b8] ss:$20 sps:$4 sm:$0xff]   ;;  %vm9697_vm3 = vcmask 392192  }
 0x300   : > { %v2052_v25 = vpop.permute.xlu1 %2051  ;;  %2299 = vst [vmem:[#allocation3 + $0x190] sm:$0xcc] %v2293_v52  ;;  %v9537_v3 = vrot.slane %v8617_v34, 4  ;;  %v6793_v9 = vld [vmem:[#allocation2 + $0xe] ss:$0 sps:$4 sm:$0xff]   ;;  %5828 = vmatprep.subr.bf16.mxu0 %v6789_v57 }
 0x301   : > { %2561 = vrot.lane.b32.xlu0 %v2556_v40, %s9613_s6  ;;  %5829 = vmatpush2.bf16.msra.mxu0 %v6791_v8  ;;  %v3846_v7 = vrot.slane %v6793_v9, %v7268_v42  ;;  %v2057_v40 = vrot.slane %v2052_v25, 4 }
 0x302   : > { %3804 = vrot.lane.b32.xlu1 %v8559_v28, %s9646_s21  ;;  %v2337_v24 = vsel %vm443_vm8, %v2334_v4, %v9537_v3  ;;  %5901 = vmatpush1.bf16.msra.mxu1 %v6785_v37  ;;  %v6794_v37 = vld [vmem:[#allocation2 + $0xc] ss:$0 sps:$4 sm:$0x33]  }
 0x303   : > { %v2338_v19 = vsel %vm9689_vm5, %v2329_v23, %v2337_v24  ;;  %v8629_v52 = vpop.permute.xlu0 %2376  ;;  %vm9698_vm5 = vcmask 375808  }
 0x304   : > { %v2099_v44 = vpop.permute.xlu1 %2098  ;;  %9690 = vst [vmem:[#allocation44_spill] sm:$0xff] %v8629_v52  ;;  %2344 = vst [vmem:[#allocation3 + $0x1a4] sm:$0x33] %v2338_v19  ;;  %v9534_v28 = vrot.slane %v8629_v52, 4 }
 0x305   : > { %3758 = vrot.lane.b32.xlu0 %v3753_v31, %s9658_s16  ;;  %s9735_s16 = smov 10  }
 0x306   : > { %2241 = vrot.lane.b32.xlu1 %v8434_v58, %s9590_s10  ;;  %v2383_v4 = vsel %vm443_vm8, %v2380_v38, %v9534_v28  ;;  %v2282_v38 = vrot.slane %v6794_v37, %v7268_v42 }
 0x307   : > { %v2384_v57 = vsel %vm9691_vm14, %v2375_v22, %v2383_v4  ;;  %v8640_v8 = vpop.permute.xlu0 %2053  ;;  %v6795_v4 = vld [vmem:[#allocation2 + $0xc] ss:$0 sps:$4 sm:$0x33]   ;;  %vm9700_vm14 = vcmask 195584  }
 0x308   : > { %v2145_v23 = vpop.permute.xlu1 %2144  ;;  %9692 = vst [vmem:[#allocation45_spill] sm:$0xff] %v8640_v8  ;;  %2390 = vst [vmem:[#allocation3 + $0x1a4] sm:$0xcc] %v2384_v57  ;;  %v9535_v24 = vrot.slane %v8640_v8, 4  ;;  %v2104_v57 = vrot.slane %v2099_v44, 4  ;;  %v2373_v37 = vrot.slane %v6795_v4, %v7268_v42 }
 0x309   : > { %3851 = vrot.lane.b32.xlu0 %v3846_v7, %s9653_s8  ;;  %v2150_v45 = vrot.slane %v2145_v23, 4  ;;  %v8676_v8 = vld.sshfl [vmem:[#allocation2 + $0xa] sm:$0x3 pattern:$0x76325410] }
 0x30a   : > { %2332 = vrot.lane.b32.xlu1 %v8434_v58, %s9591_s5  ;;  %v2060_v31 = vsel %vm443_vm8, %v2057_v40, %v9535_v24  ;;  %v6799_v58 = vld [vmem:[#allocation2 + $0xe] ss:$0 sps:$4 sm:$0x33]  }
 0x30b   : > { %v2062_v9 = vsel %vm2061_vm7, %v2052_v25, %v2060_v31  ;;  %v8650_v19 = vpop.permute.xlu0 %2100 }
 0x30c   : > { %v2192_v22 = vpop.permute.xlu1 %2191  ;;  %9693 = vst [vmem:[#allocation46_spill] sm:$0xff] %v8650_v19  ;;  %2068 = vst [vmem:[#allocation3 + $0x168] sm:$0x33] %v2062_v9  ;;  %v9538_v28 = vrot.slane %v8650_v19, 4 }
 0x30d   : > { %2287 = vrot.lane.b32.xlu0 %v2282_v38, %s9592_s25  ;;  %v3570_v38 = vrot.slane %v6799_v58, %v7268_v42 }
 0x30e   : > { %3528 = vrot.lane.b32.xlu1 %v8378_v5, %s9657_s17  ;;  %v2107_v25 = vsel %vm443_vm8, %v2104_v57, %v9538_v28  ;;  %v6800_v57 = vld [vmem:[#allocation2 + $0xe] ss:$0 sps:$4 sm:$0x33]   ;;  %s6309_s17 = sshll.u32 %s7234_s24, 4 }
 0x30f   : > { %v2109_v7 = vsel %vm9558_vm1, %v2099_v44, %v2107_v25  ;;  %v8661_v31 = vpop.permute.xlu0 %2146  ;;  %v6796_v9 = vld [vmem:[#allocation3 + $0x194] ss:$20 sps:$4 sm:$0xff]   ;;  %v6798_v24 = vld [vmem:[#allocation3 + $0x190] ss:$20 sps:$4 sm:$0xff]  }
 0x310   : > { %v1870_v40 = vpop.permute.xlu1 %1869  ;;  %9694 = vst [vmem:[#allocation47_spill] sm:$0xff] %v8661_v31  ;;  %2115 = vst [vmem:[#allocation3 + $0x168] sm:$0xcc] %v2109_v7  ;;  %v9544_v3 = vrot.slane %v8661_v31, 4  ;;  %5830 = vmatprep.subr.bf16.mxu0 %v6796_v9  ;;  %v2197_v7 = vrot.slane %v2192_v22, 4 }
 0x311   : > { %2378 = vrot.lane.b32.xlu0 %v2373_v37, %s9593_s30  ;;  %5831 = vmatpush2.bf16.msra.mxu0 %v6798_v24  ;;  %v6801_v9 = vld [vmem:[#allocation2 + $0xa] ss:$0 sps:$4 sm:$0x33]  }
 0x312   : > { %3621 = vrot.lane.b32.xlu1 %v8378_v5, %s9666_s22  ;;  %v2153_v44 = vsel %vm443_vm8, %v2150_v45, %v9544_v3  ;;  %v3662_v45 = vrot.slane %v6800_v57, %v7268_v42 }
 0x313   : > { %v2155_v4 = vsel %vm2154_vm11, %v2145_v23, %v2153_v44  ;;  %v8673_v28 = vpop.permute.xlu0 %2193  ;;  %v1875_v44 = vrot.slane %v1870_v40, 4 }
 0x314   : > { %v1916_v25 = vpop.permute.xlu1 %1915  ;;  %9695 = vst [vmem:[#allocation48_spill] sm:$0xff] %v8673_v28  ;;  %2161 = vst [vmem:[#allocation3 + $0x17c] sm:$0x33] %v2155_v4  ;;  %v9543_v19 = vrot.slane %v8673_v28, 4 }
 0x315   : > { %3575 = vrot.lane.b32.xlu0 %v3570_v38, %s9665_s18  ;;  %s9200_s18 = scalar_lea.vmem [#allocation9], %s6309_s17 }
 0x316   : > { %2055 = vrot.lane.b32.xlu1 %v8676_v8, %s9664_s26  ;;  %v2200_v23 = vsel %vm443_vm8, %v2197_v7, %v9543_v19  ;;  %v6802_v19 = vld [vmem:[#allocation2 + $0xa] ss:$0 sps:$4 sm:$0x33]   ;;  %s6165_s27 = sshll.u32 %s9200_s18, 4  ;;  %s6166_s27 = int_to_ptr.vmem [resolvable:$true] %s6165_s27 }
 0x317   : > { %v2202_v58 = vsel %vm9557_vm13, %v2192_v22, %v2200_v23  ;;  %v8686_v37 = vpop.permute.xlu0 %1871  ;;  %v2097_v23 = vrot.slane %v6801_v9, %v7268_v42  ;;  %v2190_v9 = vrot.slane %v6802_v19, %v7268_v42  ;;  %vm9703_vm13 = vcmask 359424   ;;  %s6944_s30 = scalar_lea.vmem %s6166_s27, 256 }
 0x318   : > { %v1961_v24 = vpop.permute.xlu1 %1960  ;;  %9696 = vst [vmem:[#allocation49_spill] sm:$0xff] %v8686_v37  ;;  %2208 = vst [vmem:[#allocation3 + $0x17c] sm:$0xcc] %v2202_v58  ;;  %v9545_v4 = vrot.slane %v8686_v37, 4  ;;  %v1921_v58 = vrot.slane %v1916_v25, 4  ;;  %p6945_p9 = scmp.ne.s32.totalorder %s6166_s27, %s6944_s30 }
 0x319   : > { %3667 = vrot.lane.b32.xlu0 %v3662_v45, %s9675_s2  ;;  %v6805_v45 = vld [vmem:[#allocation2 + $0xe] ss:$0 sps:$4 sm:$0x33]   ;;  %v1966_v31 = vrot.slane %v1961_v24, 4 }
 0x31a   : > { %2148 = vrot.lane.b32.xlu1 %v8676_v8, %s9666_s22  ;;  %v1878_v38 = vsel %vm443_vm8, %v1875_v44, %v9545_v4  ;;  %s7086_s22 = smov 76  }
 0x31b   : > { %v1879_v57 = vsel %vm9697_vm3, %v1870_v40, %v1878_v38  ;;  %v8696_v7 = vpop.permute.xlu0 %1917  ;;  %vm9701_vm3 = vmmov %vm9700_vm14 }
 0x31c   : > { %v2007_v22 = vpop.permute.xlu1 %2006  ;;  %1885 = vst [vmem:[#allocation3 + $0x140] sm:$0x33] %v1879_v57  ;;  %v9556_v3 = vrot.slane %v8696_v7, 4  ;;  %v5041_v57 = vld [vmem:[#allocation3 + $0x168] sm:$0xff] }
 0x31d   : > { %2102 = vrot.lane.b32.xlu0 %v2097_v23, %s9670_s4 }
 0x31e   : > { %3344 = vrot.lane.b32.xlu1 %v8378_v5, %s9669_s15  ;;  %v1924_v40 = vsel %vm443_vm8, %v1921_v58, %v9556_v3  ;;  %v6806_v58 = vld [vmem:[#allocation2 + $0xe] ss:$0 sps:$4 sm:$0x33]  }
 0x31f   : > { %v1925_v44 = vsel %vm9698_vm5, %v1916_v25, %v1924_v40  ;;  %v8707_v4 = vpop.permute.xlu0 %1962  ;;  %v5044_v37 = vld [vmem:[#allocation3 + $0x17c] sm:$0xff]  ;;  %v3385_v25 = vrot.slane %v6805_v45, %v7268_v42  ;;  %v9699_v40 = vrot.slane %v7707_v2, 4  ;;  %vm9702_vm5 = vcmask 254976  }
 0x320   : > { %v4640_v38 = vpop.permute.xlu1 %4639  ;;  %v6803_v28 = vld [vmem:[#allocation3 + $0x16c] ss:$20 sps:$4 sm:$0xff]   ;;  %1931 = vst [vmem:[#allocation3 + $0x140] sm:$0xcc] %v1925_v44  ;;  %v1967_v23 = vrot.slane %v8707_v4, 4  ;;  %v6413_v49 = vcombine.low %v5041_v57, %v5044_v37  ;;  %v2012_v57 = vrot.slane %v2007_v22, 4 }
 0x321   : > { %v4643_v52 = vrot.slane %v4640_v38, 4  ;;  %2195 = vrot.lane.b32.xlu0 %v2190_v9, %s9675_s2  ;;  %5832 = vmatprep.subr.bf16.mxu0 %v6803_v28  ;;  %s9728_s2 = smov 14  }
 0x322   : > { %3435 = vrot.lane.b32.xlu1 %v8378_v5, %s9674_s3  ;;  %v1969_v44 = vsel %vm443_vm8, %v1966_v31, %v1967_v23  ;;  %5833 = vmatpush2.bf16.msra.mxu0 %v6413_v49 }
 0x323   : > { %v4646_v19 = vsel %vm443_vm8, %v9699_v40, %v4643_v52  ;;  %v4648_v3 = vsel %vm9700_vm14, %v4640_v38, %v4643_v52  ;;  %v1970_v5 = vsel %vm9703_vm13, %v1961_v24, %v1969_v44  ;;  %v8726_v9 = vpop.permute.xlu0 %2008  ;;  %vm9705_vm13 = vcmask 162816  }
 0x324   : > { %v4647_v37 = vsel %vm9701_vm3, %v7707_v2, %v4646_v19  ;;  %4654 = vst.msk [vmem:[#allocation3 + $0x3a8] sm:$0x3] %vm9702_vm5, %v4648_v3  ;;  %v4733_v45 = vpop.permute.xlu1 %4732  ;;  %1976 = vst [vmem:[#allocation3 + $0x154] sm:$0x33] %v1970_v5  ;;  %v2013_v38 = vrot.slane %v8726_v9, 4  ;;  %v3477_v2 = vrot.slane %v6806_v58, %v7268_v42  ;;  %v9704_v3 = vrot.slane %v7729_v14, 4 }
 0x325   : > { %4653 = vst [vmem:[#allocation3 + $0x3a0] sm:$0x33] %v4647_v37  ;;  %v4736_v52 = vrot.slane %v4733_v45, 4  ;;  %3390 = vrot.lane.b32.xlu0 %v3385_v25, %s9678_s9  ;;  %vm9706_vm14 = vmmov %vm9705_vm13  ;;  %v6807_v58 = vld [vmem:[#allocation2 + $0xa] ss:$0 sps:$4 sm:$0x33]  }
 0x326   : > { %1873 = vrot.lane.b32.xlu1 %v8676_v8, %s9588_s20  ;;  %v2015_v49 = vsel %vm443_vm8, %v2012_v57, %v2013_v38  ;;  %vm9707_vm3 = vmmov %vm9702_vm5  ;;  %vm9708_vm5 = vcmask 343040  }
 0x327   : > { %v4739_v28 = vsel %vm443_vm8, %v9704_v3, %v4736_v52  ;;  %v4741_v31 = vsel %vm9705_vm13, %v4733_v45, %v4736_v52  ;;  %v2016_v40 = vsel %vm9708_vm5, %v2007_v22, %v2015_v49  ;;  %v4687_v19 = vpop.permute.xlu0 %4686  ;;  %vm9709_vm1 = vmmov %vm9707_vm3  ;;  %v9711_v22 = vrot.slane %v7718_v12, 4  ;;  %v6362_v52 = vld.sshfl [vmem:[#allocation2 + $0x10] sm:$0x33 pattern:$0x76325410] }
 0x328   : > { %v4740_v24 = vsel %vm9706_vm14, %v7729_v14, %v4739_v28  ;;  %4747 = vst.msk [vmem:[#allocation3 + $0x3bc] sm:$0x3] %vm9707_vm3, %v4741_v31  ;;  %v3163_v25 = vpop.permute.xlu1 %3162  ;;  %2022 = vst [vmem:[#allocation3 + $0x154] sm:$0xcc] %v2016_v40  ;;  %v4690_v37 = vrot.slane %v4687_v19, 4  ;;  %v9710_v14 = vrot.slane %v8188_v59, 4  ;;  %v1914_v31 = vrot.slane %v6807_v58, %v7268_v42 }
 0x329   : > { %4746 = vst [vmem:[#allocation3 + $0x3b4] sm:$0x33] %v4740_v24  ;;  %v3166_v44 = vrot.slane %v3163_v25, 4  ;;  %3176 = vst.msk [vmem:[#allocation3 + $0x268] sm:$0x3] %vm9709_vm1, %v3163_v25  ;;  %3482 = vrot.lane.b32.xlu0 %v3477_v2, %s9681_s19  ;;  %vm9712_vm13 = vcmask 179200  }
 0x32a   : > { %1964 = vrot.lane.b32.xlu1 %v8676_v8, %s9604_s13  ;;  %v4693_v45 = vsel %vm443_vm8, %v9711_v22, %v4690_v37  ;;  %v4695_v57 = vsel %vm9712_vm13, %v4687_v19, %v4690_v37  ;;  %vm9713_vm1 = vmmov %vm9712_vm13  ;;  %vm9714_vm14 = vcmask 257026   ;;  %v6808_v49 = vld [vmem:[#allocation2 + $0xa] ss:$0 sps:$4 sm:$0x33]   ;;  %v9717_v19 = vrot.slane %v7740_v36, 4  ;;  %s9920_s19 = smov 58  }
 0x32b   : > { %v3169_v5 = vsel %vm443_vm8, %v9710_v14, %v3166_v44  ;;  %v4694_v28 = vsel %vm9713_vm1, %v7718_v12, %v4693_v45  ;;  %4701 = vst.msk [vmem:[#allocation3 + $0x3a8] sm:$0xc] %vm9714_vm14, %v4695_v57  ;;  %v4780_v2 = vpop.permute.xlu0 %4779  ;;  %v9716_v12 = vrot.slane %v8210_v1, 4  ;;  %vm9718_vm5 = vcmask 146432   ;;  %vm9720_vm1 = vmmov %vm9714_vm14  ;;  %v5035_v57 = vld [vmem:[#allocation3 + $0x140] sm:$0xff] }
 0x32c   : > { %v3170_v3 = vsel %vm1695_vm9, %v8188_v59, %v3169_v5  ;;  %v3254_v8 = vpop.permute.xlu1 %3253  ;;  %4700 = vst [vmem:[#allocation3 + $0x3a0] sm:$0xcc] %v4694_v28  ;;  %v4783_v40 = vrot.slane %v4780_v2, 4  ;;  %v6811_v59 = vld [vmem:[#allocation2 + $0x10] ss:$0 sps:$4 sm:$0xff]   ;;  %vm9719_vm13 = vmmov %vm9718_vm5  ;;  %v2005_v45 = vrot.slane %v6808_v49, %v7268_v42  ;;  %v9724_v49 = vrot.slane %v7795_v6, 4 }
 0x32d   : > { %3175 = vst [vmem:[#allocation3 + $0x260] sm:$0x33] %v3170_v3  ;;  %v3257_v24 = vrot.slane %v3254_v8, 4  ;;  %3267 = vst.msk [vmem:[#allocation3 + $0x27c] sm:$0x3] %vm9707_vm3, %v3254_v8  ;;  %1919 = vrot.lane.b32.xlu0 %v1914_v31, %s9625_s28  ;;  %s9921_s28 = smov 56  }
 0x32e   : > { %4825 = vrot.lane.b32.xlu1 %v6362_v52, %s9715_s0  ;;  %v4786_v58 = vsel %vm443_vm8, %v9717_v19, %v4783_v40  ;;  %v4788_v44 = vsel %vm9718_vm5, %v4780_v2, %v4783_v40  ;;  %vm9721_vm14 = vmmov %vm9707_vm3  ;;  %v6812_v31 = vld [vmem:[#allocation2 + $0x10] ss:$0 sps:$4 sm:$0xff]   ;;  %v9725_v40 = vrot.slane %v8199_v16, 4  ;;  %vm9726_vm5 = vcmask 654336  }
 0x32f   : > { %v3260_v25 = vsel %vm443_vm8, %v9716_v12, %v3257_v24  ;;  %v4787_v14 = vsel %vm9719_vm13, %v7740_v36, %v4786_v58  ;;  %4794 = vst.msk [vmem:[#allocation3 + $0x3bc] sm:$0xc] %vm9720_vm1, %v4788_v44  ;;  %v3209_v22 = vpop.permute.xlu0 %3208  ;;  %v5038_v3 = vld [vmem:[#allocation3 + $0x154] sm:$0xff]  ;;  %vm9722_vm3 = vmmov %vm9720_vm1  ;;  %v4868_v36 = vrot.slane %v6811_v59, %v7268_v42 }
 0x330   : > { %v3261_v37 = vsel %vm2520_vm6, %v8210_v1, %v3260_v25  ;;  %v4454_v5 = vpop.permute.xlu1 %4453  ;;  %v6809_v28 = vld [vmem:[#allocation3 + $0x144] ss:$20 sps:$4 sm:$0xff]   ;;  %4793 = vst [vmem:[#allocation3 + $0x3b4] sm:$0xcc] %v4787_v14  ;;  %v3212_v2 = vrot.slane %v3209_v22, 4  ;;  %v6408_v1 = vcombine.low %v5035_v57, %v5038_v3  ;;  %v8790_v25 = vcombine.low %v8408_v13, %v8408_v13  ;;  %vm9727_vm13 = vmmov %vm9720_vm1 }
 0x331   : > { %3266 = vst [vmem:[#allocation3 + $0x274] sm:$0x33] %v3261_v37  ;;  %v4457_v8 = vrot.slane %v4454_v5, 4  ;;  %4468 = vst.msk [vmem:[#allocation3 + $0x380] sm:$0x3] %vm9721_vm14, %v4454_v5  ;;  %2010 = vrot.lane.b32.xlu0 %v2005_v45, %s9606_s29  ;;  %5834 = vmatprep.subr.bf16.mxu0 %v6809_v28  ;;  %v4963_v13 = vrot.slane %v6812_v31, %v7268_v42  ;;  %v9729_v14 = vrot.slane %v7817_v26, 4 }
 0x332   : > { %3222 = vst.msk [vmem:[#allocation3 + $0x268] sm:$0xc] %vm9722_vm3, %v3209_v22  ;;  %4920 = vrot.lane.b32.xlu1 %v6362_v52, %s9723_s1  ;;  %v3215_v12 = vsel %vm443_vm8, %v9725_v40, %v3212_v2  ;;  %5835 = vmatpush2.bf16.msra.mxu0 %v6408_v1  ;;  %vm9731_vm1 = vmmov %vm9721_vm14  ;;  %vm9732_vm14 = vcmask 130048   ;;  %s9927_s29 = sld [smem:[#allocation52_spill]] }
 0x333   : > { %v4461_v24 = vsel %vm443_vm8, %v9724_v49, %v4457_v8  ;;  %v3216_v59 = vsel %vm1742_vm4, %v8199_v16, %v3215_v12  ;;  %v3300_v58 = vpop.permute.xlu0 %3299  ;;  %v9730_v16 = vrot.slane %v8221_v29, 4  ;;  %vm9733_vm3 = vmmov %vm9731_vm1 }
 0x334   : > { %v4462_v52 = vsel %vm9726_vm5, %v7795_v6, %v4461_v24  ;;  %v4547_v19 = vpop.permute.xlu1 %4546  ;;  %3221 = vst [vmem:[#allocation3 + $0x260] sm:$0xcc] %v3216_v59  ;;  %v3303_v37 = vrot.slane %v3300_v58, 4  ;;  %3313 = vst.msk [vmem:[#allocation3 + $0x27c] sm:$0xc] %vm9727_vm13, %v3300_v58 }
 0x335   : > { %4467 = vst [vmem:[#allocation3 + $0x378] sm:$0x33] %v4462_v52  ;;  %v4550_v44 = vrot.slane %v4547_v19, 4  ;;  %4873 = vrot.lane.b32.xlu0 %v4868_v36, %s9728_s2  ;;  %5837 = vmatmul.mubr.bf16.vlgmr.msra.gmra.mxu0 %v8790_v25  ;;  %vm9734_vm5 = vmmov %vm9727_vm13  ;;  %v9737_v36 = vrot.slane %v7806_v41, 4  ;;  %vm9738_vm13 = vcmask 637952  }
 0x336   : > { %v3306_v22 = vsel %vm443_vm8, %v9730_v16, %v3303_v37  ;;  %6494 = vmatprep.mubr.msk.bf16.mxu0 %vm9732_vm14, %v7986_v10  ;;  %v9740_v37 = vrot.slane %v7828_v47, 4  ;;  %vm9741_vm14 = vmmov %vm9734_vm5 }
 0x337   : > { %v4553_v6 = vsel %vm443_vm8, %v9729_v14, %v4550_v44  ;;  %v4555_v5 = vsel %vm3073_vm2, %v4547_v19, %v4550_v44  ;;  %v3307_v42 = vsel %vm2567_vm12, %v8221_v29, %v3306_v22  ;;  %v4501_v3 = vpop.permute.xlu0 %4500  ;;  %v6814_v28 = vld [vmem:[#allocation3 + $0x3a0] ss:$20 sps:$4 sm:$0xff]   ;;  %v6816_v8 = vld [vmem:[#allocation3 + $0x3a4] ss:$20 sps:$4 sm:$0xff]   ;;  %v9739_v19 = vrot.slane %v8346_v50, 4 }
 0x338   : > { %v4554_v45 = vsel %vm3073_vm2, %v7817_v26, %v4553_v6  ;;  %4561 = vst.msk [vmem:[#allocation3 + $0x394] sm:$0x3] %vm9731_vm1, %v4555_v5  ;;  %v2974_v57 = vpop.permute.xlu1 %2973  ;;  %3312 = vst [vmem:[#allocation3 + $0x274] sm:$0xcc] %v3307_v42  ;;  %v4504_v1 = vrot.slane %v4501_v3, 4  ;;  %5927 = vmatprep.subr.bf16.mxu0 %v6816_v8  ;;  %v9736_v26 = vrot.slane %v8317_v20, 4 }
 0x339   : > { %4560 = vst [vmem:[#allocation3 + $0x38c] sm:$0x33] %v4554_v45  ;;  %v2977_v2 = vrot.slane %v2974_v57, 4  ;;  %2988 = vst.msk [vmem:[#allocation3 + $0x240] sm:$0x3] %vm9733_vm3, %v2974_v57  ;;  %4968 = vrot.lane.b32.xlu0 %v4963_v13, %s9735_s16  ;;  %5928 = vmatpush1.bf16.msra.mxu0 %v6814_v28 }
 0x33a   : > { %4515 = vst.msk [vmem:[#allocation3 + $0x380] sm:$0xc] %vm9734_vm5, %v4501_v3  ;;  %v4508_v31 = vsel %vm443_vm8, %v9737_v36, %v4504_v1  ;;  %vm9742_vm3 = vmmov %vm9731_vm1  ;;  %v9744_v3 = vrot.slane %v8332_v18, 4  ;;  %vm9745_vm5 = vcmask 244736  }
 0x33b   : > { %v2981_v29 = vsel %vm443_vm8, %v9736_v26, %v2977_v2  ;;  %v4509_v24 = vsel %vm9738_vm13, %v7806_v41, %v4508_v31  ;;  %v4594_v12 = vpop.permute.xlu0 %4593  ;;  %vm9746_vm13 = vcmask 719872   ;;  %v9748_v31 = vrot.slane %v7908_v48, 4 }
 0x33c   : > { %v2982_v49 = vsel %vm2979_vm10, %v8317_v20, %v2981_v29  ;;  %v3068_v40 = vpop.permute.xlu1 %3067  ;;  %4514 = vst [vmem:[#allocation3 + $0x378] sm:$0xcc] %v4509_v24  ;;  %v4597_v59 = vrot.slane %v4594_v12, 4  ;;  %v9749_v24 = vrot.slane %v8363_v46, 4 }
 0x33d   : > { %2987 = vst [vmem:[#allocation3 + $0x238] sm:$0x33] %v2982_v49  ;;  %v3071_v52 = vrot.slane %v3068_v40, 4 }
 0x33e   : > { %v4600_v13 = vsel %vm443_vm8, %v9740_v37, %v4597_v59  ;;  %v4602_v20 = vsel %vm3121_vm15, %v4594_v12, %v4597_v59 }
 0x33f   : > { %v3075_v58 = vsel %vm443_vm8, %v9739_v19, %v3071_v52  ;;  %v3077_v44 = vsel %vm3073_vm2, %v3068_v40, %v3071_v52  ;;  %v4601_v14 = vsel %vm3121_vm15, %v7828_v47, %v4600_v13  ;;  %4608 = vst.msk [vmem:[#allocation3 + $0x394] sm:$0xc] %vm9741_vm14, %v4602_v20  ;;  %v3021_v5 = vpop.permute.xlu0 %3020  ;;  %v6817_v16 = vld [vmem:[#allocation3 + $0x260] ss:$20 sps:$4 sm:$0xff]   ;;  %v6819_v22 = vld [vmem:[#allocation3 + $0x264] ss:$20 sps:$4 sm:$0xff]  }
 0x340   : > { %v3076_v41 = vsel %vm3073_vm2, %v8346_v50, %v3075_v58  ;;  %3083 = vst.msk [vmem:[#allocation3 + $0x254] sm:$0x3] %vm9731_vm1, %v3077_v44  ;;  %v4270_v6 = vpop.permute.xlu1 %4269  ;;  %4607 = vst [vmem:[#allocation3 + $0x38c] sm:$0xcc] %v4601_v14  ;;  %v3024_v42 = vrot.slane %v3021_v5, 4  ;;  %5902 = vmatprep.subr.bf16.mxu1 %v6819_v22  ;;  %v9743_v50 = vrot.slane %v7886_v30, 4 }
 0x341   : > { %3082 = vst [vmem:[#allocation3 + $0x24c] sm:$0x33] %v3076_v41  ;;  %v4273_v45 = vrot.slane %v4270_v6, 4  ;;  %4283 = vst.msk [vmem:[#allocation3 + $0x358] sm:$0x3] %vm9742_vm3, %v4270_v6  ;;  %5903 = vmatpush2.bf16.msra.mxu1 %v6817_v16 }
 0x342   : > { %v3028_v47 = vsel %vm443_vm8, %v9744_v3, %v3024_v42  ;;  %v3030_v28 = vsel %vm9745_vm5, %v3021_v5, %v3024_v42  ;;  %vm9747_vm1 = vmmov %vm9745_vm5  ;;  %vm9750_vm5 = vcmask 687104  }
 0x343   : > { %v4276_v57 = vsel %vm443_vm8, %v9743_v50, %v4273_v45  ;;  %v3029_v2 = vsel %vm9747_vm1, %v8332_v18, %v3028_v47  ;;  %3036 = vst.msk [vmem:[#allocation3 + $0x240] sm:$0xc] %vm9741_vm14, %v3030_v28  ;;  %v3116_v26 = vpop.permute.xlu0 %3115  ;;  %vm9752_vm1 = vmmov %vm9742_vm3  ;;  %v9758_v45 = vrot.slane %v8437_v55, 4  ;;  %v9759_v50 = vrot.slane %v7918_v61, 4 }
 0x344   : > { %v4277_v8 = vsel %vm9746_vm13, %v7886_v30, %v4276_v57  ;;  %v4361_v1 = vpop.permute.xlu1 %4360  ;;  %3035 = vst [vmem:[#allocation3 + $0x238] sm:$0xcc] %v3029_v2  ;;  %v3119_v36 = vrot.slane %v3116_v26, 4  ;;  %vm9751_vm13 = vmmov %vm9741_vm14 }
 0x345   : > { %4282 = vst [vmem:[#allocation3 + $0x350] sm:$0x33] %v4277_v8  ;;  %v4364_v29 = vrot.slane %v4361_v1, 4  ;;  %4375 = vst.msk [vmem:[#allocation3 + $0x36c] sm:$0x3] %vm9742_vm3, %v4361_v1  ;;  %vm9756_vm3 = vcmask 703488  }
 0x346   : > { %v3123_v30 = vsel %vm443_vm8, %v9749_v24, %v3119_v36  ;;  %v3125_v18 = vsel %vm3121_vm15, %v3116_v26, %v3119_v36  ;;  %vm9753_vm14 = vmmov %vm9751_vm13  ;;  %v9763_v26 = vrot.slane %v7955_v56, 4 }
 0x347   : > { %v4368_v49 = vsel %vm443_vm8, %v9748_v31, %v4364_v29  ;;  %v3124_v12 = vsel %vm3121_vm15, %v8363_v46, %v3123_v30  ;;  %3131 = vst.msk [vmem:[#allocation3 + $0x254] sm:$0xc] %vm9751_vm13, %v3125_v18  ;;  %v4316_v59 = vpop.permute.xlu0 %4315  ;;  %v6820_v19 = vld [vmem:[#allocation3 + $0x378] ss:$20 sps:$4 sm:$0xff]   ;;  %v6822_v58 = vld [vmem:[#allocation3 + $0x37c] ss:$20 sps:$4 sm:$0xff]  }
 0x348   : > { %v4369_v40 = vsel %vm9750_vm5, %v7908_v48, %v4368_v49  ;;  %v2792_v52 = vpop.permute.xlu1 %2791  ;;  %3130 = vst [vmem:[#allocation3 + $0x24c] sm:$0xcc] %v3124_v12  ;;  %v4319_v37 = vrot.slane %v4316_v59, 4  ;;  %4329 = vst.msk [vmem:[#allocation3 + $0x358] sm:$0xc] %vm9753_vm14, %v4316_v59  ;;  %5929 = vmatprep.subr.bf16.mxu0 %v6822_v58  ;;  %v9754_v48 = vrot.slane %v8405_v27, 4 }
 0x349   : > { %4374 = vst [vmem:[#allocation3 + $0x364] sm:$0x33] %v4369_v40  ;;  %v2795_v44 = vrot.slane %v2792_v52, 4  ;;  %2805 = vst.msk [vmem:[#allocation3 + $0x218] sm:$0x3] %vm9752_vm1, %v2792_v52  ;;  %v9755_v46 = vrot.slane %v7897_v17, 4  ;;  %5930 = vmatpush1.bf16.msra.mxu0 %v6820_v19 }
 0x34a   : > { %vm9757_vm5 = vmmov %vm9752_vm1  ;;  %vm9760_vm1 = vcmask 670720   ;;  %v9764_v29 = vrot.slane %v8422_v63, 4  ;;  %v9768_v40 = vrot.slane %v7989_v21, 4  ;;  %v9769_v52 = vrot.slane %v8454_v62, 4 }
 0x34b   : > { %v2798_v13 = vsel %vm443_vm8, %v9754_v48, %v2795_v44  ;;  %v4322_v20 = vsel %vm443_vm8, %v9755_v46, %v4319_v37  ;;  %v4408_v5 = vpop.permute.xlu0 %4407  ;;  %vm9761_vm14 = vmmov %vm9757_vm5  ;;  %v9774_v46 = vrot.slane %v8490_v53, 4 }
 0x34c   : > { %v2799_v41 = vsel %vm2061_vm7, %v8405_v27, %v2798_v13  ;;  %v4323_v14 = vsel %vm9756_vm3, %v7897_v17, %v4322_v20  ;;  %v2883_v6 = vpop.permute.xlu1 %2882  ;;  %v4411_v22 = vrot.slane %v4408_v5, 4  ;;  %4422 = vst.msk [vmem:[#allocation3 + $0x36c] sm:$0xc] %vm9751_vm13, %v4408_v5  ;;  %vm9762_vm3 = vmmov %vm9751_vm13  ;;  %v9775_v20 = vrot.slane %v7969_v0, 4 }
 0x34d   : > { %2804 = vst [vmem:[#allocation3 + $0x210] sm:$0x33] %v2799_v41  ;;  %4328 = vst [vmem:[#allocation3 + $0x350] sm:$0xcc] %v4323_v14  ;;  %v2886_v16 = vrot.slane %v2883_v6, 4 }
 0x34e   : > { %2896 = vst.msk [vmem:[#allocation3 + $0x22c] sm:$0x3] %vm9757_vm5, %v2883_v6  ;;  %v4415_v27 = vsel %vm443_vm8, %v9759_v50, %v4411_v22  ;;  %vm9765_vm5 = vcmask 310272   ;;  %vm9766_vm13 = vmmov %vm9761_vm14  ;;  %v9780_v50 = vrot.slane %v8002_v43, 4 }
 0x34f   : > { %v2889_v42 = vsel %vm443_vm8, %v9758_v45, %v2886_v16  ;;  %v4416_v57 = vsel %vm9760_vm1, %v7918_v61, %v4415_v27  ;;  %v2838_v47 = vpop.permute.xlu0 %2837  ;;  %v6823_v28 = vld [vmem:[#allocation3 + $0x238] ss:$20 sps:$4 sm:$0xff]   ;;  %v6825_v8 = vld [vmem:[#allocation3 + $0x23c] ss:$20 sps:$4 sm:$0xff]   ;;  %vm9767_vm1 = vmmov %vm9762_vm3  ;;  %v9779_v45 = vrot.slane %v8511_v33, 4 }
 0x350   : > { %v2890_v17 = vsel %vm2154_vm11, %v8437_v55, %v2889_v42  ;;  %v4088_v3 = vpop.permute.xlu1 %4087  ;;  %4421 = vst [vmem:[#allocation3 + $0x364] sm:$0xcc] %v4416_v57  ;;  %v2841_v1 = vrot.slane %v2838_v47, 4  ;;  %2851 = vst.msk [vmem:[#allocation3 + $0x218] sm:$0xc] %vm9762_vm3, %v2838_v47  ;;  %5904 = vmatprep.subr.bf16.mxu1 %v6825_v8  ;;  %vm9771_vm3 = vcmask 277504  }
 0x351   : > { %2895 = vst [vmem:[#allocation3 + $0x224] sm:$0x33] %v2890_v17  ;;  %v4091_v2 = vrot.slane %v4088_v3, 4  ;;  %4101 = vst.msk [vmem:[#allocation3 + $0x330] sm:$0x3] %vm9761_vm14, %v4088_v3  ;;  %5905 = vmatpush2.bf16.msra.mxu1 %v6823_v28  ;;  %vm9770_vm14 = vcmask 752640  }
 0x352   : > { %v2844_v61 = vsel %vm443_vm8, %v9764_v29, %v2841_v1 }
 0x353   : > { %v4094_v55 = vsel %vm443_vm8, %v9763_v26, %v4091_v2  ;;  %v2845_v31 = vsel %vm9765_vm5, %v8422_v63, %v2844_v61  ;;  %v2929_v24 = vpop.permute.xlu0 %2928  ;;  %vm9772_vm5 = vmmov %vm9766_vm13  ;;  %v9784_v2 = vrot.slane %v8013_v32, 4  ;;  %v9786_v26 = vrot.slane %v8501_v54, 4 }
 0x354   : > { %v4095_v36 = vsel %vm2613_vm0, %v7955_v56, %v4094_v55  ;;  %v4179_v49 = vpop.permute.xlu1 %4178  ;;  %2850 = vst [vmem:[#allocation3 + $0x210] sm:$0xcc] %v2845_v31  ;;  %v2932_v18 = vrot.slane %v2929_v24, 4  ;;  %2942 = vst.msk [vmem:[#allocation3 + $0x22c] sm:$0xc] %vm9767_vm1, %v2929_v24  ;;  %v9790_v24 = vrot.slane %v8035_v15, 4 }
 0x355   : > { %4100 = vst [vmem:[#allocation3 + $0x328] sm:$0x33] %v4095_v36  ;;  %v4182_v30 = vrot.slane %v4179_v49, 4  ;;  %4192 = vst.msk [vmem:[#allocation3 + $0x344] sm:$0x3] %vm9766_vm13, %v4179_v49 }
 0x356   : > { %v2935_v56 = vsel %vm443_vm8, %v9769_v52, %v2932_v18  ;;  %vm9773_vm13 = vmmov %vm9767_vm1  ;;  %vm9776_vm1 = vcmask 769024  }
 0x357   : > { %v4185_v12 = vsel %vm443_vm8, %v9768_v40, %v4182_v30  ;;  %v2936_v59 = vsel %vm9771_vm3, %v8454_v62, %v2935_v56  ;;  %v4134_v58 = vpop.permute.xlu0 %4133  ;;  %v6826_v44 = vld [vmem:[#allocation3 + $0x350] ss:$20 sps:$4 sm:$0xff]   ;;  %v6828_v37 = vld [vmem:[#allocation3 + $0x354] ss:$20 sps:$4 sm:$0xff]   ;;  %vm9778_vm3 = vmmov %vm9773_vm13 }
 0x358   : > { %v4186_v63 = vsel %vm9770_vm14, %v7989_v21, %v4185_v12  ;;  %v2608_v19 = vpop.permute.xlu1 %2607  ;;  %2941 = vst [vmem:[#allocation3 + $0x224] sm:$0xcc] %v2936_v59  ;;  %v4137_v13 = vrot.slane %v4134_v58, 4  ;;  %4147 = vst.msk [vmem:[#allocation3 + $0x330] sm:$0xc] %vm9773_vm13, %v4134_v58  ;;  %5931 = vmatprep.subr.bf16.mxu0 %v6828_v37  ;;  %vm9782_vm13 = vcmask 736256  }
 0x359   : > { %4191 = vst [vmem:[#allocation3 + $0x33c] sm:$0x33] %v4186_v63  ;;  %v2611_v48 = vrot.slane %v2608_v19, 4  ;;  %2622 = vst.msk [vmem:[#allocation3 + $0x1f0] sm:$0x3] %vm9772_vm5, %v2608_v19  ;;  %5932 = vmatpush1.bf16.msra.mxu0 %v6826_v44  ;;  %v9796_v44 = vrot.slane %v8550_v11, 4 }
 0x35a   : > { %v4140_v62 = vsel %vm443_vm8, %v9775_v20, %v4137_v13  ;;  %vm9777_vm14 = vmmov %vm9772_vm5  ;;  %vm9781_vm5 = vcmask 359424   ;;  %v9797_v37 = vrot.slane %v8024_v39, 4 }
 0x35b   : > { %v2615_v21 = vsel %vm443_vm8, %v9774_v46, %v2611_v48  ;;  %v4141_v14 = vsel %vm9776_vm1, %v7969_v0, %v4140_v62  ;;  %v4225_v5 = vpop.permute.xlu0 %4224  ;;  %vm9783_vm1 = vmmov %vm9778_vm3 }
 0x35c   : > { %v2616_v41 = vsel %vm2613_vm0, %v8490_v53, %v2615_v21  ;;  %v2701_v6 = vpop.permute.xlu1 %2700  ;;  %4146 = vst [vmem:[#allocation3 + $0x328] sm:$0xcc] %v4141_v14  ;;  %v4228_v22 = vrot.slane %v4225_v5, 4  ;;  %4238 = vst.msk [vmem:[#allocation3 + $0x344] sm:$0xc] %vm9778_vm3, %v4225_v5  ;;  %v9802_v14 = vrot.slane %v8573_v35, 4 }
 0x35d   : > { %2621 = vst [vmem:[#allocation3 + $0x1e8] sm:$0x33] %v2616_v41  ;;  %v2704_v16 = vrot.slane %v2701_v6, 4  ;;  %2714 = vst.msk [vmem:[#allocation3 + $0x204] sm:$0x3] %vm9777_vm14, %v2701_v6  ;;  %vm9785_vm14 = vcmask 195584  }
 0x35e   : > { %v4231_v53 = vsel %vm443_vm8, %v9780_v50, %v4228_v22  ;;  %vm9787_vm3 = vmmov %vm9785_vm14  ;;  %v9803_v5 = vrot.slane %v8046_v51, 4 }
 0x35f   : > { %v2707_v42 = vsel %vm443_vm8, %v9779_v45, %v2704_v16  ;;  %v4232_v27 = vsel %vm9782_vm13, %v8002_v43, %v4231_v53  ;;  %v2655_v57 = vpop.permute.xlu0 %2654  ;;  %v6829_v3 = vld [vmem:[#allocation3 + $0x210] ss:$20 sps:$4 sm:$0xff]   ;;  %v6831_v47 = vld [vmem:[#allocation3 + $0x214] ss:$20 sps:$4 sm:$0xff]   ;;  %vm9789_vm13 = vcmask 769024  }
 0x360   : > { %v2708_v0 = vsel %vm9781_vm5, %v8511_v33, %v2707_v42  ;;  %v3898_v17 = vpop.permute.xlu1 %3897  ;;  %4237 = vst [vmem:[#allocation3 + $0x33c] sm:$0xcc] %v4232_v27  ;;  %v2658_v8 = vrot.slane %v2655_v57, 4  ;;  %2669 = vst.msk [vmem:[#allocation3 + $0x1f0] sm:$0xc] %vm9783_vm1, %v2655_v57  ;;  %5906 = vmatprep.subr.bf16.mxu1 %v6831_v47  ;;  %vm9788_vm5 = vcmask 254976  }
 0x361   : > { %2713 = vst [vmem:[#allocation3 + $0x1fc] sm:$0x33] %v2708_v0  ;;  %v3901_v28 = vrot.slane %v3898_v17, 4  ;;  %5907 = vmatpush2.bf16.msra.mxu1 %v6829_v3 }
 0x362   : > { %v2662_v43 = vsel %vm443_vm8, %v9786_v26, %v2658_v8 }
 0x363   : > { %v3905_v1 = vsel %vm443_vm8, %v9784_v2, %v3901_v28  ;;  %v3907_v33 = vsel %vm9785_vm14, %v3898_v17, %v3901_v28  ;;  %v2663_v29 = vsel %vm9789_vm13, %v8501_v54, %v2662_v43  ;;  %v2747_v36 = vpop.permute.xlu0 %2746  ;;  %vm9791_vm14 = vcmask 162816   ;;  %v9808_v17 = vld [vmem:[#allocation22_spill] sm:$0xff] }
 0x364   : > { %v3906_v55 = vsel %vm9787_vm3, %v8013_v32, %v3905_v1  ;;  %3913 = vst.msk [vmem:[#allocation3 + $0x308] sm:$0x3] %vm9788_vm5, %v3907_v33  ;;  %v3993_v61 = vpop.permute.xlu1 %3992  ;;  %2668 = vst [vmem:[#allocation3 + $0x1e8] sm:$0xcc] %v2663_v29  ;;  %v2750_v49 = vrot.slane %v2747_v36, 4  ;;  %v9792_v32 = vrot.slane %v8528_v60, 4 }
 0x365   : > { %3912 = vst [vmem:[#allocation3 + $0x300] sm:$0x33] %v3906_v55  ;;  %v3996_v31 = vrot.slane %v3993_v61, 4  ;;  %2760 = vst.msk [vmem:[#allocation3 + $0x204] sm:$0xc] %vm9783_vm1, %v2747_v36  ;;  %vm9794_vm13 = vcmask 343040  }
 0x366   : > { %v2753_v40 = vsel %vm443_vm8, %v9792_v32, %v2750_v49  ;;  %vm9793_vm3 = vmmov %vm9791_vm14  ;;  %v9813_v55 = vld [vmem:[#allocation24_spill] sm:$0xff] }
 0x367   : > { %v4000_v30 = vsel %vm443_vm8, %v9790_v24, %v3996_v31  ;;  %v4002_v18 = vsel %vm9791_vm14, %v3993_v61, %v3996_v31  ;;  %v2754_v12 = vsel %vm9794_vm13, %v8528_v60, %v2753_v40  ;;  %v3946_v56 = vpop.permute.xlu0 %3945  ;;  %v6832_v63 = vld [vmem:[#allocation3 + $0x328] ss:$20 sps:$4 sm:$0xff]   ;;  %v6834_v59 = vld [vmem:[#allocation3 + $0x32c] ss:$20 sps:$4 sm:$0xff]   ;;  %vm9795_vm1 = vmmov %vm9788_vm5  ;;  %vm9798_vm14 = vcmask 179200  }
 0x368   : > { %v4001_v54 = vsel %vm9793_vm3, %v8035_v15, %v4000_v30  ;;  %4008 = vst.msk [vmem:[#allocation3 + $0x31c] sm:$0x3] %vm9788_vm5, %v4002_v18  ;;  %v2424_v52 = vpop.permute.xlu1 %2423  ;;  %2759 = vst [vmem:[#allocation3 + $0x1fc] sm:$0xcc] %v2754_v12  ;;  %v3949_v58 = vrot.slane %v3946_v56, 4  ;;  %5933 = vmatprep.subr.bf16.mxu0 %v6834_v59  ;;  %vm9800_vm5 = vcmask 257026   ;;  %v9004_v43 = vpop.f32.mrf.mxu1 }
 0x369   : > { %4007 = vst [vmem:[#allocation3 + $0x314] sm:$0x33] %v4001_v54  ;;  %v2427_v19 = vrot.slane %v2424_v52, 4  ;;  %2437 = vst.msk [vmem:[#allocation3 + $0x1c8] sm:$0x3] %vm9795_vm1, %v2424_v52  ;;  %5934 = vmatpush1.bf16.msra.mxu0 %v6832_v63  ;;  %v9814_v29 = vrot.slane %v9813_v55, 4 }
 0x36a   : > { %v3953_v48 = vsel %vm443_vm8, %v9797_v37, %v3949_v58  ;;  %v3955_v60 = vsel %vm9798_vm14, %v3946_v56, %v3949_v58  ;;  %vm9799_vm3 = vmmov %vm9798_vm14  ;;  %v9815_v31 = vld [vmem:[#allocation41_spill] sm:$0xff]  ;;  %v9019_v63 = vpop.f32.mrf.mxu1  ;;  %v9819_v59 = vld [vmem:[#allocation42_spill] sm:$0xff] }
 0x36b   : > { %v2430_v15 = vsel %vm443_vm8, %v9796_v44, %v2427_v19  ;;  %v3954_v46 = vsel %vm9799_vm3, %v8024_v39, %v3953_v48  ;;  %3961 = vst.msk [vmem:[#allocation3 + $0x308] sm:$0xc] %vm9800_vm5, %v3955_v60  ;;  %v4041_v20 = vpop.permute.xlu0 %4040  ;;  %vm9801_vm13 = vmmov %vm9795_vm1  ;;  %v9816_v49 = vrot.slane %v9815_v31, 4  ;;  %v9820_v19 = vrot.slane %v9819_v59, 4  ;;  %v9821_v44 = vld [vmem:[#allocation23_spill] sm:$0xff] }
 0x36c   : > { %v2431_v13 = vsel %vm1695_vm9, %v8550_v11, %v2430_v15  ;;  %v2515_v21 = vpop.permute.xlu1 %2514  ;;  %3960 = vst [vmem:[#allocation3 + $0x300] sm:$0xcc] %v3954_v46  ;;  %v4044_v41 = vrot.slane %v4041_v20, 4  ;;  %vm9804_vm9 = vcmask 146432   ;;  %vm9806_vm14 = vmmov %vm9800_vm5  ;;  %v9822_v15 = vrot.slane %v9821_v44, 4 }
 0x36d   : > { %2436 = vst [vmem:[#allocation3 + $0x1c0] sm:$0x33] %v2431_v13  ;;  %v2518_v62 = vrot.slane %v2515_v21, 4  ;;  %2529 = vst.msk [vmem:[#allocation3 + $0x1dc] sm:$0x3] %vm9801_vm13, %v2515_v21 }
 0x36e   : > { %v4048_v11 = vsel %vm443_vm8, %v9803_v5, %v4044_v41  ;;  %v4050_v39 = vsel %vm9804_vm9, %v4041_v20, %v4044_v41  ;;  %vm9805_vm1 = vmmov %vm9804_vm9  ;;  %v5883_v41 = vpop.f32.mrf.mxu1  ;;  %v9829_v5 = vld [vmem:[#allocation25_spill] sm:$0xff] }
 0x36f   : > { %v2522_v6 = vsel %vm443_vm8, %v9802_v14, %v2518_v62  ;;  %v4049_v22 = vsel %vm9805_vm1, %v8046_v51, %v4048_v11  ;;  %4056 = vst.msk [vmem:[#allocation3 + $0x31c] sm:$0xc] %vm9806_vm14, %v4050_v39  ;;  %v2470_v42 = vpop.permute.xlu0 %2469  ;;  %v6835_v50 = vld [vmem:[#allocation3 + $0x1e8] ss:$20 sps:$4 sm:$0xff]   ;;  %v6837_v53 = vld [vmem:[#allocation3 + $0x1ec] ss:$20 sps:$4 sm:$0xff]   ;;  %vm9807_vm3 = vmmov %vm9801_vm13 }
 0x370   : > { %v2523_v16 = vsel %vm2520_vm6, %v8573_v35, %v2522_v6  ;;  %v3713_v45 = vpop.permute.xlu1 %3712  ;;  %4055 = vst [vmem:[#allocation3 + $0x314] sm:$0xcc] %v4049_v22  ;;  %v2473_v27 = vrot.slane %v2470_v42, 4  ;;  %2483 = vst.msk [vmem:[#allocation3 + $0x1c8] sm:$0xc] %vm9800_vm5, %v2470_v42  ;;  %5908 = vmatprep.subr.bf16.mxu1 %v6837_v53  ;;  %v9809_v35 = vrot.slane %v9808_v17, 4  ;;  %v5884_v22 = vpop.f32.mrf.mxu1 }
 0x371   : > { %2528 = vst [vmem:[#allocation3 + $0x1d4] sm:$0x33] %v2523_v16  ;;  %v3716_v0 = vrot.slane %v3713_v45, 4  ;;  %3726 = vst.msk [vmem:[#allocation3 + $0x2e0] sm:$0x3] %vm9807_vm3, %v3713_v45  ;;  %v9810_v51 = vld [vmem:[#allocation40_spill] sm:$0xff]  ;;  %5909 = vmatpush2.bf16.msra.mxu1 %v6835_v50 }
 0x372   : > { %v9811_v3 = vrot.slane %v9810_v51, 4  ;;  %vm9812_vm6 = vmmov %vm9800_vm5  ;;  %v9828_v14 = vrot.slane %v8617_v34, 4  ;;  %v9830_v11 = vrot.slane %v9829_v5, 4  ;;  %vm9831_vm14 = vcmask 883712  }
 0x373   : > { %v3719_v57 = vsel %vm443_vm8, %v9809_v35, %v3716_v0  ;;  %v2562_v1 = vpop.permute.xlu0 %2561  ;;  %vm9826_vm9 = vmmov %vm9800_vm5 }
 0x374   : > { %v2476_v47 = vsel %vm443_vm8, %v9811_v3, %v2473_v27  ;;  %v3720_v28 = vsel %vm2979_vm10, %v9808_v17, %v3719_v57  ;;  %v3805_v2 = vpop.permute.xlu1 %3804  ;;  %v2565_v26 = vrot.slane %v2562_v1, 4  ;;  %2576 = vst.msk [vmem:[#allocation3 + $0x1dc] sm:$0xc] %vm9812_vm6, %v2562_v1  ;;  %vm9817_vm10 = vmmov %vm9807_vm3  ;;  %v9835_v57 = vld [vmem:[#allocation26_spill] sm:$0xff]  ;;  %v9837_v3 = vld [vmem:[#allocation43_spill] sm:$0xff] }
 0x375   : > { %v2477_v8 = vsel %vm1742_vm4, %v9810_v51, %v2476_v47  ;;  %3725 = vst [vmem:[#allocation3 + $0x2d8] sm:$0x33] %v3720_v28  ;;  %v3808_v33 = vrot.slane %v3805_v2, 4  ;;  %vm9818_vm4 = vmmov %vm9807_vm3  ;;  %v9838_v47 = vrot.slane %v9837_v3, 4 }
 0x376   : > { %2482 = vst [vmem:[#allocation3 + $0x1c0] sm:$0xcc] %v2477_v8  ;;  %v2569_v24 = vsel %vm443_vm8, %v9816_v49, %v2565_v26  ;;  %vm9827_vm1 = vmmov %vm9807_vm3 }
 0x377   : > { %v3811_v61 = vsel %vm443_vm8, %v9814_v29, %v3808_v33  ;;  %v3813_v36 = vsel %vm3073_vm2, %v3805_v2, %v3808_v33  ;;  %v2570_v18 = vsel %vm2567_vm12, %v9815_v31, %v2569_v24  ;;  %v3759_v40 = vpop.permute.xlu0 %3758  ;;  %v6838_v54 = vld [vmem:[#allocation3 + $0x300] ss:$20 sps:$4 sm:$0xff]   ;;  %v6840_v12 = vld [vmem:[#allocation3 + $0x304] ss:$20 sps:$4 sm:$0xff]   ;;  %vm9824_vm12 = vcmask 916480   ;;  %vm9832_vm3 = vmmov %vm9800_vm5 }
 0x378   : > { %v3812_v30 = vsel %vm3073_vm2, %v9813_v55, %v3811_v61  ;;  %3819 = vst.msk [vmem:[#allocation3 + $0x2f4] sm:$0x3] %vm9817_vm10, %v3813_v36  ;;  %v2242_v32 = vpop.permute.xlu1 %2241  ;;  %2575 = vst [vmem:[#allocation3 + $0x1d4] sm:$0xcc] %v2570_v18  ;;  %v3762_v56 = vrot.slane %v3759_v40, 4  ;;  %5935 = vmatprep.subr.bf16.mxu0 %v6840_v12  ;;  %vm9823_vm2 = vcmask 244736  }
 0x379   : > { %3818 = vst [vmem:[#allocation3 + $0x2ec] sm:$0x33] %v3812_v30  ;;  %v2245_v52 = vrot.slane %v2242_v32, 4  ;;  %2255 = vst.msk [vmem:[#allocation3 + $0x1a0] sm:$0x3] %vm9818_vm4, %v2242_v32  ;;  %5936 = vmatpush1.bf16.msra.mxu0 %v6838_v54  ;;  %vm9840_vm10 = vcmask 900096  }
 0x37a   : > { %v3765_v37 = vsel %vm443_vm8, %v9822_v15, %v3762_v56  ;;  %v3767_v48 = vsel %vm9823_vm2, %v3759_v40, %v3762_v56  ;;  %vm9825_vm13 = vmmov %vm9823_vm2  ;;  %v9843_v29 = vld [vmem:[#allocation28_spill] sm:$0xff] }
 0x37b   : > { %v2248_v58 = vsel %vm443_vm8, %v9820_v19, %v2245_v52  ;;  %v3766_v13 = vsel %vm9825_vm13, %v9821_v44, %v3765_v37  ;;  %3773 = vst.msk [vmem:[#allocation3 + $0x2e0] sm:$0xc] %vm9826_vm9, %v3767_v48  ;;  %v3852_v21 = vpop.permute.xlu0 %3851  ;;  %vm9833_vm5 = vmmov %vm9827_vm1  ;;  %v9844_v61 = vrot.slane %v9843_v29, 4  ;;  %v9845_v31 = vld [vmem:[#allocation44_spill] sm:$0xff]  ;;  %v9852_v44 = vld [vmem:[#allocation27_spill] sm:$0xff] }
 0x37c   : > { %v2249_v60 = vsel %vm9824_vm12, %v9819_v59, %v2248_v58  ;;  %v2333_v46 = vpop.permute.xlu1 %2332  ;;  %3772 = vst [vmem:[#allocation3 + $0x2d8] sm:$0xcc] %v3766_v13  ;;  %v3855_v62 = vrot.slane %v3852_v21, 4  ;;  %vm9834_vm6 = vmmov %vm9832_vm3  ;;  %v9846_v49 = vrot.slane %v9845_v31, 4  ;;  %vm9847_vm12 = vcmask 867328   ;;  %v9850_v59 = vld [vmem:[#allocation45_spill] sm:$0xff] }
 0x37d   : > { %2254 = vst [vmem:[#allocation3 + $0x198] sm:$0x33] %v2249_v60  ;;  %v2336_v20 = vrot.slane %v2333_v46, 4  ;;  %2346 = vst.msk [vmem:[#allocation3 + $0x1b4] sm:$0x3] %vm9827_vm1, %v2333_v46  ;;  %v9851_v19 = vrot.slane %v9850_v59, 4 }
 0x37e   : > { %v3858_v39 = vsel %vm443_vm8, %v9830_v11, %v3855_v62  ;;  %v3860_v16 = vsel %vm3121_vm15, %v3852_v21, %v3855_v62  ;;  %vm9841_vm4 = vmmov %vm9827_vm1  ;;  %v9853_v15 = vrot.slane %v9852_v44, 4  ;;  %v9857_v62 = vld [vmem:[#allocation47_spill] sm:$0xff] }
 0x37f   : > { %v2339_v6 = vsel %vm443_vm8, %v9828_v14, %v2336_v20  ;;  %v3859_v42 = vsel %vm3121_vm15, %v9829_v5, %v3858_v39  ;;  %3866 = vst.msk [vmem:[#allocation3 + $0x2f4] sm:$0xc] %vm9832_vm3, %v3860_v16  ;;  %v2288_v53 = vpop.permute.xlu0 %2287  ;;  %v6841_v0 = vld [vmem:[#allocation3 + $0x1c0] ss:$20 sps:$4 sm:$0xff]   ;;  %v6843_v27 = vld [vmem:[#allocation3 + $0x1c4] ss:$20 sps:$4 sm:$0xff]   ;;  %vm9842_vm2 = vmmov %vm9832_vm3 }
 0x380   : > { %v2340_v45 = vsel %vm9831_vm14, %v8617_v34, %v2339_v6  ;;  %v3529_v50 = vpop.permute.xlu1 %3528  ;;  %3865 = vst [vmem:[#allocation3 + $0x2ec] sm:$0xcc] %v3859_v42  ;;  %v2291_v35 = vrot.slane %v2288_v53, 4  ;;  %2301 = vst.msk [vmem:[#allocation3 + $0x1a0] sm:$0xc] %vm9834_vm6, %v2288_v53  ;;  %5910 = vmatprep.subr.bf16.mxu1 %v6843_v27  ;;  %v9836_v34 = vrot.slane %v9835_v57, 4 }
 0x381   : > { %2345 = vst [vmem:[#allocation3 + $0x1ac] sm:$0x33] %v2340_v45  ;;  %v3532_v17 = vrot.slane %v3529_v50, 4  ;;  %3543 = vst.msk [vmem:[#allocation3 + $0x2b8] sm:$0x3] %vm9833_vm5, %v3529_v50  ;;  %5911 = vmatpush2.bf16.msra.mxu1 %v6841_v0  ;;  %vm9839_vm15 = vcmask 719872  }
 0x382   : > { %v2294_v28 = vsel %vm443_vm8, %v9838_v47, %v2291_v35  ;;  %vm9848_vm13 = vmmov %vm9827_vm1  ;;  %vm9854_vm1 = vcmask 703488   ;;  %v9858_v41 = vrot.slane %v9857_v62, 4  ;;  %v9859_v6 = vld [vmem:[#allocation29_spill] sm:$0xff]  ;;  %v9864_v27 = vld [vmem:[#allocation30_spill] sm:$0xff] }
 0x383   : > { %v3536_v51 = vsel %vm443_vm8, %v9836_v34, %v3532_v17  ;;  %v2295_v2 = vsel %vm9840_vm10, %v9837_v3, %v2294_v28  ;;  %v2379_v33 = vpop.permute.xlu0 %2378  ;;  %vm9849_vm9 = vmmov %vm9842_vm2  ;;  %v9860_v5 = vrot.slane %v9859_v6, 4  ;;  %v9865_v17 = vrot.slane %v9864_v27, 4 }
 0x384   : > { %v3537_v8 = vsel %vm9839_vm15, %v9835_v57, %v3536_v51  ;;  %v3622_v1 = vpop.permute.xlu1 %3621  ;;  %2300 = vst [vmem:[#allocation3 + $0x198] sm:$0xcc] %v2295_v2  ;;  %v2382_v55 = vrot.slane %v2379_v33, 4  ;;  %2392 = vst.msk [vmem:[#allocation3 + $0x1b4] sm:$0xc] %vm9842_vm2, %v2379_v33  ;;  %v9866_v57 = vld [vmem:[#allocation46_spill] sm:$0xff] }
 0x385   : > { %3542 = vst [vmem:[#allocation3 + $0x2b0] sm:$0x33] %v3537_v8  ;;  %v3625_v26 = vrot.slane %v3622_v1, 4  ;;  %3635 = vst.msk [vmem:[#allocation3 + $0x2cc] sm:$0x3] %vm9841_vm4, %v3622_v1  ;;  %v9867_v34 = vrot.slane %v9866_v57, 4 }
 0x386   : > { %v2385_v24 = vsel %vm443_vm8, %v9846_v49, %v2382_v55  ;;  %vm9855_vm14 = vmmov %vm9841_vm4  ;;  %v9871_v33 = vld [vmem:[#allocation32_spill] sm:$0xff] }
 0x387   : > { %v3628_v36 = vsel %vm443_vm8, %v9844_v61, %v3625_v26  ;;  %v2386_v18 = vsel %vm9847_vm12, %v9845_v31, %v2385_v24  ;;  %v3576_v40 = vpop.permute.xlu0 %3575  ;;  %v6844_v54 = vld [vmem:[#allocation3 + $0x2d8] ss:$20 sps:$4 sm:$0xff]   ;;  %v6846_v12 = vld [vmem:[#allocation3 + $0x2dc] ss:$20 sps:$4 sm:$0xff]   ;;  %vm9856_vm3 = vmmov %vm9842_vm2  ;;  %v9872_v26 = vrot.slane %v9871_v33, 4 }
 0x388   : > { %v3629_v30 = vsel %vm2154_vm11, %v9843_v29, %v3628_v36  ;;  %v2056_v32 = vpop.permute.xlu1 %2055  ;;  %2391 = vst [vmem:[#allocation3 + $0x1ac] sm:$0xcc] %v2386_v18  ;;  %v3579_v56 = vrot.slane %v3576_v40, 4  ;;  %3590 = vst.msk [vmem:[#allocation3 + $0x2b8] sm:$0xc] %vm9849_vm9, %v3576_v40  ;;  %5937 = vmatprep.subr.bf16.mxu0 %v6846_v12  ;;  %v9873_v29 = vld [vmem:[#allocation48_spill] sm:$0xff] }
 0x389   : > { %3634 = vst [vmem:[#allocation3 + $0x2c4] sm:$0x33] %v3629_v30  ;;  %v2059_v52 = vrot.slane %v2056_v32, 4  ;;  %2070 = vst.msk [vmem:[#allocation3 + $0x178] sm:$0x3] %vm9848_vm13, %v2056_v32  ;;  %5938 = vmatpush1.bf16.msra.mxu0 %v6844_v54  ;;  %v9874_v61 = vrot.slane %v9873_v29, 4 }
 0x38a   : > { %v3583_v37 = vsel %vm443_vm8, %v9853_v15, %v3579_v56  ;;  %vm9862_vm5 = vmmov %vm9841_vm4  ;;  %v9879_v12 = vld [vmem:[#allocation49_spill] sm:$0xff]  ;;  %vm9883_vm13 = vcmask 392192   ;;  %vm9884_vm9 = vcmask 769024  }
 0x38b   : > { %v2063_v58 = vsel %vm443_vm8, %v9851_v19, %v2059_v52  ;;  %v3584_v60 = vsel %vm9854_vm1, %v9852_v44, %v3583_v37  ;;  %v3668_v46 = vpop.permute.xlu0 %3667  ;;  %vm9863_vm6 = vmmov %vm9842_vm2  ;;  %v9880_v52 = vrot.slane %v9879_v12, 4 }
 0x38c   : > { %v2064_v48 = vsel %vm2061_vm7, %v9850_v59, %v2063_v58  ;;  %v2149_v13 = vpop.permute.xlu1 %2148  ;;  %3589 = vst [vmem:[#allocation3 + $0x2b0] sm:$0xcc] %v3584_v60  ;;  %v3671_v20 = vrot.slane %v3668_v46, 4  ;;  %3681 = vst.msk [vmem:[#allocation3 + $0x2cc] sm:$0xc] %vm9856_vm3, %v3668_v46  ;;  %vm9861_vm7 = vcmask 277504  }
 0x38d   : > { %2069 = vst [vmem:[#allocation3 + $0x170] sm:$0x33] %v2064_v48  ;;  %v2152_v21 = vrot.slane %v2149_v13, 4  ;;  %2163 = vst.msk [vmem:[#allocation3 + $0x18c] sm:$0x3] %vm9855_vm14, %v2149_v13  ;;  %v9881_v59 = vld [vmem:[#allocation31_spill] sm:$0xff] }
 0x38e   : > { %v3674_v11 = vsel %vm443_vm8, %v9860_v5, %v3671_v20  ;;  %vm9869_vm15 = vmmov %vm9841_vm4  ;;  %v9882_v19 = vrot.slane %v9881_v59, 4 }
 0x38f   : > { %v2156_v14 = vsel %vm443_vm8, %v9858_v41, %v2152_v21  ;;  %v3675_v16 = vsel %vm9861_vm7, %v9859_v6, %v3674_v11  ;;  %v2103_v45 = vpop.permute.xlu0 %2102  ;;  %v6847_v42 = vld [vmem:[#allocation3 + $0x198] ss:$20 sps:$4 sm:$0xff]   ;;  %v6849_v50 = vld [vmem:[#allocation3 + $0x19c] ss:$20 sps:$4 sm:$0xff]   ;;  %vm9870_vm10 = vmmov %vm9842_vm2 }
 0x390   : > { %v2157_v39 = vsel %vm2154_vm11, %v9857_v62, %v2156_v14  ;;  %v3345_v22 = vpop.permute.xlu1 %3344  ;;  %3680 = vst [vmem:[#allocation3 + $0x2c4] sm:$0xcc] %v3675_v16  ;;  %v2106_v0 = vrot.slane %v2103_v45, 4  ;;  %2117 = vst.msk [vmem:[#allocation3 + $0x178] sm:$0xc] %vm9863_vm6, %v2103_v45  ;;  %5912 = vmatprep.subr.bf16.mxu1 %v6849_v50  ;;  %vm9868_vm11 = vcmask 310272  }
 0x391   : > { %2162 = vst [vmem:[#allocation3 + $0x184] sm:$0x33] %v2157_v39  ;;  %v3348_v53 = vrot.slane %v3345_v22, 4  ;;  %3358 = vst.msk [vmem:[#allocation3 + $0x290] sm:$0x3] %vm9862_vm5, %v3345_v22  ;;  %5913 = vmatpush2.bf16.msra.mxu1 %v6847_v42  ;;  %v9887_v21 = vld [vmem:[#allocation33_spill] sm:$0xff] }
 0x392   : > { %v2110_v51 = vsel %vm443_vm8, %v9867_v34, %v2106_v0  ;;  %vm9876_vm4 = vmmov %vm9861_vm7  ;;  %v9888_v20 = vrot.slane %v9887_v21, 4  ;;  %vm9890_vm7 = vcmask 736256   ;;  %v9895_v50 = vrot.slane %v8696_v7, 4 }
 0x393   : > { %v3351_v35 = vsel %vm443_vm8, %v9865_v17, %v3348_v53  ;;  %v2111_v47 = vsel %vm9868_vm11, %v9866_v57, %v2110_v51  ;;  %v2196_v8 = vpop.permute.xlu0 %2195  ;;  %vm9877_vm2 = vmmov %vm9862_vm5  ;;  %v9900_v51 = vld [vmem:[#allocation36_spill] sm:$0xff] }
 0x394   : > { %v3352_v3 = vsel %vm2613_vm0, %v9864_v27, %v3351_v35  ;;  %v3436_v28 = vpop.permute.xlu1 %3435  ;;  %2116 = vst [vmem:[#allocation3 + $0x170] sm:$0xcc] %v2111_v47  ;;  %v2199_v1 = vrot.slane %v2196_v8, 4  ;;  %2210 = vst.msk [vmem:[#allocation3 + $0x18c] sm:$0xc] %vm9870_vm10, %v2196_v8  ;;  %vm9875_vm0 = vcmask 752640  }
 0x395   : > { %3357 = vst [vmem:[#allocation3 + $0x288] sm:$0x33] %v3352_v3  ;;  %v3439_v2 = vrot.slane %v3436_v28, 4  ;;  %3450 = vst.msk [vmem:[#allocation3 + $0x2a4] sm:$0x3] %vm9869_vm15, %v3436_v28  ;;  %vm9898_vm10 = vcmask 375808  }
 0x396   : > { %v2203_v36 = vsel %vm443_vm8, %v9874_v61, %v2199_v1  ;;  %vm9878_vm12 = vmmov %vm9856_vm3  ;;  %v9901_v3 = vrot.slane %v9900_v51, 4 }
 0x397   : > { %v3443_v55 = vsel %vm443_vm8, %v9872_v26, %v3439_v2  ;;  %v2204_v49 = vsel %vm9876_vm4, %v9873_v29, %v2203_v36  ;;  %v3391_v30 = vpop.permute.xlu0 %3390  ;;  %v6850_v18 = vld [vmem:[#allocation3 + $0x2b0] ss:$20 sps:$4 sm:$0xff]   ;;  %v6852_v32 = vld [vmem:[#allocation3 + $0x2b4] ss:$20 sps:$4 sm:$0xff]   ;;  %vm9885_vm1 = vmmov %vm9877_vm2  ;;  %vm9902_vm4 = vcmask 97280  }
 0x398   : > { %v3444_v31 = vsel %vm9875_vm0, %v9871_v33, %v3443_v55  ;;  %v1874_v24 = vpop.permute.xlu1 %1873  ;;  %2209 = vst [vmem:[#allocation3 + $0x184] sm:$0xcc] %v2204_v49  ;;  %v3394_v54 = vrot.slane %v3391_v30, 4  ;;  %3404 = vst.msk [vmem:[#allocation3 + $0x290] sm:$0xc] %vm9878_vm12, %v3391_v30  ;;  %5939 = vmatprep.subr.bf16.mxu0 %v6852_v32  ;;  %v9906_v29 = vld [vmem:[#allocation35_spill] sm:$0xff] }
 0x399   : > { %3449 = vst [vmem:[#allocation3 + $0x29c] sm:$0x33] %v3444_v31  ;;  %v1877_v40 = vrot.slane %v1874_v24, 4  ;;  %1887 = vst.msk [vmem:[#allocation3 + $0x150] sm:$0x3] %vm9877_vm2, %v1874_v24  ;;  %5940 = vmatpush1.bf16.msra.mxu0 %v6850_v18  ;;  %v9907_v61 = vrot.slane %v9906_v29, 4 }
 0x39a   : > { %v3397_v58 = vsel %vm443_vm8, %v9882_v19, %v3394_v54  ;;  %vm9886_vm14 = vmmov %vm9856_vm3  ;;  %vm9889_vm3 = vcmask 359424   ;;  %v9911_v24 = vld [vmem:[#allocation37_spill] sm:$0xff] }
 0x39b   : > { %v1880_v56 = vsel %vm443_vm8, %v9880_v52, %v1877_v40  ;;  %v3398_v15 = vsel %vm9884_vm9, %v9881_v59, %v3397_v58  ;;  %v3483_v48 = vpop.permute.xlu0 %3482  ;;  %vm9891_vm5 = vmmov %vm9863_vm6  ;;  %vm9894_vm6 = vcmask 130048   ;;  %vm9908_vm9 = vcmask 113664   ;;  %v6866_v58 = vld [vmem:[#allocation3 + $0x380] ss:$20 sps:$4 sm:$0xff]  }
 0x39c   : > { %v1881_v44 = vsel %vm9883_vm13, %v9879_v12, %v1880_v56  ;;  %v1965_v37 = vpop.permute.xlu1 %1964  ;;  %3403 = vst [vmem:[#allocation3 + $0x288] sm:$0xcc] %v3398_v15  ;;  %v3486_v13 = vrot.slane %v3483_v48, 4  ;;  %3497 = vst.msk [vmem:[#allocation3 + $0x2a4] sm:$0xc] %vm9886_vm14, %v3483_v48  ;;  %vm9905_vm13 = vcmask 343040  }
 0x39d   : > { %1886 = vst [vmem:[#allocation3 + $0x148] sm:$0x33] %v1881_v44  ;;  %v1968_v60 = vrot.slane %v1965_v37, 4  ;;  %1978 = vst.msk [vmem:[#allocation3 + $0x164] sm:$0x3] %vm9885_vm1, %v1965_v37  ;;  %v9912_v30 = vrot.slane %v9911_v24, 4 }
 0x39e   : > { %v3490_v62 = vsel %vm443_vm8, %v9888_v20, %v3486_v13  ;;  %vm9896_vm11 = vmmov %vm9894_vm6  ;;  %v9916_v52 = vmov 0   ;;  %v6862_v56 = vld [vmem:[#allocation3 + $0x3a8] ss:$20 sps:$4 sm:$0xff]   ;;  %v6869_v37 = vld [vmem:[#allocation3 + $0x358] ss:$20 sps:$4 sm:$0xff]  }
 0x39f   : > { %v1971_v46 = vsel %vm443_vm8, %v1967_v23, %v1968_v60  ;;  %v3491_v14 = vsel %vm9890_vm7, %v9887_v21, %v3490_v62  ;;  %v1920_v5 = vpop.permute.xlu0 %1919  ;;  %v6853_v11 = vld [vmem:[#allocation3 + $0x170] ss:$20 sps:$4 sm:$0xff]   ;;  %v6855_v39 = vld [vmem:[#allocation3 + $0x174] ss:$20 sps:$4 sm:$0xff]   ;;  %vm9897_vm15 = vmmov %vm9885_vm1 }
 0x3a0   : > { %v1972_v41 = vsel %vm9889_vm3, %v8707_v4, %v1971_v46  ;;  %v4826_v6 = vpop.permute.xlu1 %4825  ;;  %3496 = vst [vmem:[#allocation3 + $0x29c] sm:$0xcc] %v3491_v14  ;;  %v1923_v22 = vrot.slane %v1920_v5, 4  ;;  %1933 = vst.msk [vmem:[#allocation3 + $0x150] sm:$0xc] %vm9891_vm5, %v1920_v5  ;;  %5914 = vmatprep.subr.bf16.mxu1 %v6855_v39  ;;  %v9892_v23 = vld [vmem:[#allocation34_spill] sm:$0xff] }
 0x3a1   : > { %1977 = vst [vmem:[#allocation3 + $0x15c] sm:$0x33] %v1972_v41  ;;  %v4829_v16 = vrot.slane %v4826_v6, 4  ;;  %v9893_v45 = vrot.slane %v9892_v23, 4  ;;  %5915 = vmatpush2.bf16.msra.mxu1 %v6853_v11  ;;  %vm9899_vm0 = vmmov %vm9891_vm5  ;;  %vm9913_vm3 = vcmask 80896   ;;  %v9918_v48 = vld [vmem:[#allocation38_spill] sm:$0xff] }
 0x3a2   : > { %v1926_v53 = vsel %vm443_vm8, %v9895_v50, %v1923_v22  ;;  %vm9903_vm2 = vmmov %vm9902_vm4  ;;  %v6867_v44 = vld [vmem:[#allocation3 + $0x268] ss:$20 sps:$4 sm:$0xff]   ;;  %v6870_v60 = vld [vmem:[#allocation3 + $0x240] ss:$20 sps:$4 sm:$0xff]  }
 0x3a3   : > { %v4833_v42 = vsel %vm443_vm8, %v9893_v45, %v4829_v16  ;;  %v4835_v4 = vsel %vm9894_vm6, %v4826_v6, %v4829_v16  ;;  %v1927_v27 = vsel %vm9898_vm10, %v8696_v7, %v1926_v53  ;;  %v2011_v35 = vpop.permute.xlu0 %2010  ;;  %vm9904_vm12 = vmmov %vm9885_vm1  ;;  %v6868_v15 = vld [vmem:[#allocation3 + $0x128] ss:$20 sps:$4 sm:$0xff]   ;;  %v6872_v13 = vld [vmem:[#allocation3 + $0x330] ss:$20 sps:$4 sm:$0xff]  }
 0x3a4   : > { %v4834_v0 = vsel %vm9896_vm11, %v9892_v23, %v4833_v42  ;;  %4841 = vst.msk [vmem:[#allocation3 + $0x3d0] sm:$0x3] %vm9897_vm15, %v4835_v4  ;;  %v4921_v17 = vpop.permute.xlu1 %4920  ;;  %1932 = vst [vmem:[#allocation3 + $0x148] sm:$0xcc] %v1927_v27  ;;  %v2014_v34 = vrot.slane %v2011_v35, 4  ;;  %v9919_v46 = vld [vmem:[#allocation39_spill] sm:$0xff] }
 0x3a5   : > { %4840 = vst [vmem:[#allocation3 + $0x3c8] sm:$0x33] %v4834_v0  ;;  %v4924_v57 = vrot.slane %v4921_v17, 4  ;;  %2024 = vst.msk [vmem:[#allocation3 + $0x164] sm:$0xc] %vm9899_vm0, %v2011_v35  ;;  %vm6053_vm11 = vcmask 261248  }
 0x3a6   : > { %v2017_v8 = vsel %vm443_vm8, %v2013_v38, %v2014_v34  ;;  %vm9909_vm1 = vmmov %vm9908_vm9  ;;  %v6873_v21 = vld [vmem:[#allocation3 + $0x218] ss:$20 sps:$4 sm:$0xff]   ;;  %v6875_v62 = vld [vmem:[#allocation3 + $0x308] ss:$20 sps:$4 sm:$0xff]   ;;  %vm6058_vm15 = vcmask 392448  }
 0x3a7   : > { %v4928_v47 = vsel %vm443_vm8, %v9901_v3, %v4924_v57  ;;  %v4930_v28 = vsel %vm9902_vm4, %v4921_v17, %v4924_v57  ;;  %v2018_v2 = vsel %vm9905_vm13, %v8726_v9, %v2017_v8  ;;  %v4874_v1 = vpop.permute.xlu0 %4873  ;;  %v6856_v33 = vld [vmem:[#allocation3 + $0x288] ss:$20 sps:$4 sm:$0xff]   ;;  %v6858_v26 = vld [vmem:[#allocation3 + $0x28c] ss:$20 sps:$4 sm:$0xff]   ;;  %vm9910_vm14 = vmmov %vm9899_vm0  ;;  %vm6069_vm4 = vcmask 654848  }
 0x3a8   : > { %v4929_v7 = vsel %vm9903_vm2, %v9900_v51, %v4928_v47  ;;  %4936 = vst.msk [vmem:[#allocation3 + $0x3e4] sm:$0x3] %vm9904_vm12, %v4930_v28  ;;  %2023 = vst [vmem:[#allocation3 + $0x15c] sm:$0xcc] %v2018_v2  ;;  %v4877_v55 = vrot.slane %v4874_v1, 4  ;;  %5941 = vmatprep.subr.bf16.mxu0 %v6858_v26  ;;  %vm9923_vm2 = vcmask 474112  }
 0x3a9   : > { %4935 = vst [vmem:[#allocation3 + $0x3dc] sm:$0x33] %v4929_v7  ;;  %5942 = vmatpush1.bf16.msra.mxu0 %v6856_v33  ;;  %vm9914_vm7 = vmmov %vm9913_vm3  ;;  %v6874_v20 = vld [vmem:[#allocation3 + $0xd8] ss:$20 sps:$4 sm:$0xff]   ;;  %v6876_v41 = vld [vmem:[#allocation3 + $0x1f0] ss:$20 sps:$4 sm:$0xff]  }
 0x3aa   : > { %v4881_v36 = vsel %vm443_vm8, %v9907_v61, %v4877_v55  ;;  %v4883_v38 = vsel %vm9908_vm9, %v4874_v1, %v4877_v55  ;;  %vm9915_vm5 = vmmov %vm9899_vm0  ;;  %v6877_v14 = vld [vmem:[#allocation3 + $0xb0] ss:$20 sps:$4 sm:$0xff]   ;;  %v6878_v6 = vld [vmem:[#allocation3 + $0x2e0] ss:$20 sps:$4 sm:$0xff]   ;;  %vm6063_vm0 = vcmask 523648   ;;  %vm6074_vm12 = vcmask 786048  }
 0x3ab   : > { %v4882_v31 = vsel %vm9909_vm1, %v9906_v29, %v4881_v36  ;;  %4889 = vst.msk [vmem:[#allocation3 + $0x3d0] sm:$0xc] %vm9910_vm14, %v4883_v38  ;;  %v4969_v9 = vpop.permute.xlu0 %4968  ;;  %v6879_v5 = vld [vmem:[#allocation3 + $0x1c8] ss:$20 sps:$4 sm:$0xff]   ;;  %v6881_v39 = vld [vmem:[#allocation3 + $0x2b8] ss:$20 sps:$4 sm:$0xff]   ;;  %vm9922_vm10 = vmmov %vm9894_vm6 }
 0x3ac   : > { %4888 = vst [vmem:[#allocation3 + $0x3c8] sm:$0xcc] %v4882_v31  ;;  %v4972_v49 = vrot.slane %v4969_v9, 4  ;;  %v6880_v11 = vld [vmem:[#allocation3 + $0x88] ss:$20 sps:$4 sm:$0xff]   ;;  %vm6079_vm13 = vcmask 917248  }
 0x3ad   : > { %v6882_v16 = vld [vmem:[#allocation3 + $0x1a0] ss:$20 sps:$4 sm:$0xff]   ;;  %v6884_v23 = vld [vmem:[#allocation3 + $0x290] ss:$20 sps:$4 sm:$0xff]   ;;  %v6885_v45 = vld [vmem:[#allocation3 + $0x178] ss:$20 sps:$4 sm:$0xff]  }
 0x3ae   : > { %v4976_v18 = vsel %vm443_vm8, %v9912_v30, %v4972_v49  ;;  %v4978_v32 = vsel %vm9913_vm3, %v4969_v9, %v4972_v49  ;;  %vm9917_vm8 = vmmov %vm9894_vm6  ;;  %v6883_v22 = vld [vmem:[#allocation3 + $0x60] ss:$20 sps:$4 sm:$0xff]   ;;  %v6886_v42 = vld [vmem:[#allocation3 + $0x38] ss:$20 sps:$4 sm:$0xff]   ;;  %vm6084_vm9 = vcmask 1048448   ;;  %vm9925_vm1 = vcmask 932864  }
 0x3af   : > { %v4977_v40 = vsel %vm9914_vm7, %v9911_v24, %v4976_v18  ;;  %4984 = vst.msk [vmem:[#allocation3 + $0x3e4] sm:$0xc] %vm9915_vm5, %v4978_v32  ;;  %v6859_v54 = vld [vmem:[#allocation3 + $0x148] ss:$20 sps:$4 sm:$0xff]   ;;  %v6861_v12 = vld [vmem:[#allocation3 + $0x14c] ss:$20 sps:$4 sm:$0xff]  }
 0x3b0   : > { %4983 = vst [vmem:[#allocation3 + $0x3dc] sm:$0xcc] %v4977_v40  ;;  %5916 = vmatprep.subr.bf16.mxu1 %v6861_v12  ;;  %v6888_v50 = vld [vmem:[#allocation3 + $0x150] ss:$20 sps:$4 sm:$0xff]  }
 0x3b1   : > { %5917 = vmatpush2.bf16.msra.mxu1 %v6859_v54  ;;  %v6889_v53 = vld [vmem:[#allocation3 + $0x10] ss:$20 sps:$4 sm:$0xff]  }
 0x3b2   : > { %6008 = vmatprep.subr.bf16.mxu1 %v9916_v52 }
 0x3b4   : > { %5919 = vmatmul.mubr.bf16.vlgmr.msra.gmra.mxu1 %v8790_v25 }
 0x3b5   : > { %6009 = vmatpush1.bf16.msra.mxu1 %v6862_v56  ;;  %6495 = vmatprep.mubr.msk.bf16.mxu1 %vm9917_vm8, %v7986_v10  ;;  %v6871_v10 = vld [vmem:[#allocation3 + $0x100] ss:$20 sps:$4 sm:$0xff]  }
 0x3b6   : > { %6010 = vmatprep.subr.bf16.mxu1 %v9916_v52  ;;  %v6887_v4 = vld [vmem:[#allocation3 + $0x3d0] ss:$20 sps:$4 sm:$0xff]  }
 0x3b7   : > { %v6863_v59 = vld [vmem:[#allocation3 + $0x3c8] ss:$20 sps:$4 sm:$0xff]   ;;  %v6865_v19 = vld [vmem:[#allocation3 + $0x3cc] ss:$20 sps:$4 sm:$0xff]  }
 0x3b8   : > { %5957 = vmatprep.subr.bf16.mxu0 %v6865_v19 }
 0x3b9   : > { %5958 = vmatpush2.bf16.msra.mxu0 %v6863_v59  ;;  %6011 = vmatpush1.bf16.msra.mxu1 %v6866_v58 }
 0x3ba   : > { %6503 = vmatprep.subr.bf16.mxu0 %v6867_v44  ;;  %6012 = vmatprep.subr.bf16.mxu1 %v9916_v52 }
 0x3bc   : > { %5960 = vmatmul.mubr.bf16.vlgmr.msra.gmra.mxu0 %v9918_v48 }
 0x3bd   : > { %6504 = vmatpush3.bf16.msra.mxu0 %v6868_v15  ;;  %6013 = vmatpush1.bf16.msra.mxu1 %v6869_v37 }
 0x3be   : > { %6505 = vmatprep.subr.bf16.mxu0 %v6870_v60  ;;  %6014 = vmatprep.subr.bf16.mxu1 %v9916_v52 }
 0x3bf   : > { %6000 = vmatprep.mubr.bf16.mxu0 %v9919_v46 }
 0x3c1   : > { %6506 = vmatpush3.bf16.msra.mxu0 %v6871_v10  ;;  %6015 = vmatpush1.bf16.msra.mxu1 %v6872_v13 }
 0x3c2   : > { %6507 = vmatprep.subr.bf16.mxu0 %v6873_v21  ;;  %6016 = vmatprep.subr.bf16.mxu1 %v9916_v52 }
 0x3c5   : > { %6508 = vmatpush3.bf16.msra.mxu0 %v6874_v20  ;;  %6017 = vmatpush1.bf16.msra.mxu1 %v6875_v62 }
 0x3c6   : > { %6509 = vmatprep.subr.bf16.mxu0 %v6876_v41  ;;  %6018 = vmatprep.subr.bf16.mxu1 %v9916_v52 }
 0x3c9   : > { %6510 = vmatpush3.bf16.msra.mxu0 %v6877_v14  ;;  %6019 = vmatpush1.bf16.msra.mxu1 %v6878_v6 }
 0x3ca   : > { %6511 = vmatprep.subr.bf16.mxu0 %v6879_v5  ;;  %6020 = vmatprep.subr.bf16.mxu1 %v9916_v52 }
 0x3cd   : > { %6512 = vmatpush3.bf16.msra.mxu0 %v6880_v11  ;;  %6021 = vmatpush1.bf16.msra.mxu1 %v6881_v39 }
 0x3ce   : > { %6513 = vmatprep.subr.bf16.mxu0 %v6882_v16  ;;  %6022 = vmatprep.subr.bf16.mxu1 %v9916_v52 }
 0x3d1   : > { %6514 = vmatpush3.bf16.msra.mxu0 %v6883_v22  ;;  %6023 = vmatpush1.bf16.msra.mxu1 %v6884_v23 }
 0x3d2   : > { %6515 = vmatprep.subr.bf16.mxu0 %v6885_v45  ;;  %6038 = vmatprep.subr.bf16.mxu1 %v9916_v52 }
 0x3d5   : > { %6516 = vmatpush3.bf16.msra.mxu0 %v6886_v42  ;;  %6039 = vmatpush2.bf16.msra.mxu1 %v6887_v4 }
 0x3d6   : > { %6517 = vmatprep.subr.bf16.mxu0 %v6888_v50 }
 0x3d8   : > { %6041 = vmatmul.mubr.bf16.vlgmr.msra.gmra.mxu1 %v9918_v48 }
 0x3d9   : > { %6518 = vmatpush3.bf16.msra.mxu0 %v6889_v53 }
 0x3dc   : > { %6001 = vmatmul.mubr.bf16.vlgmr.msra.gmra.mxu0 %v8790_v25 }
 0x3f5   : > { %v5838_v0 = vpop.f32.mrf.mxu0 }
 0x3f6   : > { %v5880_v27 = vadd.f32 %v9004_v43, %v5838_v0 }
 0x3f7   : > { %v5840_v17 = vpop.f32.mrf.mxu0 }
 0x3f8   : > { %6048 = vst.msk [vmem:[%s9200_s18] sm:$0xff] %vm9894_vm6, %v5880_v27  ;;  %6050 = vrot.lane.b32.xlu0 %v5880_v27, %s9592_s25  ;;  %v5882_v26 = vadd.f32 %v9019_v63, %v5840_v17  ;;  %s7087_s25 = smov 4  }
 0x3f9   : > { %v5842_v35 = vpop.f32.mrf.mxu0 }
 0x3fb   : > { %v5843_v57 = vpop.f32.mrf.mxu0 }
 0x3fc   : > { %6055 = vrot.lane.b32.xlu0 %v5880_v27, %s9674_s3  ;;  %s7085_s3 = smov 74  }
 0x46a   : > { %v6051_v25 = vpop.permute.xlu0 %6050 }
 0x46b   : > { %6054 = vst.msk [vmem:[%s9200_s18] sm:$0xff] %vm6053_vm11, %v6051_v25 }
 0x46e   : > { %v6056_v43 = vpop.permute.xlu0 %6055 }
 0x46f   : > { %6059 = vst.msk [vmem:[%s9200_s18] sm:$0xff] %vm6058_vm15, %v6056_v43 }
 0x474   : > { %v5920_v34 = vpop.f32.mrf.mxu1 }
 0x476   : > { %v5922_v51 = vpop.f32.mrf.mxu1 }
 0x478   : > { %v5924_v3 = vpop.f32.mrf.mxu1 }
 0x47a   : > { %v5925_v47 = vpop.f32.mrf.mxu1 }
 0x47c   : > { %v5961_v28 = vpop.f32.mrf.mxu0 }
 0x47d   : > { %v5962_v8 = vadd.f32 %v5961_v28, %v5920_v34 }
 0x47e   : > { %v5963_v7 = vpop.f32.mrf.mxu0 }
 0x47f   : > { %6100 = vrot.lane.b32.xlu0 %v5962_v8, %s9920_s19  ;;  %6087 = vrot.lane.b32.xlu1 %v5962_v8, %s9590_s10  ;;  %v5964_v33 = vadd.f32 %v5963_v7, %v5922_v51  ;;  %s7089_s10 = smov [#allocation9]  }
 0x480   : > { %v5965_v2 = vpop.f32.mrf.mxu0  ;;  %s6948_s5 = sshll.u32 %s7089_s10, 4  ;;  %s6949_s5 = int_to_ptr.vmem [resolvable:$false] %s6948_s5 }
 0x481   : > { %s6950_s13 = scalar_lea.vmem %s6949_s5, 512  ;;  %p6951_p1 = scmp.lt.s32.totalorder %s6166_s27, %s6949_s5 }
 0x482   : > { %v5966_v1 = vpop.f32.mrf.mxu0  ;;  %p6952_p2 = scmp.lt.s32.totalorder %s6950_s13, %s6944_s30 }
 0x483   : > { %6060 = vrot.lane.b32.xlu0 %v5880_v27, %s7085_s3  ;;  %6091 = vrot.lane.b32.xlu1 %v5962_v8, %s9678_s9  ;;  %s7088_s9 = smov 2  }
 0x484   : > { %p6953_p0 = por %p6952_p2, %p6951_p1 }
 0x487   : > { %6095 = vrot.lane.b32.xlu1 %v5962_v8, %s7086_s22  ;;  %6108 = vrot.lane.b32.xlu0 %v5964_v33, %s9664_s26 }
 0x48b   : > { %6112 = vrot.lane.b32.xlu0 %v5964_v33, %s9637_s23  ;;  %6102 = vrot.lane.b32.xlu1 %v5964_v33, %s9920_s19  ;;  %s9926_s23 = sld [smem:[#allocation21_spill]] }
 0x48f   : > { %6116 = vrot.lane.b32.xlu0 %v5964_v33, %s7087_s25  ;;  %6066 = vrot.lane.b32.xlu1 %v5882_v26, %s9921_s28 }
 0x491   : > { %p9928_p11 = scmp.ne.s32.totalorder %s9926_s23, 0 }
 0x493   : > { %6071 = vrot.lane.b32.xlu1 %v5882_v26, %s9670_s4  ;;  %s9924_s4 = sld [smem:[#allocation17_spill]]  ;;  %p6946_p13 = pnand %p6945_p9, %p9928_p11 }
 0x495   : > { %p6947_p10 = pneg %p6946_p13 }
 0x497   : > { %6076 = vrot.lane.b32.xlu1 %v5882_v26, %s9633_s14  ;;  %p6954_p3 = pnand %p6953_p0, %p6947_p10 }
 0x498   : > { %v6042_v55 = vpop.f32.mrf.mxu1 }
 0x499   : > { %s6502_s6 = sshll.u32 %s9924_s4, 8 }
 0x49a   : > { %v6044_v29 = vpop.f32.mrf.mxu1  ;;  %s6163_s20 = scalar_lea.hbm %s9927_s29, %s6502_s6 }
 0x49b   : > { %6121 = vrot.lane.b32.xlu1 %v5964_v33, %s9602_s7 }
 0x49c   : > { %v6519_v61 = vpop.f32.mrf.mxu0  ;;  %v6045_v36 = vpop.f32.mrf.mxu1 }
 0x49e   : > { %v6520_v38 = vpop.f32.mrf.mxu0  ;;  %v6046_v31 = vpop.f32.mrf.mxu1 }
 0x49f   : > { %v6521_v63 = vadd.f32 %v6520_v38, %v6519_v61  ;;  %6081 = vrot.lane.b32.xlu1 %v5882_v26, %s7088_s9 }
 0x4a0   : > { %v6522_v9 = vpop.f32.mrf.mxu0 }
 0x4a1   : > { %v6043_v49 = vadd.f32 %v6521_v63, %v6042_v55 }
 0x4a2   : > { %v6523_v24 = vpop.f32.mrf.mxu0 }
 0x4a3   : > { %6123 = vrot.lane.b32.xlu0 %v6043_v49, %s9602_s7  ;;  %s6143_s7 = scalar_lea.sflag [#allocation6], %s7234_s24 }
 0x4f1   : > { %v6101_v30 = vpop.permute.xlu0 %6100  ;;  %v6088_v18 = vpop.permute.xlu1 %6087 }
 0x4f2   : > { %6090 = vst.msk [vmem:[%s9200_s18 + $0x8] sm:$0xff] %vm9922_vm10, %v6088_v18 }
 0x4f5   : > { %v6061_v32 = vpop.permute.xlu0 %6060  ;;  %v6092_v40 = vpop.permute.xlu1 %6091 }
 0x4f6   : > { %6064 = vst.msk [vmem:[%s9200_s18] sm:$0xff] %vm6063_vm0, %v6061_v32 }
 0x4f7   : > { %6094 = vst.msk [vmem:[%s9200_s18 + $0x8] sm:$0xff] %vm6053_vm11, %v6092_v40 }
 0x4f9   : > { %v6096_v54 = vpop.permute.xlu1 %6095  ;;  %v6109_v12 = vpop.permute.xlu0 %6108 }
 0x4fa   : > { %6098 = vst.msk [vmem:[%s9200_s18 + $0x8] sm:$0xff] %vm6058_vm15, %v6096_v54 }
 0x4fd   : > { %v6113_v52 = vpop.permute.xlu0 %6112  ;;  %v6103_v56 = vpop.permute.xlu1 %6102 }
 0x4fe   : > { %v6105_v59 = vsel %vm9923_vm2, %v6101_v30, %v6103_v56 }
 0x4ff   : > { %6107 = vst.msk [vmem:[%s9200_s18 + $0x8] sm:$0xff] %vm6063_vm0, %v6105_v59 }
 0x500   : > { %6111 = vst.msk [vmem:[%s9200_s18 + $0x8] sm:$0xff] %vm6069_vm4, %v6109_v12 }
 0x501   : > { %v6117_v19 = vpop.permute.xlu0 %6116  ;;  %6115 = vst.msk [vmem:[%s9200_s18 + $0x8] sm:$0xff] %vm6074_vm12, %v6113_v52  ;;  %v6067_v58 = vpop.permute.xlu1 %6066 }
 0x502   : > { %6119 = vst.msk [vmem:[%s9200_s18 + $0x8] sm:$0xff] %vm6079_vm13, %v6117_v19 }
 0x503   : > { %6070 = vst.msk [vmem:[%s9200_s18] sm:$0xff] %vm6069_vm4, %v6067_v58 }
 0x505   : > { %v6072_v44 = vpop.permute.xlu1 %6071 }
 0x506   : > { %6075 = vst.msk [vmem:[%s9200_s18] sm:$0xff] %vm6074_vm12, %v6072_v44 }
 0x509   : > { %v6077_v15 = vpop.permute.xlu1 %6076 }
 0x50a   : > { %6080 = vst.msk [vmem:[%s9200_s18] sm:$0xff] %vm6079_vm13, %v6077_v15 }
 0x50d   : > { %v6122_v37 = vpop.permute.xlu1 %6121 }
 0x511   : > { %v6082_v48 = vpop.permute.xlu1 %6081 }
 0x512   : > { %6085 = vst.msk [vmem:[%s9200_s18] sm:$0xff] %vm6084_vm9, %v6082_v48 }
 0x515   : > { %v6124_v60 = vpop.permute.xlu0 %6123 }
 0x516   : > { %v6126_v10 = vsel %vm9925_vm1, %v6122_v37, %v6124_v60 }
 0x517   : > { %6128 = vst.msk [vmem:[%s9200_s18 + $0x8] sm:$0xff] %vm6084_vm9, %v6126_v10 }
 0x519   : > { %v6129_v13 = vld [vmem:[%s9200_s18] sm:$0xff] }
 0x51a   : > { %v6136_v20 = vmul.f32 %v6129_v13, %v6129_v13 }
 0x51e   : > { %v6130_v46 = vld [vmem:[%s9200_s18 + $0x8] sm:$0xff] }
 0x51f   : > { %v6131_v21 = vadd.f32 %v6130_v46, %v6129_v13  ;;  %v6137_v62 = vmul.f32 %v6130_v46, %v6130_v46 }
 0x521   : > { %6132 = vadd.xlane.f32.xlu0 %v6131_v21  ;;  %v6138_v41 = vadd.f32 %v6137_v62, %v6136_v20 }
 0x523   : > { %6139 = vadd.xlane.f32.xlu1 %v6138_v41 }
 0x524   : > { %6957 = shalt.err (!%p6954_p3)
}
 0x525   : > { %s6958_s21 = scalar_lea.hbm %s6163_s20, 256  ;;  %s6962_s26 = scalar_lea.hbm %s9927_s29, 512 }
 0x526   : > { %p6959_p12 = scmp.ne.s32.totalorder %s6163_s20, %s6958_s21  ;;  %p6963_p6 = scmp.lt.s32.totalorder %s6163_s20, %s9927_s29 }
 0x527   : > { %p6964_p4 = scmp.lt.s32.totalorder %s6962_s26, %s6958_s21 }
 0x528   : > { %p6960_p5 = pnand %p6959_p12, %p9928_p11 }
 0x529   : > { %p6965_p8 = por %p6964_p4, %p6963_p6 }
 0x52a   : > { %p6961_p7 = pneg %p6960_p5 }
 0x52c   : > { %p6966_p9 = pnand %p6965_p8, %p6961_p7 }
 0x52e   : > { %6969 = shalt.err (!%p6966_p9)
}
 0x52f   : > { %6531 = dma.vmem_to_hbm [thread:$0]  (%p9928_p11), %s6166_s27, 256, %s6163_s20, %s6143_s7   ;;  %vm6134_vm14 = vcmask 7168  }
 0x530   : > { %p240_p13 = scmp.lt.s32.totalorder %s9924_s4, 1  ;;  %s9929_s16 = sld [smem:[#allocation53_spill]] }
 0x531   : > { %s9930_s3 = sld [smem:[#allocation54_spill]] }
 0x532   : > { %s9941_s4 = smov (!%p240_p13, %s9924_s4), 1 }
 0x533   : > { %s6310_s0 = sshll.u32 %s9941_s4, 3 }
 0x536   : > { %s243_s17 = scalar_lea.vmem %s9929_s16, %s6310_s0 }
 0x537   : > { %s247_s22 = scalar_lea.vmem %s9930_s3, %s6310_s0 }
 0x5aa   : > { %v6133_v14 = vpop.xlane.xlu0 %6132 }
 0x5ab   : > { %6135 = vst.msk [vmem:[%s243_s17] sm:$0xff] %vm6134_vm14, %v6133_v14 }
 0x5ac   : > { %v6140_v6 = vpop.xlane.xlu1 %6139 }
 0x5ad   : > { %6141 = vst.msk [vmem:[%s247_s22] sm:$0xff] %vm6134_vm14, %v6140_v6 }
 0x5ae PF: > { %s9931_s25 = sld [smem:[#allocation13_spill]] }
 0x5af   : > { %s9932_s28 = sld [smem:[#allocation18_spill]] }
 0x5b0   : > { %s9933_s9 = sld [smem:[#allocation16_spill]] }
 0x5b4   : > { %s6183_s23 = sand.u32 1, %s9931_s25  }
 0x5b5   : > { %p9934_p11 = scmp.ne.s32.totalorder %s9932_s28, 0  ;;  %s6184_s4 = scalar_lea.sflag [#allocation6], %s6183_s23 }
 0x5b6   : > { %p9935_p10 = scmp.ge.s32.totalorder %s9933_s9, 2 }
 0x5b8   : > { %p6542_p1 = pnand %p9935_p10, %p9934_p11 }
 0x5ba   : > { %p6543_p2 = pneg %p6542_p1 }
 0x5bc   : > { %6995 = dma.done.wait (%p6543_p2), %s6184_s4, 256  }
 0x5bd   : > { %6997 = vsyncadd (%p6543_p2), %s6184_s4, 4294967040  ;;  %s9936_s18 = sld [smem:[#allocation19_spill]] }
 0x5be   : > { %s9937_s15 = sld [smem:[#allocation14_spill]] }
 0x5bf   : > { %s9938_s16 = sld [smem:[#allocation15_spill]] }
 0x5c0   : > { %s9939_s17 = sld [smem:[#allocation20_spill]] }
 0x5c3   : > { %p19_p0 = scmp.ge.s32.totalorder %s9936_s18, 4  }
 0x5c5   :  { %21 = sbr.rel (!%p19_p0) target bundleno = 12 (0xc), region = 101 }
 0x5ca   :  { %6203 = vsyncpa [#allocation5], 1 }
 0x5cb   :  { %6205 = vsyncpa [#allocation5 + $0x1], 1 }
 0x5cc   :  { %6206 = vsyncpa [#allocation8], 1 }
 0x5cd   :  { %6207 = vsyncpa [#allocation6], 1 }
 0x5ce   :  { %6209 = vsyncpa [#allocation6 + $0x1], 1 }

</bundles_post_ra>
